<compile_context>
chip_gen: v5e
topology: v5e:2x2
jax: 0.10.0
libtpu: 0.0.40
codegen_flags: <defaults>
</compile_context>

<pallas_src>
import math
import functools

import jax
import jax.numpy as jnp
from jax import lax
from jax.experimental import pallas as pl
from jax.experimental.pallas import tpu as pltpu

# ----- synthetic config (small) -----
B = 2                 # batch
S = 32                # seq len (multiple of attention_window)
E = 64                # hidden_size
H = 4                 # num_attention_heads
D = E // H            # head_dim = 16
ATTN_WINDOW = 8       # config.attention_window[layer_id], even
W = ATTN_WINDOW // 2  # one_sided_attn_window_size
DROPOUT_P = 0.0       # attention_probs_dropout_prob

NEG_INF = float("-inf")


# -------------------- fused projection + attention kernel --------------------

def _longformer_kernel(x_ref, w_ref, b_ref, qm_ref, km_ref, kmp_ref, o_ref,
                       *, w, h, d, e):
    s = x_ref.shape[0]
    rh = s // h   # rows of the lane-dense (S, E) matrix per raw-.view head chunk

    # ---- fused projection: one MXU push for all six nn.Linear layers ----
    # w_ref is (E, 6E) = [Wq.T | Wk.T | Wv.T | Wqg.T | Wkg.T | Wvg.T]; the
    # 1/sqrt(head_dim) scaling is already folded into the q / q_global columns.
    y = jnp.dot(x_ref[...], w_ref[...],
                preferred_element_type=jnp.float32) + b_ref[...]        # (S, 6E)

    qm = qm_ref[...] > 0.5        # (S, 1)  True where the position is masked (query rows)
    km = km_ref[...] > 0.5        # (1, S)  same mask along the key/column axis
    kmp = kmp_ref[...] > 0.5      # (1, S)  mask permuted to the raw-.view global-key order

    q = y[:, :e]                                   # scaled query
    k = jnp.where(qm, 0.0, y[:, e:2 * e])          # key_vectors.masked_fill(mask, 0)
    v = y[:, 2 * e:3 * e]
    qg = y[0:1, 3 * e:4 * e]                       # scaled global query (token 0)
    kg = y[:, 4 * e:5 * e]                         # key_global   (lane dense)
    vg = y[:, 5 * e:6 * e]                         # value_global (lane dense)

    # ---- additive {0, -inf} bias built ONCE (band + key mask + query-row mask) ----
    row = lax.broadcasted_iota(jnp.int32, (s, s), 0)
    col = lax.broadcasted_iota(jnp.int32, (s, s), 1)
    in_band = jnp.abs(row - col) <= w
    not_qm = jnp.logical_not(qm)
    valid = in_band & not_qm & jnp.logical_not(km)
    bias = jnp.where(valid, 0.0, NEG_INF)                                   # (S, S)
    g_bias = jnp.where(not_qm & jnp.logical_not(km[:, 0:1]), 0.0, NEG_INF)  # (S, 1)
    gk_bias = jnp.where(kmp, NEG_INF, 0.0)                                  # (1, S)

    # ---- band + prepended-global-column attention, all heads batched ----
    qh = jnp.stack([q[:, i * d:(i + 1) * d] for i in range(h)], axis=0).astype(jnp.bfloat16)
    kh = jnp.stack([k[:, i * d:(i + 1) * d] for i in range(h)], axis=0).astype(jnp.bfloat16)
    vh = jnp.stack([v[:, i * d:(i + 1) * d] for i in range(h)], axis=0).astype(jnp.bfloat16)

    scores = jnp.einsum("hqd,hkd->hqk", qh, kh,
                        preferred_element_type=jnp.float32)                 # (H, S, S)
    # column 0 of the dense scores doubles as the prepended global-key column
    g_col = scores[:, :, 0:1] + g_bias                                      # (H, S, 1)
    scores = scores + bias

    m = jnp.maximum(jnp.max(scores, axis=-1, keepdims=True), g_col)
    m = jnp.where(jnp.isfinite(m), m, 0.0)
    p = jnp.exp(scores - m)
    pg = jnp.exp(g_col - m)
    denom = jnp.sum(p, axis=-1, keepdims=True) + pg
    denom = jnp.where(denom == 0.0, 1.0, denom)
    inv = 1.0 / denom
    p = p * inv                                     # masked query rows are exactly 0 already
    pg = pg * inv
    band_out = jnp.einsum("hqk,hkd->hqd", p.astype(jnp.bfloat16), vh,
                          preferred_element_type=jnp.float32)               # (H, S, D)

    # ---- global-token attention (query_global / key_global / value_global) ----
    # The reference splits key_global/value_global with a raw .view(B*H, S, D);
    # per head i that view is a re-chunking of rows [i*rh, (i+1)*rh) of the
    # lane-dense (S, E) matrix.  We rebuild it with static slices + concatenates
    # in a permuted key order (softmax + weighted sum are permutation invariant;
    # the key mask was permuted identically on the host).
    def raw_view(mat, i):
        chunk = mat[i * rh:(i + 1) * rh, :]
        return jnp.concatenate([chunk[:, c * d:(c + 1) * d] for c in range(h)], axis=0)

    qgh = jnp.stack([qg[:, i * d:(i + 1) * d] for i in range(h)], axis=0).astype(jnp.bfloat16)
    kgh = jnp.stack([raw_view(kg, i) for i in range(h)], axis=0).astype(jnp.bfloat16)
    vgh = jnp.stack([raw_view(vg, i) for i in range(h)], axis=0).astype(jnp.bfloat16)

    gs = jnp.einsum("hqd,hkd->hqk", qgh, kgh,
                    preferred_element_type=jnp.float32)                      # (H, 1, S)
    gs = gs + gk_bias
    gm = jnp.max(gs, axis=-1, keepdims=True)
    gm = jnp.where(jnp.isfinite(gm), gm, 0.0)
    ge = jnp.exp(gs - gm)
    gden = jnp.sum(ge, axis=-1, keepdims=True)
    gden = jnp.where(gden == 0.0, 1.0, gden)
    gp = ge / gden
    g_out = jnp.einsum("hqk,hkd->hqd", gp.astype(jnp.bfloat16), vgh,
                       preferred_element_type=jnp.float32)                   # (H, 1, D)

    # ---- lane-slice writes into the (S, E) VMEM output block ----
    for i in range(h):
        lo = i * d
        # band output + global-column contribution (value of the global token, unmasked)
        o_ref[:, lo:lo + d] = (band_out[i] + pg[i] * v[0:1, lo:lo + d]).astype(o_ref.dtype)
        # global attention output overwrites row 0 (the single global token)
        o_ref[0:1, lo:lo + d] = g_out[i].astype(o_ref.dtype)


def longformer_forward(hidden_states, attention_mask_f, w_all, b_all):
    b, s, e = hidden_states.shape
    assert s % (2 * W) == 0 and s % H == 0

    qm = attention_mask_f                                  # (B, S, 1)
    km = attention_mask_f.reshape(b, 1, s)                 # (B, 1, S)
    # permute the mask into the raw-.view global-key order used in-kernel:
    # concat position p = c*rh + r  <->  raw index r*H + c
    rh = s // H
    kmp = (attention_mask_f.reshape(b, rh, H)
           .transpose(0, 2, 1)
           .reshape(b, 1, s))                              # (B, 1, S)

    kernel = functools.partial(_longformer_kernel, w=W, h=H, d=D, e=e)
    return pl.pallas_call(
        kernel,
        out_shape=jax.ShapeDtypeStruct((b, s, e), jnp.float32),
        grid=(b,),
        in_specs=[
            pl.BlockSpec((None, s, e), lambda bi: (bi, 0, 0)),     # hidden states
            pl.BlockSpec((e, 6 * e), lambda bi: (0, 0)),           # stacked weights (resident)
            pl.BlockSpec((1, 6 * e), lambda bi: (0, 0)),           # stacked bias   (resident)
            pl.BlockSpec((None, s, 1), lambda bi: (bi, 0, 0)),     # query-row mask
            pl.BlockSpec((None, 1, s), lambda bi: (bi, 0, 0)),     # key-column mask
            pl.BlockSpec((None, 1, s), lambda bi: (bi, 0, 0)),     # permuted global-key mask
        ],
        out_specs=pl.BlockSpec((None, s, e), lambda bi: (bi, 0, 0)),
        compiler_params=pltpu.CompilerParams(dimension_semantics=("parallel",)),
    )(hidden_states, w_all, b_all, qm, km, kmp)


# -------------------- parameters & forward glue --------------------

def init_params(key):
    names = ["query", "key", "value", "query_global", "key_global", "value_global"]
    keys = jax.random.split(key, 2 * len(names))
    params = {}
    for i, name in enumerate(names):
        w = jax.random.normal(keys[2 * i], (E, E), dtype=jnp.float32) * 0.02
        b = jax.random.normal(keys[2 * i + 1], (E,), dtype=jnp.float32) * 0.02
        params[name] = (w, b)   # torch nn.Linear layout: weight (out, in), bias (out,)
    return params


def prepare_weights(params):
    """Stack, transpose and pre-scale the six Linear layers once (host side)."""
    names = ["query", "key", "value", "query_global", "key_global", "value_global"]
    w_all = jnp.concatenate([params[n][0].T for n in names], axis=1)              # (E, 6E)
    b_all = jnp.concatenate([params[n][1] for n in names], axis=0).reshape(1, 6 * E)
    inv_scale = 1.0 / math.sqrt(D)
    scale = jnp.ones((6 * E,), jnp.float32)
    scale = scale.at[0:E].set(inv_scale).at[3 * E:4 * E].set(inv_scale)           # q, q_global
    return w_all * scale[None, :], b_all * scale[None, :]


def longformer_self_attention(params, hidden_states, attention_mask):
    """hidden_states: (B, S0, E) f32; attention_mask: (B, S0, 1) bool (True = masked)."""
    b, s0, e = hidden_states.shape
    attn_window = 2 * W

    # _pad_to_window_size (factor=1, pad_token_id=1)
    padding_len = (attn_window - s0 % attn_window) % attn_window
    if padding_len > 0:
        hidden_states = jnp.concatenate(
            [hidden_states, jnp.full((b, padding_len, e), 1.0, hidden_states.dtype)], axis=1)
        attention_mask = jnp.concatenate(
            [attention_mask, jnp.ones((b, padding_len, 1), dtype=bool)], axis=1)

    w_all, b_all = prepare_weights(params)
    mask_f = attention_mask.astype(jnp.float32)

    out = longformer_forward(hidden_states, mask_f, w_all, b_all)   # (B, S, E)
    return out[:, :s0, :]


if __name__ == "__main__":
    key = jax.random.PRNGKey(0)
    k_hid, k_par = jax.random.split(key)
    params = init_params(k_par)

    hidden = jax.random.normal(k_hid, (B, S, E), dtype=jnp.float32)
    # boolean attention mask (True = masked/padding); keep token 0 (global) unmasked
    attention_mask = jnp.zeros((B, S, 1), dtype=bool).at[:, S - 3:, :].set(True)

    out = longformer_self_attention(params, hidden, attention_mask)
    out = jax.block_until_ready(out)
    assert out.shape == (B, S, E), out.shape
    assert bool(jnp.all(jnp.isfinite(out)))
    print("KERNEL_OK")
</pallas_src>

<mosaic_0001>
module attributes {stable_mosaic.version = 11 : i64} {
  func.func @_longformer_kernel(%arg0: i32, %arg1: memref<1x32x64xf32, #tpu.memory_space<vmem>>, %arg2: memref<64x384xf32, #tpu.memory_space<vmem>>, %arg3: memref<1x384xf32, #tpu.memory_space<vmem>>, %arg4: memref<1x32x1xf32, #tpu.memory_space<vmem>>, %arg5: memref<1x1x32xf32, #tpu.memory_space<vmem>>, %arg6: memref<1x1x32xf32, #tpu.memory_space<vmem>>, %arg7: memref<1x32x64xf32, #tpu.memory_space<vmem>>) attributes {dimension_semantics = [#tpu.dimension_semantics<parallel>], iteration_bounds = array<i64: 2>, scalar_prefetch = 0 : i64, scratch_operands = 0 : i64, tpu.core_type = #tpu.core_type<tc>, window_params = [{transform_indices = @transform_0, window_bounds = array<i64: 1, 32, 64>}, {pipeline_mode = #tpu.pipeline_mode<synchronous>, transform_indices = @transform_1, window_bounds = array<i64: 64, 384>}, {pipeline_mode = #tpu.pipeline_mode<synchronous>, transform_indices = @transform_2, window_bounds = array<i64: 1, 384>}, {transform_indices = @transform_3, window_bounds = array<i64: 1, 32, 1>}, {transform_indices = @transform_4, window_bounds = array<i64: 1, 1, 32>}, {transform_indices = @transform_5, window_bounds = array<i64: 1, 1, 32>}, {transform_indices = @transform_6, window_bounds = array<i64: 1, 32, 64>}]} {
    %c0 = arith.constant 0 : index
    %c0_0 = arith.constant 0 : index
    %c0_1 = arith.constant 0 : index
    %0 = vector.load %arg1[%c0, %c0_0, %c0_1] : memref<1x32x64xf32, #tpu.memory_space<vmem>>, vector<1x32x64xf32>
    %1 = vector.shape_cast %0 : vector<1x32x64xf32> to vector<32x64xf32>
    %c0_2 = arith.constant 0 : index
    %c0_3 = arith.constant 0 : index
    %2 = vector.load %arg2[%c0_2, %c0_3] : memref<64x384xf32, #tpu.memory_space<vmem>>, vector<64x384xf32>
    %cst = arith.constant dense<0.000000e+00> : vector<32x384xf32>
    %3 = tpu.matmul %1, %2, %cst {dimension_numbers = #tpu.dot_dimension_numbers<[1], [0], [0], [1], [0, 0, 1, 1], [], []>} : vector<32x64xf32>, vector<64x384xf32>, vector<32x384xf32> -> vector<32x384xf32>
    %c0_4 = arith.constant 0 : index
    %c0_5 = arith.constant 0 : index
    %4 = vector.load %arg3[%c0_4, %c0_5] : memref<1x384xf32, #tpu.memory_space<vmem>>, vector<1x384xf32>
    %5 = vector.broadcast %4 : vector<1x384xf32> to vector<32x384xf32>
    %6 = arith.addf %3, %5 : vector<32x384xf32>
    %c0_6 = arith.constant 0 : index
    %c0_7 = arith.constant 0 : index
    %c0_8 = arith.constant 0 : index
    %7 = vector.load %arg4[%c0_6, %c0_7, %c0_8] : memref<1x32x1xf32, #tpu.memory_space<vmem>>, vector<1x32x1xf32>
    %8 = vector.shape_cast %7 : vector<1x32x1xf32> to vector<32x1xf32>
    %cst_9 = arith.constant 5.000000e-01 : f32
    %9 = vector.broadcast %cst_9 : f32 to vector<32x1xf32>
    %10 = arith.cmpf ogt, %8, %9 : vector<32x1xf32>
    %c0_10 = arith.constant 0 : index
    %c0_11 = arith.constant 0 : index
    %c0_12 = arith.constant 0 : index
    %11 = vector.load %arg5[%c0_10, %c0_11, %c0_12] : memref<1x1x32xf32, #tpu.memory_space<vmem>>, vector<1x1x32xf32>
    %12 = vector.shape_cast %11 : vector<1x1x32xf32> to vector<1x32xf32>
    %cst_13 = arith.constant 5.000000e-01 : f32
    %13 = vector.broadcast %cst_13 : f32 to vector<1x32xf32>
    %14 = arith.cmpf ogt, %12, %13 : vector<1x32xf32>
    %c0_14 = arith.constant 0 : index
    %c0_15 = arith.constant 0 : index
    %c0_16 = arith.constant 0 : index
    %15 = vector.load %arg6[%c0_14, %c0_15, %c0_16] : memref<1x1x32xf32, #tpu.memory_space<vmem>>, vector<1x1x32xf32>
    %16 = vector.shape_cast %15 : vector<1x1x32xf32> to vector<1x32xf32>
    %cst_17 = arith.constant 5.000000e-01 : f32
    %17 = vector.broadcast %cst_17 : f32 to vector<1x32xf32>
    %18 = arith.cmpf ogt, %16, %17 : vector<1x32xf32>
    %19 = vector.extract_strided_slice %6 {offsets = [0, 0], sizes = [32, 64], strides = [1, 1]} : vector<32x384xf32> to vector<32x64xf32>
    %20 = vector.extract_strided_slice %6 {offsets = [0, 64], sizes = [32, 64], strides = [1, 1]} : vector<32x384xf32> to vector<32x64xf32>
    %cst_18 = arith.constant 0.000000e+00 : f32
    %21 = vector.shape_cast %10 : vector<32x1xi1> to vector<32x1xi1>
    %22 = vector.broadcast %21 : vector<32x1xi1> to vector<32x64xi1>
    %23 = vector.broadcast %cst_18 : f32 to vector<32x64xf32>
    %24 = arith.select %22, %23, %20 : vector<32x64xi1>, vector<32x64xf32>
    %25 = vector.extract_strided_slice %6 {offsets = [0, 128], sizes = [32, 64], strides = [1, 1]} : vector<32x384xf32> to vector<32x64xf32>
    %26 = vector.extract_strided_slice %6 {offsets = [0, 192], sizes = [1, 64], strides = [1, 1]} : vector<32x384xf32> to vector<1x64xf32>
    %27 = vector.extract_strided_slice %6 {offsets = [0, 256], sizes = [32, 64], strides = [1, 1]} : vector<32x384xf32> to vector<32x64xf32>
    %28 = vector.extract_strided_slice %6 {offsets = [0, 320], sizes = [32, 64], strides = [1, 1]} : vector<32x384xf32> to vector<32x64xf32>
    %29 = tpu.iota {dimensions = array<i32: 0>} : vector<32x32xi32>
    %30 = tpu.iota {dimensions = array<i32: 1>} : vector<32x32xi32>
    %31 = arith.subi %29, %30 : vector<32x32xi32>
    %32 = math.absi %31 : vector<32x32xi32>
    %c4_i32 = arith.constant 4 : i32
    %33 = vector.broadcast %c4_i32 : i32 to vector<32x32xi32>
    %34 = arith.cmpi sle, %32, %33 : vector<32x32xi32>
    %cst_19 = arith.constant dense<true> : vector<32x1xi1>
    %35 = arith.xori %10, %cst_19 : vector<32x1xi1>
    %36 = vector.broadcast %35 : vector<32x1xi1> to vector<32x32xi1>
    %37 = arith.andi %34, %36 : vector<32x32xi1>
    %cst_20 = arith.constant dense<true> : vector<1x32xi1>
    %38 = arith.xori %14, %cst_20 : vector<1x32xi1>
    %39 = vector.broadcast %38 : vector<1x32xi1> to vector<32x32xi1>
    %40 = arith.andi %37, %39 : vector<32x32xi1>
    %cst_21 = arith.constant 0.000000e+00 : f32
    %cst_22 = arith.constant 0xFF800000 : f32
    %41 = vector.broadcast %cst_21 : f32 to vector<32x32xf32>
    %42 = vector.broadcast %cst_22 : f32 to vector<32x32xf32>
    %43 = arith.select %40, %41, %42 : vector<32x32xi1>, vector<32x32xf32>
    %44 = vector.extract_strided_slice %14 {offsets = [0, 0], sizes = [1, 1], strides = [1, 1]} : vector<1x32xi1> to vector<1x1xi1>
    %cst_23 = arith.constant dense<true> : vector<1x1xi1>
    %45 = arith.xori %44, %cst_23 : vector<1x1xi1>
    %46 = vector.broadcast %45 : vector<1x1xi1> to vector<32x1xi1>
    %47 = arith.andi %35, %46 : vector<32x1xi1>
    %cst_24 = arith.constant 0.000000e+00 : f32
    %cst_25 = arith.constant 0xFF800000 : f32
    %48 = vector.broadcast %cst_24 : f32 to vector<32x1xf32>
    %49 = vector.broadcast %cst_25 : f32 to vector<32x1xf32>
    %50 = arith.select %47, %48, %49 : vector<32x1xi1>, vector<32x1xf32>
    %cst_26 = arith.constant 0xFF800000 : f32
    %cst_27 = arith.constant 0.000000e+00 : f32
    %51 = vector.broadcast %cst_26 : f32 to vector<1x32xf32>
    %52 = vector.broadcast %cst_27 : f32 to vector<1x32xf32>
    %53 = arith.select %18, %51, %52 : vector<1x32xi1>, vector<1x32xf32>
    %54 = vector.extract_strided_slice %19 {offsets = [0, 0], sizes = [32, 16], strides = [1, 1]} : vector<32x64xf32> to vector<32x16xf32>
    %55 = vector.extract_strided_slice %19 {offsets = [0, 16], sizes = [32, 16], strides = [1, 1]} : vector<32x64xf32> to vector<32x16xf32>
    %56 = vector.extract_strided_slice %19 {offsets = [0, 32], sizes = [32, 16], strides = [1, 1]} : vector<32x64xf32> to vector<32x16xf32>
    %57 = vector.extract_strided_slice %19 {offsets = [0, 48], sizes = [32, 16], strides = [1, 1]} : vector<32x64xf32> to vector<32x16xf32>
    %58 = vector.shape_cast %54 : vector<32x16xf32> to vector<1x32x16xf32>
    %59 = vector.shape_cast %55 : vector<32x16xf32> to vector<1x32x16xf32>
    %60 = vector.shape_cast %56 : vector<32x16xf32> to vector<1x32x16xf32>
    %61 = vector.shape_cast %57 : vector<32x16xf32> to vector<1x32x16xf32>
    %62 = tpu.concatenate %58, %59, %60, %61 in 0 : vector<1x32x16xf32>, vector<1x32x16xf32>, vector<1x32x16xf32>, vector<1x32x16xf32> -> vector<4x32x16xf32>
    %63 = arith.truncf %62 : vector<4x32x16xf32> to vector<4x32x16xbf16>
    %64 = vector.extract_strided_slice %24 {offsets = [0, 0], sizes = [32, 16], strides = [1, 1]} : vector<32x64xf32> to vector<32x16xf32>
    %65 = vector.extract_strided_slice %24 {offsets = [0, 16], sizes = [32, 16], strides = [1, 1]} : vector<32x64xf32> to vector<32x16xf32>
    %66 = vector.extract_strided_slice %24 {offsets = [0, 32], sizes = [32, 16], strides = [1, 1]} : vector<32x64xf32> to vector<32x16xf32>
    %67 = vector.extract_strided_slice %24 {offsets = [0, 48], sizes = [32, 16], strides = [1, 1]} : vector<32x64xf32> to vector<32x16xf32>
    %68 = vector.shape_cast %64 : vector<32x16xf32> to vector<1x32x16xf32>
    %69 = vector.shape_cast %65 : vector<32x16xf32> to vector<1x32x16xf32>
    %70 = vector.shape_cast %66 : vector<32x16xf32> to vector<1x32x16xf32>
    %71 = vector.shape_cast %67 : vector<32x16xf32> to vector<1x32x16xf32>
    %72 = tpu.concatenate %68, %69, %70, %71 in 0 : vector<1x32x16xf32>, vector<1x32x16xf32>, vector<1x32x16xf32>, vector<1x32x16xf32> -> vector<4x32x16xf32>
    %73 = arith.truncf %72 : vector<4x32x16xf32> to vector<4x32x16xbf16>
    %74 = vector.extract_strided_slice %25 {offsets = [0, 0], sizes = [32, 16], strides = [1, 1]} : vector<32x64xf32> to vector<32x16xf32>
    %75 = vector.extract_strided_slice %25 {offsets = [0, 16], sizes = [32, 16], strides = [1, 1]} : vector<32x64xf32> to vector<32x16xf32>
    %76 = vector.extract_strided_slice %25 {offsets = [0, 32], sizes = [32, 16], strides = [1, 1]} : vector<32x64xf32> to vector<32x16xf32>
    %77 = vector.extract_strided_slice %25 {offsets = [0, 48], sizes = [32, 16], strides = [1, 1]} : vector<32x64xf32> to vector<32x16xf32>
    %78 = vector.shape_cast %74 : vector<32x16xf32> to vector<1x32x16xf32>
    %79 = vector.shape_cast %75 : vector<32x16xf32> to vector<1x32x16xf32>
    %80 = vector.shape_cast %76 : vector<32x16xf32> to vector<1x32x16xf32>
    %81 = vector.shape_cast %77 : vector<32x16xf32> to vector<1x32x16xf32>
    %82 = tpu.concatenate %78, %79, %80, %81 in 0 : vector<1x32x16xf32>, vector<1x32x16xf32>, vector<1x32x16xf32>, vector<1x32x16xf32> -> vector<4x32x16xf32>
    %83 = arith.truncf %82 : vector<4x32x16xf32> to vector<4x32x16xbf16>
    "tpu.trace_start"() <{level = 10 : i32, message = "hqd,hkd->hqk"}> : () -> ()
    %cst_28 = arith.constant dense<0.000000e+00> : vector<4x32x32xf32>
    %84 = tpu.matmul %63, %73, %cst_28 {dimension_numbers = #tpu.dot_dimension_numbers<[2], [2], [1], [1], [0, 0, 0, 1, 1, 1], [0], [0]>} : vector<4x32x16xbf16>, vector<4x32x16xbf16>, vector<4x32x32xf32> -> vector<4x32x32xf32>
    "tpu.trace_stop"() : () -> ()
    %85 = vector.extract_strided_slice %84 {offsets = [0, 0, 0], sizes = [4, 32, 1], strides = [1, 1, 1]} : vector<4x32x32xf32> to vector<4x32x1xf32>
    %86 = vector.shape_cast %50 : vector<32x1xf32> to vector<1x32x1xf32>
    %87 = vector.broadcast %86 : vector<1x32x1xf32> to vector<4x32x1xf32>
    %88 = arith.addf %85, %87 : vector<4x32x1xf32>
    %89 = vector.shape_cast %43 : vector<32x32xf32> to vector<1x32x32xf32>
    %90 = vector.broadcast %89 : vector<1x32x32xf32> to vector<4x32x32xf32>
    %91 = arith.addf %84, %90 : vector<4x32x32xf32>
    %cst_29 = arith.constant dense<0xFF800000> : vector<4x32xf32>
    %92 = vector.multi_reduction <maximumf>, %91, %cst_29 [2] : vector<4x32x32xf32> to vector<4x32xf32>
    %93 = vector.shape_cast %92 : vector<4x32xf32> to vector<4x32x1xf32>
    %94 = arith.maximumf %93, %88 : vector<4x32x1xf32>
    %95 = tpu.weird %94 : vector<4x32x1xf32> -> vector<4x32x1xi1>
    %cst_30 = arith.constant dense<true> : vector<4x32x1xi1>
    %96 = arith.xori %95, %cst_30 : vector<4x32x1xi1>
    %cst_31 = arith.constant 0.000000e+00 : f32
    %97 = vector.broadcast %cst_31 : f32 to vector<4x32x1xf32>
    %98 = arith.select %96, %94, %97 : vector<4x32x1xi1>, vector<4x32x1xf32>
    %99 = vector.broadcast %98 : vector<4x32x1xf32> to vector<4x32x32xf32>
    %100 = arith.subf %91, %99 : vector<4x32x32xf32>
    %101 = math.exp %100 : vector<4x32x32xf32>
    %102 = arith.subf %88, %98 : vector<4x32x1xf32>
    %103 = math.exp %102 : vector<4x32x1xf32>
    %cst_32 = arith.constant dense<0.000000e+00> : vector<4x32xf32>
    %104 = vector.multi_reduction <add>, %101, %cst_32 [2] : vector<4x32x32xf32> to vector<4x32xf32>
    %105 = vector.shape_cast %104 : vector<4x32xf32> to vector<4x32x1xf32>
    %106 = arith.addf %105, %103 : vector<4x32x1xf32>
    %cst_33 = arith.constant 0.000000e+00 : f32
    %107 = vector.broadcast %cst_33 : f32 to vector<4x32x1xf32>
    %108 = arith.cmpf oeq, %106, %107 : vector<4x32x1xf32>
    %cst_34 = arith.constant 1.000000e+00 : f32
    %109 = vector.broadcast %cst_34 : f32 to vector<4x32x1xf32>
    %110 = arith.select %108, %109, %106 : vector<4x32x1xi1>, vector<4x32x1xf32>
    %cst_35 = arith.constant 1.000000e+00 : f32
    %111 = vector.broadcast %cst_35 : f32 to vector<4x32x1xf32>
    %112 = arith.divf %111, %110 : vector<4x32x1xf32>
    %113 = vector.broadcast %112 : vector<4x32x1xf32> to vector<4x32x32xf32>
    %114 = arith.mulf %101, %113 : vector<4x32x32xf32>
    %115 = arith.mulf %103, %112 : vector<4x32x1xf32>
    %116 = arith.truncf %114 : vector<4x32x32xf32> to vector<4x32x32xbf16>
    "tpu.trace_start"() <{level = 10 : i32, message = "hqk,hkd->hqd"}> : () -> ()
    %cst_36 = arith.constant dense<0.000000e+00> : vector<4x32x16xf32>
    %117 = tpu.matmul %116, %83, %cst_36 {dimension_numbers = #tpu.dot_dimension_numbers<[2], [1], [1], [2], [0, 0, 0, 1, 1, 2], [0], [0]>} : vector<4x32x32xbf16>, vector<4x32x16xbf16>, vector<4x32x16xf32> -> vector<4x32x16xf32>
    "tpu.trace_stop"() : () -> ()
    %118 = vector.extract_strided_slice %26 {offsets = [0, 0], sizes = [1, 16], strides = [1, 1]} : vector<1x64xf32> to vector<1x16xf32>
    %119 = vector.extract_strided_slice %26 {offsets = [0, 16], sizes = [1, 16], strides = [1, 1]} : vector<1x64xf32> to vector<1x16xf32>
    %120 = vector.extract_strided_slice %26 {offsets = [0, 32], sizes = [1, 16], strides = [1, 1]} : vector<1x64xf32> to vector<1x16xf32>
    %121 = vector.extract_strided_slice %26 {offsets = [0, 48], sizes = [1, 16], strides = [1, 1]} : vector<1x64xf32> to vector<1x16xf32>
    %122 = vector.shape_cast %118 : vector<1x16xf32> to vector<1x1x16xf32>
    %123 = vector.shape_cast %119 : vector<1x16xf32> to vector<1x1x16xf32>
    %124 = vector.shape_cast %120 : vector<1x16xf32> to vector<1x1x16xf32>
    %125 = vector.shape_cast %121 : vector<1x16xf32> to vector<1x1x16xf32>
    %126 = tpu.concatenate %122, %123, %124, %125 in 0 : vector<1x1x16xf32>, vector<1x1x16xf32>, vector<1x1x16xf32>, vector<1x1x16xf32> -> vector<4x1x16xf32>
    %127 = arith.truncf %126 : vector<4x1x16xf32> to vector<4x1x16xbf16>
    %128 = vector.extract_strided_slice %27 {offsets = [0, 0], sizes = [8, 64], strides = [1, 1]} : vector<32x64xf32> to vector<8x64xf32>
    %129 = vector.extract_strided_slice %128 {offsets = [0, 0], sizes = [8, 16], strides = [1, 1]} : vector<8x64xf32> to vector<8x16xf32>
    %130 = vector.extract_strided_slice %128 {offsets = [0, 16], sizes = [8, 16], strides = [1, 1]} : vector<8x64xf32> to vector<8x16xf32>
    %131 = vector.extract_strided_slice %128 {offsets = [0, 32], sizes = [8, 16], strides = [1, 1]} : vector<8x64xf32> to vector<8x16xf32>
    %132 = vector.extract_strided_slice %128 {offsets = [0, 48], sizes = [8, 16], strides = [1, 1]} : vector<8x64xf32> to vector<8x16xf32>
    %133 = tpu.concatenate %129, %130, %131, %132 in 0 : vector<8x16xf32>, vector<8x16xf32>, vector<8x16xf32>, vector<8x16xf32> -> vector<32x16xf32>
    %134 = vector.extract_strided_slice %27 {offsets = [8, 0], sizes = [8, 64], strides = [1, 1]} : vector<32x64xf32> to vector<8x64xf32>
    %135 = vector.extract_strided_slice %134 {offsets = [0, 0], sizes = [8, 16], strides = [1, 1]} : vector<8x64xf32> to vector<8x16xf32>
    %136 = vector.extract_strided_slice %134 {offsets = [0, 16], sizes = [8, 16], strides = [1, 1]} : vector<8x64xf32> to vector<8x16xf32>
    %137 = vector.extract_strided_slice %134 {offsets = [0, 32], sizes = [8, 16], strides = [1, 1]} : vector<8x64xf32> to vector<8x16xf32>
    %138 = vector.extract_strided_slice %134 {offsets = [0, 48], sizes = [8, 16], strides = [1, 1]} : vector<8x64xf32> to vector<8x16xf32>
    %139 = tpu.concatenate %135, %136, %137, %138 in 0 : vector<8x16xf32>, vector<8x16xf32>, vector<8x16xf32>, vector<8x16xf32> -> vector<32x16xf32>
    %140 = vector.extract_strided_slice %27 {offsets = [16, 0], sizes = [8, 64], strides = [1, 1]} : vector<32x64xf32> to vector<8x64xf32>
    %141 = vector.extract_strided_slice %140 {offsets = [0, 0], sizes = [8, 16], strides = [1, 1]} : vector<8x64xf32> to vector<8x16xf32>
    %142 = vector.extract_strided_slice %140 {offsets = [0, 16], sizes = [8, 16], strides = [1, 1]} : vector<8x64xf32> to vector<8x16xf32>
    %143 = vector.extract_strided_slice %140 {offsets = [0, 32], sizes = [8, 16], strides = [1, 1]} : vector<8x64xf32> to vector<8x16xf32>
    %144 = vector.extract_strided_slice %140 {offsets = [0, 48], sizes = [8, 16], strides = [1, 1]} : vector<8x64xf32> to vector<8x16xf32>
    %145 = tpu.concatenate %141, %142, %143, %144 in 0 : vector<8x16xf32>, vector<8x16xf32>, vector<8x16xf32>, vector<8x16xf32> -> vector<32x16xf32>
    %146 = vector.extract_strided_slice %27 {offsets = [24, 0], sizes = [8, 64], strides = [1, 1]} : vector<32x64xf32> to vector<8x64xf32>
    %147 = vector.extract_strided_slice %146 {offsets = [0, 0], sizes = [8, 16], strides = [1, 1]} : vector<8x64xf32> to vector<8x16xf32>
    %148 = vector.extract_strided_slice %146 {offsets = [0, 16], sizes = [8, 16], strides = [1, 1]} : vector<8x64xf32> to vector<8x16xf32>
    %149 = vector.extract_strided_slice %146 {offsets = [0, 32], sizes = [8, 16], strides = [1, 1]} : vector<8x64xf32> to vector<8x16xf32>
    %150 = vector.extract_strided_slice %146 {offsets = [0, 48], sizes = [8, 16], strides = [1, 1]} : vector<8x64xf32> to vector<8x16xf32>
    %151 = tpu.concatenate %147, %148, %149, %150 in 0 : vector<8x16xf32>, vector<8x16xf32>, vector<8x16xf32>, vector<8x16xf32> -> vector<32x16xf32>
    %152 = vector.shape_cast %133 : vector<32x16xf32> to vector<1x32x16xf32>
    %153 = vector.shape_cast %139 : vector<32x16xf32> to vector<1x32x16xf32>
    %154 = vector.shape_cast %145 : vector<32x16xf32> to vector<1x32x16xf32>
    %155 = vector.shape_cast %151 : vector<32x16xf32> to vector<1x32x16xf32>
    %156 = tpu.concatenate %152, %153, %154, %155 in 0 : vector<1x32x16xf32>, vector<1x32x16xf32>, vector<1x32x16xf32>, vector<1x32x16xf32> -> vector<4x32x16xf32>
    %157 = arith.truncf %156 : vector<4x32x16xf32> to vector<4x32x16xbf16>
    %158 = vector.extract_strided_slice %28 {offsets = [0, 0], sizes = [8, 64], strides = [1, 1]} : vector<32x64xf32> to vector<8x64xf32>
    %159 = vector.extract_strided_slice %158 {offsets = [0, 0], sizes = [8, 16], strides = [1, 1]} : vector<8x64xf32> to vector<8x16xf32>
    %160 = vector.extract_strided_slice %158 {offsets = [0, 16], sizes = [8, 16], strides = [1, 1]} : vector<8x64xf32> to vector<8x16xf32>
    %161 = vector.extract_strided_slice %158 {offsets = [0, 32], sizes = [8, 16], strides = [1, 1]} : vector<8x64xf32> to vector<8x16xf32>
    %162 = vector.extract_strided_slice %158 {offsets = [0, 48], sizes = [8, 16], strides = [1, 1]} : vector<8x64xf32> to vector<8x16xf32>
    %163 = tpu.concatenate %159, %160, %161, %162 in 0 : vector<8x16xf32>, vector<8x16xf32>, vector<8x16xf32>, vector<8x16xf32> -> vector<32x16xf32>
    %164 = vector.extract_strided_slice %28 {offsets = [8, 0], sizes = [8, 64], strides = [1, 1]} : vector<32x64xf32> to vector<8x64xf32>
    %165 = vector.extract_strided_slice %164 {offsets = [0, 0], sizes = [8, 16], strides = [1, 1]} : vector<8x64xf32> to vector<8x16xf32>
    %166 = vector.extract_strided_slice %164 {offsets = [0, 16], sizes = [8, 16], strides = [1, 1]} : vector<8x64xf32> to vector<8x16xf32>
    %167 = vector.extract_strided_slice %164 {offsets = [0, 32], sizes = [8, 16], strides = [1, 1]} : vector<8x64xf32> to vector<8x16xf32>
    %168 = vector.extract_strided_slice %164 {offsets = [0, 48], sizes = [8, 16], strides = [1, 1]} : vector<8x64xf32> to vector<8x16xf32>
    %169 = tpu.concatenate %165, %166, %167, %168 in 0 : vector<8x16xf32>, vector<8x16xf32>, vector<8x16xf32>, vector<8x16xf32> -> vector<32x16xf32>
    %170 = vector.extract_strided_slice %28 {offsets = [16, 0], sizes = [8, 64], strides = [1, 1]} : vector<32x64xf32> to vector<8x64xf32>
    %171 = vector.extract_strided_slice %170 {offsets = [0, 0], sizes = [8, 16], strides = [1, 1]} : vector<8x64xf32> to vector<8x16xf32>
    %172 = vector.extract_strided_slice %170 {offsets = [0, 16], sizes = [8, 16], strides = [1, 1]} : vector<8x64xf32> to vector<8x16xf32>
    %173 = vector.extract_strided_slice %170 {offsets = [0, 32], sizes = [8, 16], strides = [1, 1]} : vector<8x64xf32> to vector<8x16xf32>
    %174 = vector.extract_strided_slice %170 {offsets = [0, 48], sizes = [8, 16], strides = [1, 1]} : vector<8x64xf32> to vector<8x16xf32>
    %175 = tpu.concatenate %171, %172, %173, %174 in 0 : vector<8x16xf32>, vector<8x16xf32>, vector<8x16xf32>, vector<8x16xf32> -> vector<32x16xf32>
    %176 = vector.extract_strided_slice %28 {offsets = [24, 0], sizes = [8, 64], strides = [1, 1]} : vector<32x64xf32> to vector<8x64xf32>
    %177 = vector.extract_strided_slice %176 {offsets = [0, 0], sizes = [8, 16], strides = [1, 1]} : vector<8x64xf32> to vector<8x16xf32>
    %178 = vector.extract_strided_slice %176 {offsets = [0, 16], sizes = [8, 16], strides = [1, 1]} : vector<8x64xf32> to vector<8x16xf32>
    %179 = vector.extract_strided_slice %176 {offsets = [0, 32], sizes = [8, 16], strides = [1, 1]} : vector<8x64xf32> to vector<8x16xf32>
    %180 = vector.extract_strided_slice %176 {offsets = [0, 48], sizes = [8, 16], strides = [1, 1]} : vector<8x64xf32> to vector<8x16xf32>
    %181 = tpu.concatenate %177, %178, %179, %180 in 0 : vector<8x16xf32>, vector<8x16xf32>, vector<8x16xf32>, vector<8x16xf32> -> vector<32x16xf32>
    %182 = vector.shape_cast %163 : vector<32x16xf32> to vector<1x32x16xf32>
    %183 = vector.shape_cast %169 : vector<32x16xf32> to vector<1x32x16xf32>
    %184 = vector.shape_cast %175 : vector<32x16xf32> to vector<1x32x16xf32>
    %185 = vector.shape_cast %181 : vector<32x16xf32> to vector<1x32x16xf32>
    %186 = tpu.concatenate %182, %183, %184, %185 in 0 : vector<1x32x16xf32>, vector<1x32x16xf32>, vector<1x32x16xf32>, vector<1x32x16xf32> -> vector<4x32x16xf32>
    %187 = arith.truncf %186 : vector<4x32x16xf32> to vector<4x32x16xbf16>
    "tpu.trace_start"() <{level = 10 : i32, message = "hqd,hkd->hqk"}> : () -> ()
    %cst_37 = arith.constant dense<0.000000e+00> : vector<4x1x32xf32>
    %188 = tpu.matmul %127, %157, %cst_37 {dimension_numbers = #tpu.dot_dimension_numbers<[2], [2], [1], [1], [0, 0, 0, 1, 1, 1], [0], [0]>} : vector<4x1x16xbf16>, vector<4x32x16xbf16>, vector<4x1x32xf32> -> vector<4x1x32xf32>
    "tpu.trace_stop"() : () -> ()
    %189 = vector.shape_cast %53 : vector<1x32xf32> to vector<1x1x32xf32>
    %190 = vector.broadcast %189 : vector<1x1x32xf32> to vector<4x1x32xf32>
    %191 = arith.addf %188, %190 : vector<4x1x32xf32>
    %cst_38 = arith.constant dense<0xFF800000> : vector<4x1xf32>
    %192 = vector.multi_reduction <maximumf>, %191, %cst_38 [2] : vector<4x1x32xf32> to vector<4x1xf32>
    %193 = vector.shape_cast %192 : vector<4x1xf32> to vector<4x1x1xf32>
    %194 = tpu.weird %193 : vector<4x1x1xf32> -> vector<4x1x1xi1>
    %cst_39 = arith.constant dense<true> : vector<4x1x1xi1>
    %195 = arith.xori %194, %cst_39 : vector<4x1x1xi1>
    %cst_40 = arith.constant 0.000000e+00 : f32
    %196 = vector.broadcast %cst_40 : f32 to vector<4x1x1xf32>
    %197 = arith.select %195, %193, %196 : vector<4x1x1xi1>, vector<4x1x1xf32>
    %198 = vector.broadcast %197 : vector<4x1x1xf32> to vector<4x1x32xf32>
    %199 = arith.subf %191, %198 : vector<4x1x32xf32>
    %200 = math.exp %199 : vector<4x1x32xf32>
    %cst_41 = arith.constant dense<0.000000e+00> : vector<4x1xf32>
    %201 = vector.multi_reduction <add>, %200, %cst_41 [2] : vector<4x1x32xf32> to vector<4x1xf32>
    %202 = vector.shape_cast %201 : vector<4x1xf32> to vector<4x1x1xf32>
    %cst_42 = arith.constant 0.000000e+00 : f32
    %203 = vector.broadcast %cst_42 : f32 to vector<4x1x1xf32>
    %204 = arith.cmpf oeq, %202, %203 : vector<4x1x1xf32>
    %cst_43 = arith.constant 1.000000e+00 : f32
    %205 = vector.broadcast %cst_43 : f32 to vector<4x1x1xf32>
    %206 = arith.select %204, %205, %202 : vector<4x1x1xi1>, vector<4x1x1xf32>
    %207 = vector.broadcast %206 : vector<4x1x1xf32> to vector<4x1x32xf32>
    %208 = arith.divf %200, %207 : vector<4x1x32xf32>
    %209 = arith.truncf %208 : vector<4x1x32xf32> to vector<4x1x32xbf16>
    "tpu.trace_start"() <{level = 10 : i32, message = "hqk,hkd->hqd"}> : () -> ()
    %cst_44 = arith.constant dense<0.000000e+00> : vector<4x1x16xf32>
    %210 = tpu.matmul %209, %187, %cst_44 {dimension_numbers = #tpu.dot_dimension_numbers<[2], [1], [1], [2], [0, 0, 0, 1, 1, 2], [0], [0]>} : vector<4x1x32xbf16>, vector<4x32x16xbf16>, vector<4x1x16xf32> -> vector<4x1x16xf32>
    "tpu.trace_stop"() : () -> ()
    %211 = vector.extract_strided_slice %117 {offsets = [0, 0, 0], sizes = [1, 32, 16], strides = [1, 1, 1]} : vector<4x32x16xf32> to vector<1x32x16xf32>
    %212 = vector.shape_cast %211 : vector<1x32x16xf32> to vector<32x16xf32>
    %213 = vector.extract_strided_slice %115 {offsets = [0, 0, 0], sizes = [1, 32, 1], strides = [1, 1, 1]} : vector<4x32x1xf32> to vector<1x32x1xf32>
    %214 = vector.shape_cast %213 : vector<1x32x1xf32> to vector<32x1xf32>
    %215 = vector.extract_strided_slice %25 {offsets = [0, 0], sizes = [1, 16], strides = [1, 1]} : vector<32x64xf32> to vector<1x16xf32>
    %216 = vector.broadcast %214 : vector<32x1xf32> to vector<32x16xf32>
    %217 = vector.broadcast %215 : vector<1x16xf32> to vector<32x16xf32>
    %218 = arith.mulf %216, %217 : vector<32x16xf32>
    %219 = arith.addf %212, %218 : vector<32x16xf32>
    %c0_45 = arith.constant 0 : index
    %c0_46 = arith.constant 0 : index
    %c0_47 = arith.constant 0 : index
    %220 = vector.load %arg7[%c0_45, %c0_46, %c0_47] : memref<1x32x64xf32, #tpu.memory_space<vmem>>, vector<1x32x16xf32>
    %221 = vector.shape_cast %220 : vector<1x32x16xf32> to vector<32x16xf32>
    %222 = vector.shape_cast %219 : vector<32x16xf32> to vector<1x32x16xf32>
    tpu.vector_store %arg7[%c0_45, %c0_46, %c0_47], %222 {strides = array<i32>} : memref<1x32x64xf32, #tpu.memory_space<vmem>>, vector<1x32x16xf32>,
    %223 = vector.extract_strided_slice %210 {offsets = [0, 0, 0], sizes = [1, 1, 16], strides = [1, 1, 1]} : vector<4x1x16xf32> to vector<1x1x16xf32>
    %224 = vector.shape_cast %223 : vector<1x1x16xf32> to vector<1x16xf32>
    %c0_48 = arith.constant 0 : index
    %c0_49 = arith.constant 0 : index
    %c0_50 = arith.constant 0 : index
    %225 = vector.load %arg7[%c0_48, %c0_49, %c0_50] : memref<1x32x64xf32, #tpu.memory_space<vmem>>, vector<1x1x16xf32>
    %226 = vector.shape_cast %225 : vector<1x1x16xf32> to vector<1x16xf32>
    %227 = vector.shape_cast %224 : vector<1x16xf32> to vector<1x1x16xf32>
    tpu.vector_store %arg7[%c0_48, %c0_49, %c0_50], %227 {strides = array<i32>} : memref<1x32x64xf32, #tpu.memory_space<vmem>>, vector<1x1x16xf32>,
    %228 = vector.extract_strided_slice %117 {offsets = [1, 0, 0], sizes = [1, 32, 16], strides = [1, 1, 1]} : vector<4x32x16xf32> to vector<1x32x16xf32>
    %229 = vector.shape_cast %228 : vector<1x32x16xf32> to vector<32x16xf32>
    %230 = vector.extract_strided_slice %115 {offsets = [1, 0, 0], sizes = [1, 32, 1], strides = [1, 1, 1]} : vector<4x32x1xf32> to vector<1x32x1xf32>
    %231 = vector.shape_cast %230 : vector<1x32x1xf32> to vector<32x1xf32>
    %232 = vector.extract_strided_slice %25 {offsets = [0, 16], sizes = [1, 16], strides = [1, 1]} : vector<32x64xf32> to vector<1x16xf32>
    %233 = vector.broadcast %231 : vector<32x1xf32> to vector<32x16xf32>
    %234 = vector.broadcast %232 : vector<1x16xf32> to vector<32x16xf32>
    %235 = arith.mulf %233, %234 : vector<32x16xf32>
    %236 = arith.addf %229, %235 : vector<32x16xf32>
    %c0_51 = arith.constant 0 : index
    %c0_52 = arith.constant 0 : index
    %c16 = arith.constant 16 : index
    %237 = vector.load %arg7[%c0_51, %c0_52, %c16] : memref<1x32x64xf32, #tpu.memory_space<vmem>>, vector<1x32x16xf32>
    %238 = vector.shape_cast %237 : vector<1x32x16xf32> to vector<32x16xf32>
    %239 = vector.shape_cast %236 : vector<32x16xf32> to vector<1x32x16xf32>
    tpu.vector_store %arg7[%c0_51, %c0_52, %c16], %239 {strides = array<i32>} : memref<1x32x64xf32, #tpu.memory_space<vmem>>, vector<1x32x16xf32>,
    %240 = vector.extract_strided_slice %210 {offsets = [1, 0, 0], sizes = [1, 1, 16], strides = [1, 1, 1]} : vector<4x1x16xf32> to vector<1x1x16xf32>
    %241 = vector.shape_cast %240 : vector<1x1x16xf32> to vector<1x16xf32>
    %c0_53 = arith.constant 0 : index
    %c0_54 = arith.constant 0 : index
    %c16_55 = arith.constant 16 : index
    %242 = vector.load %arg7[%c0_53, %c0_54, %c16_55] : memref<1x32x64xf32, #tpu.memory_space<vmem>>, vector<1x1x16xf32>
    %243 = vector.shape_cast %242 : vector<1x1x16xf32> to vector<1x16xf32>
    %244 = vector.shape_cast %241 : vector<1x16xf32> to vector<1x1x16xf32>
    tpu.vector_store %arg7[%c0_53, %c0_54, %c16_55], %244 {strides = array<i32>} : memref<1x32x64xf32, #tpu.memory_space<vmem>>, vector<1x1x16xf32>,
    %245 = vector.extract_strided_slice %117 {offsets = [2, 0, 0], sizes = [1, 32, 16], strides = [1, 1, 1]} : vector<4x32x16xf32> to vector<1x32x16xf32>
    %246 = vector.shape_cast %245 : vector<1x32x16xf32> to vector<32x16xf32>
    %247 = vector.extract_strided_slice %115 {offsets = [2, 0, 0], sizes = [1, 32, 1], strides = [1, 1, 1]} : vector<4x32x1xf32> to vector<1x32x1xf32>
    %248 = vector.shape_cast %247 : vector<1x32x1xf32> to vector<32x1xf32>
    %249 = vector.extract_strided_slice %25 {offsets = [0, 32], sizes = [1, 16], strides = [1, 1]} : vector<32x64xf32> to vector<1x16xf32>
    %250 = vector.broadcast %248 : vector<32x1xf32> to vector<32x16xf32>
    %251 = vector.broadcast %249 : vector<1x16xf32> to vector<32x16xf32>
    %252 = arith.mulf %250, %251 : vector<32x16xf32>
    %253 = arith.addf %246, %252 : vector<32x16xf32>
    %c0_56 = arith.constant 0 : index
    %c0_57 = arith.constant 0 : index
    %c32 = arith.constant 32 : index
    %254 = vector.load %arg7[%c0_56, %c0_57, %c32] : memref<1x32x64xf32, #tpu.memory_space<vmem>>, vector<1x32x16xf32>
    %255 = vector.shape_cast %254 : vector<1x32x16xf32> to vector<32x16xf32>
    %256 = vector.shape_cast %253 : vector<32x16xf32> to vector<1x32x16xf32>
    tpu.vector_store %arg7[%c0_56, %c0_57, %c32], %256 {strides = array<i32>} : memref<1x32x64xf32, #tpu.memory_space<vmem>>, vector<1x32x16xf32>,
    %257 = vector.extract_strided_slice %210 {offsets = [2, 0, 0], sizes = [1, 1, 16], strides = [1, 1, 1]} : vector<4x1x16xf32> to vector<1x1x16xf32>
    %258 = vector.shape_cast %257 : vector<1x1x16xf32> to vector<1x16xf32>
    %c0_58 = arith.constant 0 : index
    %c0_59 = arith.constant 0 : index
    %c32_60 = arith.constant 32 : index
    %259 = vector.load %arg7[%c0_58, %c0_59, %c32_60] : memref<1x32x64xf32, #tpu.memory_space<vmem>>, vector<1x1x16xf32>
    %260 = vector.shape_cast %259 : vector<1x1x16xf32> to vector<1x16xf32>
    %261 = vector.shape_cast %258 : vector<1x16xf32> to vector<1x1x16xf32>
    tpu.vector_store %arg7[%c0_58, %c0_59, %c32_60], %261 {strides = array<i32>} : memref<1x32x64xf32, #tpu.memory_space<vmem>>, vector<1x1x16xf32>,
    %262 = vector.extract_strided_slice %117 {offsets = [3, 0, 0], sizes = [1, 32, 16], strides = [1, 1, 1]} : vector<4x32x16xf32> to vector<1x32x16xf32>
    %263 = vector.shape_cast %262 : vector<1x32x16xf32> to vector<32x16xf32>
    %264 = vector.extract_strided_slice %115 {offsets = [3, 0, 0], sizes = [1, 32, 1], strides = [1, 1, 1]} : vector<4x32x1xf32> to vector<1x32x1xf32>
    %265 = vector.shape_cast %264 : vector<1x32x1xf32> to vector<32x1xf32>
    %266 = vector.extract_strided_slice %25 {offsets = [0, 48], sizes = [1, 16], strides = [1, 1]} : vector<32x64xf32> to vector<1x16xf32>
    %267 = vector.broadcast %265 : vector<32x1xf32> to vector<32x16xf32>
    %268 = vector.broadcast %266 : vector<1x16xf32> to vector<32x16xf32>
    %269 = arith.mulf %267, %268 : vector<32x16xf32>
    %270 = arith.addf %263, %269 : vector<32x16xf32>
    %c0_61 = arith.constant 0 : index
    %c0_62 = arith.constant 0 : index
    %c48 = arith.constant 48 : index
    %271 = vector.load %arg7[%c0_61, %c0_62, %c48] : memref<1x32x64xf32, #tpu.memory_space<vmem>>, vector<1x32x16xf32>
    %272 = vector.shape_cast %271 : vector<1x32x16xf32> to vector<32x16xf32>
    %273 = vector.shape_cast %270 : vector<32x16xf32> to vector<1x32x16xf32>
    tpu.vector_store %arg7[%c0_61, %c0_62, %c48], %273 {strides = array<i32>} : memref<1x32x64xf32, #tpu.memory_space<vmem>>, vector<1x32x16xf32>,
    %274 = vector.extract_strided_slice %210 {offsets = [3, 0, 0], sizes = [1, 1, 16], strides = [1, 1, 1]} : vector<4x1x16xf32> to vector<1x1x16xf32>
    %275 = vector.shape_cast %274 : vector<1x1x16xf32> to vector<1x16xf32>
    %c0_63 = arith.constant 0 : index
    %c0_64 = arith.constant 0 : index
    %c48_65 = arith.constant 48 : index
    %276 = vector.load %arg7[%c0_63, %c0_64, %c48_65] : memref<1x32x64xf32, #tpu.memory_space<vmem>>, vector<1x1x16xf32>
    %277 = vector.shape_cast %276 : vector<1x1x16xf32> to vector<1x16xf32>
    %278 = vector.shape_cast %275 : vector<1x16xf32> to vector<1x1x16xf32>
    tpu.vector_store %arg7[%c0_63, %c0_64, %c48_65], %278 {strides = array<i32>} : memref<1x32x64xf32, #tpu.memory_space<vmem>>, vector<1x1x16xf32>,
    return
  }
  func.func @transform_0(%arg0: i32) -> (i32, i32, i32) {
    %c0_i32 = arith.constant 0 : i32
    %c0_i32_0 = arith.constant 0 : i32
    %c0_i32_1 = arith.constant 0 : i32
    return %arg0, %c0_i32, %c0_i32_0 : i32, i32, i32
  }
  func.func @transform_1(%arg0: i32) -> (i32, i32) {
    %c0_i32 = arith.constant 0 : i32
    %c0_i32_0 = arith.constant 0 : i32
    %c0_i32_1 = arith.constant 0 : i32
    return %c0_i32, %c0_i32_0 : i32, i32
  }
  func.func @transform_2(%arg0: i32) -> (i32, i32) {
    %c0_i32 = arith.constant 0 : i32
    %c0_i32_0 = arith.constant 0 : i32
    %c0_i32_1 = arith.constant 0 : i32
    return %c0_i32, %c0_i32_0 : i32, i32
  }
  func.func @transform_3(%arg0: i32) -> (i32, i32, i32) {
    %c0_i32 = arith.constant 0 : i32
    %c0_i32_0 = arith.constant 0 : i32
    %c0_i32_1 = arith.constant 0 : i32
    return %arg0, %c0_i32, %c0_i32_0 : i32, i32, i32
  }
  func.func @transform_4(%arg0: i32) -> (i32, i32, i32) {
    %c0_i32 = arith.constant 0 : i32
    %c0_i32_0 = arith.constant 0 : i32
    %c0_i32_1 = arith.constant 0 : i32
    return %arg0, %c0_i32, %c0_i32_0 : i32, i32, i32
  }
  func.func @transform_5(%arg0: i32) -> (i32, i32, i32) {
    %c0_i32 = arith.constant 0 : i32
    %c0_i32_0 = arith.constant 0 : i32
    %c0_i32_1 = arith.constant 0 : i32
    return %arg0, %c0_i32, %c0_i32_0 : i32, i32, i32
  }
  func.func @transform_6(%arg0: i32) -> (i32, i32, i32) {
    %c0_i32 = arith.constant 0 : i32
    %c0_i32_0 = arith.constant 0 : i32
    %c0_i32_1 = arith.constant 0 : i32
    return %arg0, %c0_i32, %c0_i32_0 : i32, i32, i32
  }
}

</mosaic_0001>

<bundles_post_ra>
// kernel: tpu_custom_call.1
= control target key start
LH: loop header
LB: loop body
LE: loop exit
PB: predicated region body
PF: predicated region fallthrough
CT: control target
= control target key end

     0   :  { %11 = vsyncpa [#allocation3], 0  ;;  %s4562_s0 = inlined_call_operand.vmem [shape: f32[2,32,64], index: 0, kind: input, shape index: {}]   ;;  %s4563_s1 = inlined_call_operand.hbm [shape: f32[64,384], index: 1, kind: input, shape index: {}]   ;;  %s4564_s2 = inlined_call_operand.hbm [shape: f32[1,384], index: 2, kind: input, shape index: {}]   ;;  %s4565_s3 = inlined_call_operand.vmem [shape: f32[2,32,1], index: 3, kind: input, shape index: {}]   ;;  %s4566_s4 = inlined_call_operand.vmem [shape: f32[2,1,32], index: 4, kind: input, shape index: {}]   ;;  %s4567_s5 = inlined_call_operand.vmem [shape: f32[2,1,32], index: 5, kind: input, shape index: {}]   ;;  %s4568_s6 = inlined_call_operand.hbm [shape: f32[2,32,64], index: 6, kind: output, shape index: {}]  }
   0x1   :  { %12 = vsyncpa [#allocation6], 0 }
   0x2   :  { %13 = vsyncpa [#allocation4], 0 }
   0x3   :  { %15 = vsyncpa [#allocation4 + $0x1], 0  ;;  %s3270_s21 = smov 0   ;;  %s3272_s22 = smov 0  }
   0x4   :  { %s3274_s23 = smov 0   ;;  %s3276_s24 = smov 0  }
   0x5 LB: > { %s3291_s25 = sadd.s32 4294967295, %s3216_s24   ;;  %s2724_s26 = sadd.s32 4294967294, %s3216_s24   ;;  %s3216_s24 = sphi %s3276_s24, %s4638_s24   ;;  %s3212_s23 = sphi %s3274_s23, %s4637_s23   ;;  %s3208_s22 = sphi %s3272_s22, %s4636_s22   ;;  %s3204_s21 = sphi %s3270_s21, %s4635_s21  }
   0x6   : > { %s3295_s27 = sadd.s32 1, %s3216_s24   ;;  %s174_s28 = sadd.s32 1, %s3212_s23 }
   0x7   : > { %s171_s29 = ssub.s32 %s3216_s24, %s3295_s27  ;;  %p184_p0 = scmp.ne.s32.totalorder %s3212_s23, %s3208_s22 }
   0x8   : > { %p172_p1 = scmp.eq.s32.totalorder %s171_s29, 0  ;;  %p185_p2 = scmp.eq.s32.totalorder %s3291_s25, 1 }
   0x9   : > { %p190_p3 = scmp.ne.s32.totalorder %s3208_s22, %s3204_s21  ;;  %p191_p4 = scmp.eq.s32.totalorder %s2724_s26, 1 }
   0xa   : > { %s3306_s30 = scalar_select %p172_p1, %s3212_s23, %s174_s28  }
   0xb   : > { %p3308_p5 = por %p185_p2, %p184_p0  ;;  %p3312_p6 = por %p191_p4, %p190_p3 }
   0xc   : > { %p2725_p7 = scmp.ge.s32.totalorder %s3216_s24, 1  ;;  %p198_p8 = scmp.lt.s32.totalorder %s3216_s24, 3 }
   0xd   : > { %p2802_p9 = scmp.eq.s32.totalorder %s3291_s25, 0  ;;  %s209_s12 = sshll.u32 %s4563_s1, 4  ;;  %s210_s12 = int_to_ptr.hbm [resolvable:$true] %s209_s12 }
   0xe   : > { %p3319_p10 = pnand %p2725_p7, %p198_p8  ;;  %s3218_s13 = smov [#allocation2]  }
   0xf   : > { %s211_s14 = sshll.u32 %s3218_s13, 4  ;;  %s224_s17 = sshll.u32 %s4564_s2, 4  ;;  %s212_s14 = int_to_ptr.vmem [resolvable:$true] %s211_s14  ;;  %s225_s17 = int_to_ptr.hbm [resolvable:$true] %s224_s17 }
  0x10   : > { %p2791_p11 = pneg %p3319_p10  ;;  %s3219_s18 = smov 384  }
  0x11   : > { %s3220_s19 = smov 24   ;;  %s3221_s20 = smov [#allocation5]  }
  0x12   : > { %p2792_p12 = pnand %p2802_p9, %p2791_p11  ;;  %s226_s26 = sshll.u32 %s3221_s20, 4  ;;  %s227_s26 = int_to_ptr.vmem [resolvable:$true] %s226_s26 }
  0x13   : > { %267 = sbr.rel (%p3319_p10) target bundleno = 2173 (0x87d), region = 44 }
  0x14   : > { %2794 = dma.hbm_to_vmem [thread:$0]  (!%p2792_p12), %s210_s12, 3072, %s212_s14, [#allocation3], %s3219_s18, %s3219_s18, %s3220_s19  }
  0x15   : > { %2797 = dma.hbm_to_vmem [thread:$0]  (!%p2792_p12), %s225_s17, 48, %s227_s26, [#allocation6]  }
  0x18   : > { %3191 = dma.done.wait (%p2802_p9), [#allocation3], 3072  }
  0x19   : > { %3193 = vsyncadd (%p2802_p9), [#allocation3], 4294964224 }
  0x1a   : > { %3195 = dma.done.wait (%p2802_p9), [#allocation6], 48  }
  0x1b   : > { %3197 = vsyncadd (%p2802_p9), [#allocation6], 4294967248  ;;  %p314_p13 = scmp.lt.s32.totalorder %s3291_s25, 1  ;;  %v3222_v0 = vmov 0   ;;  %v356_v1 = vld [vmem:[#allocation2 + $0xa8] sm:$0xff]  ;;  %v353_v2 = vld [vmem:[#allocation2 + $0x90] sm:$0xff] }
  0x1c   : > { %2857 = vset.pattern.permute.xlu1 %v3222_v0  ;;  %2856 = vset.pattern.permute.xlu0 %v3222_v0  ;;  %v350_v3 = vld [vmem:[#allocation2 + $0x78] sm:$0xff]  ;;  %v347_v5 = vld [vmem:[#allocation2 + $0x60] sm:$0xff]  ;;  %v344_v8 = vld [vmem:[#allocation2 + $0x48] sm:$0xff]  ;;  %vm367_vm3 = vcmask 523264   ;;  %s3223_s15 = smov 112   ;;  %s3224_s16 = smov 64  }
  0x1d   : > { %s3347_s28 = scalar_select %p314_p13, %s3291_s25, 1  ;;  %2898 = vset.pattern.permute.xlu2 %v3222_v0  ;;  %388 = vmatpush.msra.mxu0 %v356_v1  ;;  %v341_v9 = vld [vmem:[#allocation2 + $0x30] sm:$0xff]  ;;  %v338_v11 = vld [vmem:[#allocation2 + $0x18] sm:$0xff]  ;;  %v335_v15 = vld [vmem:[#allocation2] sm:$0xff]  ;;  %vm4569_vm9 = vmmov 1   ;;  %vm771_vm12 = vcmask 130048  }
  0x1e   : > { %v357_v21 = vld [vmem:[#allocation2 + $0xb0] sm:$0xff]  ;;  %v354_v22 = vld [vmem:[#allocation2 + $0x98] sm:$0xff]  ;;  %v351_v23 = vld [vmem:[#allocation2 + $0x80] sm:$0xff]  ;;  %s3225_s17 = smov 96   ;;  %s3227_s18 = smov 80  }
  0x1f   : > { %s2778_s29 = sshll.u32 %s3347_s28, 5  ;;  %389 = vmatpush.msra.mxu0 %v353_v2  ;;  %417 = vmatpush.msra.mxu1 %v357_v21  ;;  %v348_v24 = vld [vmem:[#allocation2 + $0x68] sm:$0xff]  ;;  %v345_v25 = vld [vmem:[#allocation2 + $0x50] sm:$0xff]  ;;  %v342_v26 = vld [vmem:[#allocation2 + $0x38] sm:$0xff]  ;;  %s326_s26 = scalar_lea.vmem %s4566_s4, %s3347_s28 }
  0x20   : > { %s323_s11 = scalar_lea.vmem %s4565_s3, %s2778_s29  ;;  %s318_s14 = scalar_lea.vmem %s4562_s0, %s2778_s29  ;;  %v358_v27 = vld [vmem:[#allocation2 + $0xb8] sm:$0xff]  ;;  %v339_v28 = vld [vmem:[#allocation2 + $0x20] sm:$0xff]  ;;  %v336_v30 = vld [vmem:[#allocation2 + $0x8] sm:$0xff] }
  0x21   : > { %v3354_v4 = vld [vmem:[%s323_s11] sm:$0xff]  ;;  %390 = vmatpush.msra.mxu0 %v350_v3  ;;  %v3360_v7 = vld [vmem:[%s323_s11 + $0x8] sm:$0xff]  ;;  %v3363_v10 = vld [vmem:[%s323_s11 + $0x10] sm:$0xff]  ;;  %418 = vmatpush.msra.mxu1 %v354_v22  ;;  %s329_s10 = scalar_lea.vmem %s4567_s5, %s3347_s28  ;;  %s3230_s28 = smov 16  }
  0x22   : > { %vm471_vm0 = vcmp.gt.f32.partialorder %v3354_v4, 0.5  ;;  %vm472_vm1 = vcmp.gt.f32.partialorder %v3360_v7, 0.5  ;;  %vm473_vm2 = vcmp.gt.f32.partialorder %v3363_v10, 0.5  ;;  %v3372_v13 = vld [vmem:[%s323_s11 + $0x18] sm:$0xff]  ;;  %v331_v16 = vld [vmem:[%s318_s14] sm:$0xff]  ;;  %v332_v18 = vld [vmem:[%s318_s14 + $0x8] sm:$0xff]  ;;  %446 = vmatpush.msra.mxu2 %v358_v27 }
  0x23   : > { %v479_v6 = vsel %vm471_vm0, 1, %v3222_v0  ;;  %391 = vmatpush.msra.mxu0 %v347_v5  ;;  %v481_v12 = vsel %vm473_vm2, 1, %v3222_v0  ;;  %v480_v14 = vsel %vm472_vm1, 1, %v3222_v0  ;;  %vm474_vm4 = vcmp.gt.f32.partialorder %v3372_v13, 0.5  ;;  %v333_v19 = vld [vmem:[%s318_s14 + $0x10] sm:$0xff]  ;;  %v3384_v20 = vld [vmem:[%s318_s14 + $0x18] sm:$0xff]  ;;  %419 = vmatpush.msra.mxu1 %v351_v23  ;;  %vm3471_vm10 = vmxor %vm472_vm1, %vm4569_vm9 }
  0x24   : > { %484 = vperm.xlu1 %2857, %v479_v6   ;;  %490 = vperm.xlu0 %2856, %v481_v12   ;;  %v482_v17 = vsel %vm474_vm4, 1, %v3222_v0  ;;  %v355_v29 = vld [vmem:[#allocation2 + $0xa0] sm:$0xff]  ;;  %v352_v31 = vld [vmem:[#allocation2 + $0x88] sm:$0xff]  ;;  %v349_v32 = vld [vmem:[#allocation2 + $0x70] sm:$0xff]  ;;  %s3231_s11 = smov 32   ;;  %s311_s12 = sand.u32 1, %s3208_s22  }
  0x25   : > { %392 = vmatpush.msra.mxu0 %v344_v8  ;;  %420 = vmatpush.msra.mxu1 %v348_v24  ;;  %v346_v33 = vld [vmem:[#allocation2 + $0x58] sm:$0xff]  ;;  %v343_v34 = vld [vmem:[#allocation2 + $0x40] sm:$0xff]  ;;  %v340_v35 = vld [vmem:[#allocation2 + $0x28] sm:$0xff]  ;;  %s2732_s13 = sshll.u32 %s311_s12, 5 }
  0x26   : > { %447 = vmatpush.msra.mxu2 %v355_v29  ;;  %v337_v36 = vld [vmem:[#allocation2 + $0x10] sm:$0xff]  ;;  %v3391_v38 = vld [vmem:[#allocation5] sm:$0x7]  ;;  %vm3489_vm11 = vmxor %vm471_vm0, %vm4569_vm9  ;;  %s4480_s14 = scalar_lea.vmem [#allocation7], %s2732_s13 }
  0x27   : > { %393 = vmatpush.msra.mxu0 %v341_v9  ;;  %421 = vmatpush.msra.mxu1 %v345_v25  ;;  %v361_v40 = vperm.slane %v3391_v38, 0  ;;  %v534_v4 = vsel %vm3489_vm11, 1, %v3222_v0  ;;  %vm3516_vm13 = vmxor %vm473_vm2, %vm4569_vm9 }
  0x28   : > { %448 = vmatpush.msra.mxu2 %v352_v31  ;;  %vm3525_vm14 = vmxor %vm474_vm4, %vm4569_vm9 }
  0x29   : > { %394 = vmatpush.msra.mxu0 %v338_v11  ;;  %422 = vmatpush.msra.mxu1 %v342_v26 }
  0x2a   : > { %449 = vmatpush.msra.mxu2 %v349_v32 }
  0x2b   : > { %395 = vmatpush.msra.mxu0 %v335_v15  ;;  %423 = vmatpush.msra.mxu1 %v339_v28 }
  0x2c   : > { %487 = vperm.xlu1 %2857, %v480_v14   ;;  %2737 = vmatmul.msk.f32.vlgmr.msra.gmra.mxu0 %vm367_vm3, %v331_v16 }
  0x2d   : > { %493 = vperm.xlu0 %2856, %v482_v17   ;;  %424 = vmatpush.msra.mxu1 %v336_v30 }
  0x2e   : > { %2741 = vmatmul.msk.f32.vlgmr.msra.gmra.mxu1 %vm367_vm3, %v331_v16  ;;  %450 = vmatpush.msra.mxu2 %v346_v33 }
  0x30   : > { %451 = vmatpush.msra.mxu2 %v343_v34 }
  0x32   : > { %452 = vmatpush.msra.mxu2 %v340_v35 }
  0x34   : > { %2738 = vmatmul.msk.f32.gmra.mxu0 %vm367_vm3, %v332_v18  ;;  %453 = vmatpush.msra.mxu2 %v337_v36 }
  0x35   : > { %2745 = vmatmul.msk.f32.vlgmr.msra.gmra.mxu2 %vm367_vm3, %v331_v16 }
  0x36   : > { %2742 = vmatmul.msk.f32.gmra.mxu1 %vm367_vm3, %v332_v18 }
  0x3c   : > { %2739 = vmatmul.msk.f32.gmra.mxu0 %vm367_vm3, %v333_v19 }
  0x3d   : > { %2746 = vmatmul.msk.f32.gmra.mxu2 %vm367_vm3, %v332_v18 }
  0x3e   : > { %2743 = vmatmul.msk.f32.gmra.mxu1 %vm367_vm3, %v333_v19 }
  0x44   : > { %2740 = vmatmul.msk.f32.gmra.mxu0 %vm367_vm3, %v3384_v20 }
  0x45   : > { %2747 = vmatmul.msk.f32.gmra.mxu2 %vm367_vm3, %v333_v19 }
  0x46   : > { %2744 = vmatmul.msk.f32.gmra.mxu1 %vm367_vm3, %v3384_v20 }
  0x4d   : > { %2748 = vmatmul.msk.f32.gmra.mxu2 %vm367_vm3, %v3384_v20 }
  0x96   : > { %v485_v37 = vpop.permute.xlu1 %484  ;;  %v491_v49 = vpop.permute.xlu0 %490 }
  0x97   : > { %vm495_vm5 = vcmp.eq.s32.totalorder %v485_v37, 1  ;;  %vm497_vm7 = vcmp.eq.s32.totalorder %v491_v49, 1 }
  0x9e   : > { %v488_v42 = vpop.permute.xlu1 %487 }
  0x9f   : > { %vm496_vm6 = vcmp.eq.s32.totalorder %v488_v42, 1  ;;  %v494_v2 = vpop.permute.xlu0 %493 }
  0xa0   : > { %vm498_vm8 = vcmp.eq.s32.totalorder %v494_v2, 1 }
  0xa9   : > { %v397_v39 = vpop.f32.mrf.mxu0 }
  0xaa   : > { %v3396_v41 = vadd.f32 %v397_v39, %v361_v40 }
  0xab   : > { %v426_v23 = vpop.f32.mrf.mxu1 }
  0xac   : > { %v619_v45 = vpack.c.bf16 %v3396_v41, %v3396_v41  ;;  %v3406_v46 = vsel %vm495_vm5, 0.0, %v3396_v41 }
  0xad   : > { %v675_v56 = vpack.c.bf16 %v3406_v46, %v3406_v46 }
  0xae   : > { %v3425_v54 = vunpack.c.l.b16 %v619_v45 }
  0xaf   : > { %v761_v61 = vunpack.c.l.b16 %v675_v56 }
  0xb1   : > { %v400_v43 = vpop.f32.mrf.mxu0 }
  0xb2   : > { %v3400_v44 = vadd.f32 %v400_v43, %v361_v40 }
  0xb3   : > { %v429_v31 = vpop.f32.mrf.mxu1 }
  0xb4   : > { %v3410_v47 = vpack.i.bf16 %v3400_v44, %v3396_v41  ;;  %v3413_v48 = vsel %vm496_vm6, 0.0, %v3400_v44  ;;  %v620_v50 = vpack.c.bf16 %v3400_v44, %v3400_v44 }
  0xb5   : > { %v2858_v51 = vpack.i.bf16 %v3413_v48, %v3406_v46  ;;  %v676_v52 = vpack.c.bf16 %v3413_v48, %v3413_v48  ;;  %v2909_v53 = vpack.i.bf16 %v3400_v44, %v3413_v48 }
  0xb6   : > { %2879 = vrot.lane.b32.xlu1 %v3410_v47, %s3223_s15  ;;  %v3427_v55 = vunpack.c.l.b16 %v620_v50 }
  0xb7   : > { %2859 = vrot.lane.b32.xlu0 %v2858_v51, %s3223_s15  ;;  %v762_v59 = vunpack.c.l.b16 %v676_v52 }
  0xb8   : > { %v755_v57 = vpack.c.b16 %v3427_v55, %v3425_v54 }
  0xb9   : > { %v403_v58 = vpop.f32.mrf.mxu0  ;;  %v765_v63 = vpack.c.b16 %v762_v59, %v761_v61 }
  0xba   : > { %v404_v60 = vadd.f32 %v403_v58, %v361_v40 }
  0xbb   : > { %v432_v59 = vpop.f32.mrf.mxu1 }
  0xbc   : > { %v3436_v62 = vsel %vm497_vm7, 0.0, %v404_v60  ;;  %v621_v16 = vpack.c.bf16 %v404_v60, %v404_v60  ;;  %vm1000_vm7 = vcmask 261120  }
  0xbd   : > { %v2899_v1 = vpack.i.bf16 %v3436_v62, %v3396_v41  ;;  %v677_v5 = vpack.c.bf16 %v3436_v62, %v3436_v62 }
  0xbe   : > { %v3454_v19 = vunpack.c.l.b16 %v621_v16  ;;  %v535_v16 = vsel %vm3471_vm10, 1, %v3222_v0 }
  0xbf   : > { %767 = vrot.lane.b32.xlu0 %v765_v63, %s3224_s16  ;;  %v763_v14 = vunpack.c.l.b16 %v677_v5 }
  0xc1   : > { %v406_v3 = vpop.f32.mrf.mxu0 }
  0xc2   : > { %v407_v6 = vadd.f32 %v406_v3, %v361_v40 }
  0xc4   : > { %v3443_v8 = vsel %vm498_vm8, 0.0, %v407_v6  ;;  %v3445_v9 = vpack.i.bf16 %v407_v6, %v404_v60  ;;  %v622_v17 = vpack.c.bf16 %v407_v6, %v407_v6 }
  0xc5   : > { %v2863_v11 = vpack.i.bf16 %v3443_v8, %v3436_v62  ;;  %v678_v12 = vpack.c.bf16 %v3443_v8, %v3443_v8  ;;  %v2904_v15 = vpack.i.bf16 %v3406_v46, %v3443_v8  ;;  %v363_v62 = vperm.slane %v3391_v38, 2 }
  0xc6   : > { %v3456_v20 = vunpack.c.l.b16 %v622_v17 }
  0xc7   : > { %2864 = vrot.lane.b32.xlu2 %v2863_v11, %s3223_s15  ;;  %v764_v18 = vunpack.c.l.b16 %v678_v12 }
  0xc8   : > { %v756_v22 = vpack.c.b16 %v3456_v20, %v3454_v19 }
  0xc9   : > { %v766_v21 = vpack.c.b16 %v764_v18, %v763_v14  ;;  %v362_v14 = vperm.slane %v3391_v38, 1  ;;  %v435_v18 = vpop.f32.mrf.mxu1 }
  0xcb   : > { %769 = vrot.lane.b32.xlu1 %v766_v21, %s3224_s16  ;;  %v455_v21 = vpop.f32.mrf.mxu2  ;;  %v433_v7 = vadd.f32 %v432_v59, %v362_v14 }
  0xcf   : > { %2869 = vrot.lane.b32.xlu2 %v2863_v11, %s3225_s17 }
  0xd7   : > { %2874 = vrot.lane.b32.xlu2 %v2858_v51, %s3225_s17 }
 0x121   : > { %v2865_v24 = vpop.permute.xlu2 %2864 }
 0x122   : > { %v2867_v25 = vunpack.i.h.bf16 %v2865_v24  ;;  %v2866_v26 = vunpack.i.l.bf16 %v2865_v24  ;;  %v3484_v24 = vadd.f32 %v435_v18, %v362_v14 }
 0x124   : > { %v682_v27 = vpack.c.bf16 %v2867_v25, %v2867_v25  ;;  %v681_v28 = vpack.c.bf16 %v2866_v26, %v2866_v26  ;;  %v3493_v26 = vadd.f32 %v429_v31, %v362_v14 }
 0x126   : > { %v820_v29 = vunpack.c.l.b16 %v682_v27  ;;  %v819_v30 = vunpack.c.l.b16 %v681_v28  ;;  %4590 = vst [vmem:[#allocation11_spill] sm:$0xff] %v3493_v26  ;;  %v733_v28 = vpack.c.bf16 %v433_v7, %v433_v7 }
 0x128   : > { %v822_v32 = vpack.c.b16 %v820_v29, %v819_v30  ;;  %v3475_v6 = vpop.permute.xlu1 %2879  ;;  %v734_v29 = vpack.c.bf16 %v3484_v24, %v3484_v24  ;;  %v3498_v30 = vadd.f32 %v426_v23, %v362_v14 }
 0x129   : > { %v2870_v33 = vpop.permute.xlu2 %2869  ;;  %v2860_v34 = vpop.permute.xlu0 %2859 }
 0x12a   : > { %v2872_v35 = vunpack.i.h.bf16 %v2870_v33  ;;  %v2871_v36 = vunpack.i.l.bf16 %v2870_v33  ;;  %v2862_v37 = vunpack.i.h.bf16 %v2860_v34  ;;  %v2861_v39 = vunpack.i.l.bf16 %v2860_v34  ;;  %825 = vrot.lane.b32.xlu1 %v822_v32, %s3224_s16  ;;  %4591 = vst [vmem:[#allocation12_spill] sm:$0xff] %v3498_v30 }
 0x12b   : > { %v1769_v32 = vunpack.c.l.b16 %v733_v28  ;;  %v1770_v33 = vunpack.c.l.b16 %v734_v29  ;;  %v731_v31 = vpack.c.bf16 %v3498_v30, %v3498_v30  ;;  %v732_v34 = vpack.c.bf16 %v3493_v26, %v3493_v26 }
 0x12c   : > { %v686_v40 = vpack.c.bf16 %v2872_v35, %v2872_v35  ;;  %v685_v42 = vpack.c.bf16 %v2871_v36, %v2871_v36  ;;  %v680_v43 = vpack.c.bf16 %v2862_v37, %v2862_v37  ;;  %v679_v45 = vpack.c.bf16 %v2861_v39, %v2861_v39  ;;  %v458_v35 = vpop.f32.mrf.mxu2 }
 0x12d   : > { %v1772_v37 = vpack.c.b16 %v1770_v33, %v1769_v32  ;;  %v3520_v39 = vunpack.c.l.b16 %v731_v31  ;;  %v2919_v10 = vpack.i.bf16 %v433_v7, %v3498_v30  ;;  %v3578_v46 = vadd.f32 %v458_v35, %v363_v62 }
 0x12e   : > { %v875_v49 = vunpack.c.l.b16 %v686_v40  ;;  %v874_v50 = vunpack.c.l.b16 %v685_v42  ;;  %v818_v51 = vunpack.c.l.b16 %v680_v43  ;;  %v817_v52 = vunpack.c.l.b16 %v679_v45 }
 0x12f   : > { %v1768_v40 = vunpack.c.l.b16 %v732_v34  ;;  %v536_v42 = vsel %vm3516_vm13, 1, %v3222_v0  ;;  %v537_v43 = vsel %vm3525_vm14, 1, %v3222_v0  ;;  %v3539_v45 = vadd.f32 %v455_v21, %v363_v62 }
 0x130   : > { %v877_v56 = vpack.c.b16 %v875_v49, %v874_v50  ;;  %v821_v58 = vpack.c.b16 %v818_v51, %v817_v52  ;;  %v3558_v50 = vpack.i.bf16 %v3484_v24, %v433_v7  ;;  %v2944_v48 = vpack.i.bf16 %v3578_v46, %v3493_v26 }
 0x131   : > { %v2875_v60 = vpop.permute.xlu2 %2874  ;;  %v768_v23 = vpop.permute.xlu0 %767  ;;  %v1771_v13 = vpack.c.b16 %v1768_v40, %v3520_v39  ;;  %v2924_v49 = vpack.i.bf16 %v3498_v30, %v3539_v45  ;;  %v2881_v51 = vunpack.i.l.bf16 %v3475_v6 }
 0x132   : > { %v2877_v61 = vunpack.i.h.bf16 %v2875_v60  ;;  %v2876_v63 = vunpack.i.l.bf16 %v2875_v60  ;;  %2889 = vrot.lane.b32.xlu1 %v3445_v9, %s3223_s15  ;;  %880 = vrot.lane.b32.xlu2 %v877_v56, %s3224_s16  ;;  %4596 = vst [vmem:[#allocation13_spill] sm:$0xff] %v3558_v50 }
 0x133   : > { %823 = vrot.lane.b32.xlu0 %v821_v58, %s3224_s16  ;;  %v623_v56 = vpack.c.bf16 %v2881_v51, %v2881_v51  ;;  %v503_v51 = vlaneseq }
 0x134   : > { %v684_v2 = vpack.c.bf16 %v2877_v61, %v2877_v61  ;;  %v683_v3 = vpack.c.bf16 %v2876_v63, %v2876_v63  ;;  %v461_v38 = vpop.f32.mrf.mxu2 }
 0x135   : > { %v3560_v55 = vadd.f32 %v461_v38, %v363_v62  ;;  %v807_v63 = vunpack.c.l.b16 %v623_v56 }
 0x136   : > { %v873_v11 = vunpack.c.l.b16 %v684_v2  ;;  %v872_v12 = vunpack.c.l.b16 %v683_v3 }
 0x138   : > { %v876_v17 = vpack.c.b16 %v873_v11, %v872_v12 }
 0x13a   : > { %542 = vperm.xlu1 %2857, %v535_v16   ;;  %878 = vrot.lane.b32.xlu2 %v876_v17, %s3224_s16 }
 0x13b   : > { %2884 = vrot.lane.b32.xlu0 %v3410_v47, %s3225_s17 }
 0x13c   : > { %v464_v54 = vpop.f32.mrf.mxu2 }
 0x13d   : > { %v770_v27 = vpop.permute.xlu1 %769 }
 0x13e   : > { %v782_v47 = vsel %vm771_vm12, %v770_v27, 0 }
 0x13f   : > { %790 = vmatpush.bf16.xpose.msra.mxu3 %v782_v47 }
 0x142   : > { %2900 = vrot.lane.b32.xlu1 %v2899_v1, %s3227_s18  ;;  %2894 = vrot.lane.b32.xlu2 %v3445_v9, %s3225_s17  ;;  %v779_v1 = vsel %vm771_vm12, %v768_v23, 0 }
 0x143   : > { %539 = vperm.xlu0 %2856, %v534_v4  }
 0x147   : > { %791 = vmatpush.bf16.xpose.msra.mxu3 %v779_v1 }
 0x14a   : > { %2920 = vrot.lane.b32.xlu1 %v2919_v10, %s3223_s15  ;;  %545 = vperm.xlu2 %2898, %v536_v42  }
 0x14b   : > { %548 = vperm.xlu0 %2856, %v537_v43  }
 0x14e   : > { %2749 = vmatmul.msk.bf16.vlgmr.msra.gmra.mxu3 %vm771_vm12, %v755_v57  ;;  %v3564_v57 = vadd.f32 %v464_v54, %v363_v62 }
 0x14f   : > { %1787 = vmatpush.bf16.msrb.mxu3 %v1772_v37 }
 0x150   : > { %v3574_v44 = vpack.i.bf16 %v3564_v57, %v3560_v55 }
 0x152   : > { %2925 = vrot.lane.b32.xlu1 %v2924_v49, %s3225_s17  ;;  %2905 = vrot.lane.b32.xlu2 %v2904_v15, %s3227_s18 }
 0x153   : > { %1788 = vmatpush.bf16.msrb.mxu3 %v1771_v13  ;;  %2910 = vrot.lane.b32.xlu0 %v2909_v53, %s3227_s18 }
 0x15a   : > { %2940 = vrot.lane.b32.xlu1 %v3558_v50, %s3225_s17 }
 0x15b   : > { %2915 = vrot.lane.b32.xlu0 %v3445_v9, %s3227_s18 }
 0x15e   : > { %2750 = vmatmul.msk.bf16.gmra.mxu3 %vm771_vm12, %v756_v22  ;;  %v2882_v22 = vunpack.i.h.bf16 %v3475_v6 }
 0x160   : > { %v624_v52 = vpack.c.bf16 %v2882_v22, %v2882_v22 }
 0x162   : > { %2965 = vrot.lane.b32.xlu1 %v3574_v44, %s3223_s15  ;;  %v808_v61 = vunpack.c.l.b16 %v624_v52 }
 0x163   : > { %2930 = vrot.lane.b32.xlu0 %v2924_v49, %s3227_s18 }
 0x164   : > { %v811_v3 = vpack.c.b16 %v808_v61, %v807_v63 }
 0x16b   : > { %2945 = vrot.lane.b32.xlu0 %v2944_v48, %s3223_s15 }
 0x173   : > { %2950 = vrot.lane.b32.xlu0 %v2944_v48, %s3225_s17 }
 0x17b   : > { %1958 = vrot.lane.b32.xlu0 %v3578_v46, %s3227_s18 }
 0x183   : > { %2955 = vrot.lane.b32.xlu0 %v3574_v44, %s3225_s17 }
 0x18c   : > { %v881_v53 = vpop.permute.xlu2 %880 }
 0x18d   : > { %v892_v8 = vsel %vm771_vm12, %v881_v53, 0 }
 0x18e   : > { %900 = vmatpush.bf16.xpose.msrb.mxu1 %v892_v8 }
 0x194   : > { %v879_v9 = vpop.permute.xlu2 %878 }
 0x195   : > { %v889_v15 = vsel %vm771_vm12, %v879_v9, 0 }
 0x196   : > { %901 = vmatpush.bf16.xpose.msrb.mxu1 %v889_v15 }
 0x19c   : > { %v826_v19 = vpop.permute.xlu1 %825  ;;  %v2895_v2 = vpop.permute.xlu2 %2894 }
 0x19d   : > { %v837_v20 = vsel %vm771_vm12, %v826_v19, 0  ;;  %v2897_v31 = vunpack.i.h.bf16 %v2895_v2  ;;  %v2896_v34 = vunpack.i.l.bf16 %v2895_v2 }
 0x19e   : > { %845 = vmatpush.bf16.xpose.msrb.mxu0 %v837_v20 }
 0x19f   : > { %v630_v37 = vpack.c.bf16 %v2897_v31, %v2897_v31  ;;  %v629_v40 = vpack.c.bf16 %v2896_v34, %v2896_v34 }
 0x1a1   : > { %v865_v38 = vunpack.c.l.b16 %v630_v37  ;;  %v864_v49 = vunpack.c.l.b16 %v629_v40 }
 0x1a3   : > { %v867_v9 = vpack.c.b16 %v865_v38, %v864_v49 }
 0x1a4   : > { %v2890_v58 = vpop.permute.xlu1 %2889  ;;  %v3600_v32 = vpop.permute.xlu2 %545 }
 0x1a5   : > { %v824_v59 = vpop.permute.xlu0 %823  ;;  %v2892_v17 = vunpack.i.h.bf16 %v2890_v58  ;;  %v2891_v6 = vunpack.i.l.bf16 %v2890_v58  ;;  %vm552_vm3 = vcmp.eq.s32.totalorder %v3600_v32, 1 }
 0x1a6   : > { %v834_v60 = vsel %vm771_vm12, %v824_v59, 0 }
 0x1a7   : > { %846 = vmatpush.bf16.xpose.msrb.mxu0 %v834_v60  ;;  %v626_v28 = vpack.c.bf16 %v2892_v17, %v2892_v17  ;;  %v625_v29 = vpack.c.bf16 %v2891_v6, %v2891_v6  ;;  %v3625_v60 = vshrl.u32 %v503_v51, 7  ;;  %v3636_v17 = vand.u32 127, %v503_v51 }
 0x1a9   : > { %v810_v23 = vunpack.c.l.b16 %v626_v28  ;;  %v809_v35 = vunpack.c.l.b16 %v625_v29  ;;  %v475_v28 = vld [vmem:[%s326_s26] sm:$0x1]  ;;  %s2595_s26 = scalar_lea.sflag [#allocation4], %s311_s12 }
 0x1aa   : > { %vm476_vm15 = vcmp.gt.f32.partialorder %v475_v28, 0.5 }
 0x1ab   : > { %v812_v1 = vpack.c.b16 %v810_v23, %v809_v35  ;;  %vm558_vm1 = vmxor %vm476_vm15, %vm4569_vm9 }
 0x1ac   : > { %v3595_v11 = vpop.permute.xlu1 %542  ;;  %v3611_v43 = vpop.permute.xlu2 %2905 }
 0x1ad   : > { %v2885_v12 = vpop.permute.xlu0 %2884  ;;  %v2908_v48 = vunpack.i.h.bf16 %v3611_v43 }
 0x1ae   : > { %v2887_v14 = vunpack.i.h.bf16 %v2885_v12  ;;  %v2886_v16 = vunpack.i.l.bf16 %v2885_v12  ;;  %2751 = vmatmul.msk.bf16.vlgmr.msrb.gmra.mxu0 %vm771_vm12, %v811_v3  ;;  %v506_v3 = vadd.s32 16, %v3625_v60 }
 0x1af   : > { %v687_v19 = vpack.c.bf16 %v2908_v48, %v2908_v48 }
 0x1b0   : > { %v628_v18 = vpack.c.bf16 %v2887_v14, %v2887_v14  ;;  %v627_v21 = vpack.c.bf16 %v2886_v16, %v2886_v16 }
 0x1b1   : > { %v927_v52 = vunpack.c.l.b16 %v687_v19 }
 0x1b2   : > { %v863_v7 = vunpack.c.l.b16 %v628_v18  ;;  %v862_v27 = vunpack.c.l.b16 %v627_v21  ;;  %v512_v21 = vsub.s32 %v506_v3, %v3636_v17 }
 0x1b4   : > { %v866_v47 = vpack.c.b16 %v863_v7, %v862_v27  ;;  %v3598_v4 = vpop.permute.xlu1 %2900  ;;  %v521_v35 = vsub.s32 0, %v512_v21  ;;  %vm520_vm0 = vcmp.lt.s32.totalorder %v512_v21, 0 }
 0x1b5   : > { %v3602_v33 = vpop.permute.xlu0 %539  ;;  %v2903_v37 = vunpack.i.h.bf16 %v3598_v4 }
 0x1b6   : > { %2753 = vmatmul.msk.bf16.vlgmr.msrb.gmra.mxu1 %vm771_vm12, %v866_v47  ;;  %v2934_v47 = vpack.i.bf16 %v3539_v45, %v3484_v24  ;;  %v1997_v24 = vpack.c.b16 %v3520_v39, %v3520_v39  ;;  %v522_v48 = vsel %vm520_vm0, %v521_v35, %v512_v21  ;;  %vm550_vm0 = vcmp.eq.s32.totalorder %v3602_v33, 1 }
 0x1b7   : > { %vm528_vm2 = vcmp.le.s32.totalorder %v522_v48, 4 }
 0x1b8   : > { %vm556_vm4 = vmand %vm528_vm2, %vm552_vm3 }
 0x1bc   : > { %v3605_v62 = vpop.permute.xlu1 %2920 }
 0x1bd   : > { %v2922_v10 = vunpack.i.l.bf16 %v3605_v62  ;;  %v3608_v42 = vpop.permute.xlu0 %548 }
 0x1be   : > { %2752 = vmatmul.msk.bf16.gmra.mxu0 %vm771_vm12, %v812_v1 }
 0x1bf   : > { %v735_v13 = vpack.c.bf16 %v2922_v10, %v2922_v10 }
 0x1c1   : > { %v3613_v54 = vunpack.c.l.b16 %v735_v13  ;;  %v2907_v13 = vunpack.i.l.bf16 %v3611_v43  ;;  %v559_v43 = vsel %vm558_vm1, 1, %v3222_v0 }
 0x1c3   : > { %v2032_v53 = vpack.c.b16 %v3613_v54, %v3613_v54  ;;  %v690_v51 = vpack.c.bf16 %v2907_v13, %v2907_v13  ;;  %v510_v13 = vsub.s32 %v3625_v60, %v3636_v17 }
 0x1c4   : > { %v3618_v8 = vpop.permute.xlu1 %2925 }
 0x1c5   : > { %v3620_v15 = vpop.permute.xlu0 %2910  ;;  %2033 = vrot.lane.b32.xlu0 %v2032_v53, %s3224_s16  ;;  %v2927_v16 = vunpack.i.l.bf16 %v3618_v8  ;;  %v689_v53 = vpack.c.bf16 %v2903_v37, %v2903_v37  ;;  %v930_v0 = vunpack.c.l.b16 %v690_v51  ;;  %vm514_vm8 = vcmp.lt.s32.totalorder %v510_v13, 0 }
 0x1c6   : > { %v2912_v20 = vunpack.i.l.bf16 %v3620_v15  ;;  %2754 = vmatmul.msk.bf16.gmra.mxu1 %vm771_vm12, %v867_v9 }
 0x1c7   : > { %v1983_v29 = vpack.c.bf16 %v2927_v16, %v2927_v16 }
 0x1c8   : > { %v688_v22 = vpack.c.bf16 %v2912_v20, %v2912_v20 }
 0x1c9   : > { %v2006_v40 = vunpack.c.l.b16 %v1983_v29 }
 0x1ca   : > { %v928_v56 = vunpack.c.l.b16 %v688_v22 }
 0x1cc   : > { %v2941_v58 = vpop.permute.xlu1 %2940  ;;  %v931_v59 = vpack.c.b16 %v928_v56, %v927_v52  ;;  %v929_v56 = vunpack.c.l.b16 %v689_v53 }
 0x1cd   : > { %v2943_v61 = vunpack.i.h.bf16 %v2941_v58  ;;  %v2942_v63 = vunpack.i.l.bf16 %v2941_v58  ;;  %v3627_v2 = vpop.permute.xlu0 %2915  ;;  %v2928_v58 = vunpack.i.h.bf16 %v3618_v8 }
 0x1ce   : > { %933 = vrot.lane.b32.xlu2 %v931_v59, %s3224_s16 }
 0x1cf   : > { %v742_v12 = vpack.c.bf16 %v2943_v61, %v2943_v61  ;;  %v741_v14 = vpack.c.bf16 %v2942_v63, %v2942_v63  ;;  %v560_v61 = vperm.slane %v559_v43, 0  ;;  %v739_v3 = vpack.c.bf16 %v2928_v58, %v2928_v58 }
 0x1d0   : > { %v507_v43 = vadd.s32 24, %v3625_v60 }
 0x1d1   : > { %v1864_v6 = vunpack.c.l.b16 %v742_v12  ;;  %v1863_v18 = vunpack.c.l.b16 %v741_v14  ;;  %v3639_v27 = vpop.f32.mrf.mxu3  ;;  %v932_v12 = vpack.c.b16 %v930_v0, %v929_v56  ;;  %vm3670_vm5 = vcmp.eq.s32.totalorder %v560_v61, 1 }
 0x1d2   : > { %vm564_vm6 = vmand %vm556_vm4, %vm3670_vm5 }
 0x1d3   : > { %v1866_v7 = vpack.c.b16 %v1864_v6, %v1863_v18  ;;  %v1861_v18 = vunpack.c.l.b16 %v739_v3 }
 0x1d5   : > { %v2931_v31 = vpop.permute.xlu0 %2930  ;;  %1881 = vmatpush.bf16.msra.mxu1 %v1866_v7 }
 0x1d6   : > { %v2933_v34 = vunpack.i.h.bf16 %v2931_v31  ;;  %v2932_v23 = vunpack.i.l.bf16 %v2931_v31  ;;  %2935 = vrot.lane.b32.xlu2 %v2934_v47, %s3223_s15 }
 0x1d8   : > { %v743_v1 = vpack.c.bf16 %v2933_v34, %v2933_v34  ;;  %v1984_v10 = vpack.c.bf16 %v2932_v23, %v2932_v23  ;;  %v2067_v34 = vpack.c.b16 %v1861_v18, %v1861_v18 }
 0x1d9   : > { %v3655_v20 = vpop.f32.mrf.mxu3 }
 0x1da   : > { %v3646_v38 = vunpack.c.l.b16 %v743_v1  ;;  %v2007_v49 = vunpack.c.l.b16 %v1984_v10 }
 0x1dc   : > { %4597 = vst [vmem:[#allocation14_spill] sm:$0xff] %v3646_v38  ;;  %v2102_v9 = vpack.c.b16 %v3646_v38, %v3646_v38  ;;  %v3653_v19 = vpack.c.b16 %v2007_v49, %v2006_v40  ;;  %v505_v49 = vadd.s32 8, %v3625_v60 }
 0x1dd   : > { %v3657_v22 = vpop.permute.xlu0 %2945 }
 0x1de   : > { %4598 = vst [vmem:[#allocation15_spill] sm:$0xff] %v3653_v19  ;;  %v2947_v52 = vunpack.i.l.bf16 %v3657_v22  ;;  %2103 = vrot.lane.b32.xlu1 %v2102_v9, %s3224_s16  ;;  %1998 = vrot.lane.b32.xlu2 %v1997_v24, %s3224_s16  ;;  %v2017_v39 = vsel %vm771_vm12, %v3653_v19, 0  ;;  %v515_v24 = vsub.s32 0, %v510_v13  ;;  %v511_v48 = vsub.s32 %v505_v49, %v3636_v17 }
 0x1df   : > { %2025 = vmatpush.bf16.xpose.msra.mxu3 %v2017_v39 }
 0x1e0   : > { %v736_v59 = vpack.c.bf16 %v2947_v52, %v2947_v52  ;;  %v516_v53 = vsel %vm514_vm8, %v515_v24, %v510_v13  ;;  %v518_v9 = vsub.s32 0, %v511_v48  ;;  %vm517_vm1 = vcmp.lt.s32.totalorder %v511_v48, 0 }
 0x1e1   : > { %v3679_v8 = vpop.f32.mrf.mxu3  ;;  %vm526_vm15 = vcmp.le.s32.totalorder %v516_v53, 4  ;;  %v513_v52 = vsub.s32 %v507_v43, %v3636_v17 }
 0x1e2   : > { %v1815_v63 = vunpack.c.l.b16 %v736_v59  ;;  %vm554_vm2 = vmand %vm526_vm15, %vm550_vm0  ;;  %v519_v51 = vsel %vm517_vm1, %v518_v9, %v511_v48  ;;  %vm553_vm1 = vcmp.eq.s32.totalorder %v3608_v42, 1 }
 0x1e3   : > { %vm562_vm3 = vmand %vm554_vm2, %vm3670_vm5  ;;  %vm527_vm4 = vcmp.le.s32.totalorder %v519_v51, 4  ;;  %v524_v39 = vsub.s32 0, %v513_v52  ;;  %vm523_vm8 = vcmp.lt.s32.totalorder %v513_v52, 0 }
 0x1e4   : > { %v3668_v14 = vpack.c.b16 %v1815_v63, %v3613_v54  ;;  %v3228_v54 = vmov -inf  }
 0x1e5   : > { %v2951_v6 = vpop.permute.xlu0 %2950  ;;  %v3682_v7 = vsel %vm564_vm6, 0.0, %v3228_v54  ;;  %vm551_vm6 = vcmp.eq.s32.totalorder %v3595_v11, 1  ;;  %v3704_v56 = vsel %vm562_vm3, 0.0, %v3228_v54  ;;  %v525_v60 = vsel %vm523_vm8, %v524_v39, %v513_v52  ;;  %vm570_vm8 = vmand %vm3489_vm11, %vm3670_vm5 }
 0x1e6   : > { %v2952_v32 = vunpack.i.l.bf16 %v2951_v6  ;;  %935 = vrot.lane.b32.xlu1 %v932_v12, %s3224_s16  ;;  %2960 = vrot.lane.b32.xlu2 %v3574_v44, %s3227_s18  ;;  %v2953_v28 = vunpack.i.h.bf16 %v2951_v6  ;;  %v3686_v29 = vadd.f32 %v3679_v8, %v3682_v7  ;;  %vm555_vm9 = vmand %vm527_vm4, %vm551_vm6  ;;  %v3708_v33 = vadd.f32 %v3639_v27, %v3704_v56 }
 0x1e7   : > { %vm563_vm15 = vmand %vm555_vm9, %vm3670_vm5  ;;  %vm529_vm0 = vcmp.le.s32.totalorder %v525_v60, 4  ;;  %vm4608_vm4 = vmmov 1  }
 0x1e8   : > { %v740_v21 = vpack.c.bf16 %v2952_v32, %v2952_v32  ;;  %v1987_v23 = vpack.c.bf16 %v2953_v28, %v2953_v28  ;;  %v1007_v44 = vsel %vm1000_vm7, %v3686_v29, -inf  ;;  %v1001_v17 = vsel %vm1000_vm7, %v3708_v33, -inf  ;;  %vm557_vm2 = vmand %vm529_vm0, %vm553_vm1 }
 0x1e9   : > { %v3716_v11 = vsel %vm563_vm15, 0.0, %v3228_v54  ;;  %vm565_vm3 = vmand %vm557_vm2, %vm3670_vm5  ;;  %v3726_v61 = vpop.f32.mrf.mxu3  ;;  %v2923_v32 = vunpack.i.h.bf16 %v3605_v62 }
 0x1ea   : > { %v1862_v47 = vunpack.c.l.b16 %v740_v21  ;;  %v2041_v37 = vunpack.c.l.b16 %v1987_v23  ;;  %v3720_v58 = vadd.f32 %v3655_v20, %v3716_v11  ;;  %v3729_v42 = vsel %vm565_vm3, 0.0, %v3228_v54  ;;  %vm572_vm9 = vmand %vm3516_vm13, %vm3670_vm5 }
 0x1eb   : > { %v3733_v0 = vadd.f32 %v3726_v61, %v3729_v42  ;;  %v737_v28 = vpack.c.bf16 %v2923_v32, %v2923_v32  ;;  %v2966_v32 = vpop.permute.xlu1 %2965  ;;  %vm571_vm15 = vmand %vm3471_vm10, %vm3670_vm5 }
 0x1ec   : > { %v1865_v31 = vpack.c.b16 %v1862_v47, %v1861_v18  ;;  %v1004_v59 = vsel %vm1000_vm7, %v3720_v58, -inf  ;;  %v3869_v25 = vsel %vm571_vm15, 0.0, %v3228_v54  ;;  %vm573_vm10 = vmand %vm3525_vm14, %vm3670_vm5 }
 0x1ed   : > { %v1959_v35 = vpop.permute.xlu0 %1958  ;;  %v1010_v63 = vsel %vm1000_vm7, %v3733_v0, -inf }
 0x1ee   : > { %1882 = vmatpush.bf16.msra.mxu1 %v1865_v31  ;;  %2068 = vrot.lane.b32.xlu2 %v2067_v34, %s3224_s16  ;;  %v1988_v40 = vpack.c.bf16 %v1959_v35, %v1959_v35  ;;  %v1981_v34 = vpack.c.bf16 %v3539_v45, %v3539_v45 }
 0x1ef   : > { %1008 = vmax.xlane.f32.xlu0 %v1007_v44 }
 0x1f0   : > { %v2042_v1 = vunpack.c.l.b16 %v1988_v40  ;;  %v2004_v24 = vunpack.c.l.b16 %v1981_v34  ;;  %v2967_v34 = vunpack.i.l.bf16 %v2966_v32 }
 0x1f2   : > { %v3691_v10 = vpack.c.b16 %v2042_v1, %v2041_v37  ;;  %v1816_v1 = vunpack.c.l.b16 %v737_v28 }
 0x1f5   : > { %v2956_v51 = vpop.permute.xlu0 %2955 }
 0x210   : > { %1002 = vmax.xlane.f32.xlu1 %v1001_v17  ;;  %v2958_v17 = vunpack.i.h.bf16 %v2956_v51 }
 0x217   : > { %1005 = vmax.xlane.f32.xlu2 %v1004_v59  ;;  %v2957_v59 = vunpack.i.l.bf16 %v2956_v51 }
 0x219   : > { %v1991_v28 = vpack.c.bf16 %v2957_v59, %v2957_v59 }
 0x21f   : > { %1011 = vmax.xlane.f32.xlu2 %v1010_v63 }
 0x228   : > { %v3737_v3 = vpop.permute.xlu2 %933 }
 0x22b   : > { %v3739_v12 = vpop.f32.mrf.mxu0 }
 0x22c   : > { %v3743_v6 = vadd.f32 %v3739_v12, %v3704_v56 }
 0x22e   : > { %v1013_v18 = vsel %vm1000_vm7, %v3743_v6, -inf }
 0x22f   : > { %1014 = vmax.xlane.f32.xlu2 %v1013_v18 }
 0x230   : > { %v2936_v21 = vpop.permute.xlu2 %2935 }
 0x231   : > { %v2938_v47 = vunpack.i.h.bf16 %v2936_v21  ;;  %v2937_v31 = vunpack.i.l.bf16 %v2936_v21  ;;  %v1995_v21 = vpack.c.bf16 %v2958_v17, %v2958_v17 }
 0x233   : > { %v1982_v23 = vpack.c.bf16 %v2938_v47, %v2938_v47  ;;  %v738_v44 = vpack.c.bf16 %v2937_v31, %v2937_v31  ;;  %v3750_v35 = vpop.f32.mrf.mxu0  ;;  %v3752_v37 = vpop.f32.mrf.mxu1  ;;  %v2968_v31 = vunpack.i.h.bf16 %v2966_v32 }
 0x234   : > { %v3756_v62 = vadd.f32 %v3750_v35, %v3716_v11  ;;  %v3760_v40 = vadd.f32 %v3752_v37, %v3704_v56 }
 0x235   : > { %v2005_v13 = vunpack.c.l.b16 %v1982_v23  ;;  %v1817_v49 = vunpack.c.l.b16 %v738_v44  ;;  %v1994_v51 = vpack.c.bf16 %v2968_v31, %v2968_v31  ;;  %v1993_v31 = vpack.c.bf16 %v3564_v57, %v3564_v57 }
 0x236   : > { %v1016_v45 = vsel %vm1000_vm7, %v3756_v62, -inf  ;;  %v1025_v48 = vsel %vm1000_vm7, %v3760_v40, -inf }
 0x237   : > { %v1819_v53 = vpack.c.b16 %v1817_v49, %v1816_v1  ;;  %1017 = vmax.xlane.f32.xlu0 %v1016_v45  ;;  %1026 = vmax.xlane.f32.xlu2 %v1025_v48  ;;  %v3766_v9 = vpack.c.b16 %v2005_v13, %v2004_v24  ;;  %v2111_v1 = vunpack.c.l.b16 %v1995_v21  ;;  %v2076_v13 = vunpack.c.l.b16 %v1991_v28 }
 0x238   : > { %v3768_v43 = vpop.permute.xlu2 %1998  ;;  %v1989_v21 = vpack.c.bf16 %v3560_v55, %v3560_v55 }
 0x239   : > { %4601 = vst [vmem:[#allocation16_spill] sm:$0xff] %v3766_v9  ;;  %1834 = vmatpush.bf16.msra.mxu0 %v1819_v53  ;;  %v2014_v52 = vsel %vm771_vm12, %v3766_v9, 0 }
 0x23a   : > { %2026 = vmatpush.bf16.xpose.msra.mxu3 %v2014_v52  ;;  %v1990_v52 = vpack.c.bf16 %v2967_v34, %v2967_v34  ;;  %v2110_v34 = vunpack.c.l.b16 %v1994_v51  ;;  %v2074_v55 = vunpack.c.l.b16 %v1989_v21  ;;  %v2902_v21 = vunpack.i.l.bf16 %v3598_v4 }
 0x23b   : > { %v3772_v39 = vpop.f32.mrf.mxu0  ;;  %v3774_v60 = vpop.f32.mrf.mxu1 }
 0x23c   : > { %v3778_v63 = vadd.f32 %v3774_v60, %v3716_v11 }
 0x23d   : > { %1835 = vmatpush.bf16.msra.mxu0 %v3668_v14 }
 0x23e   : > { %v1028_v18 = vsel %vm1000_vm7, %v3778_v63, -inf }
 0x23f   : > { %1029 = vmax.xlane.f32.xlu0 %v1028_v18 }
 0x240   : > { %v2961_v47 = vpop.permute.xlu2 %2960 }
 0x241   : > { %v2963_v23 = vunpack.i.h.bf16 %v2961_v47  ;;  %v2962_v44 = vunpack.i.l.bf16 %v2961_v47 }
 0x243   : > { %v1996_v49 = vpack.c.bf16 %v2963_v23, %v2963_v23  ;;  %v1992_v24 = vpack.c.bf16 %v2962_v44, %v2962_v44  ;;  %v3783_v45 = vpop.f32.mrf.mxu0  ;;  %v3785_v48 = vpop.f32.mrf.mxu1  ;;  %v2075_v23 = vunpack.c.l.b16 %v1990_v52 }
 0x244   : > { %v3789_v14 = vadd.f32 %v3783_v45, %v3729_v42  ;;  %v3793_v53 = vadd.f32 %v3785_v48, %v3682_v7 }
 0x245   : > { %v2112_v17 = vunpack.c.l.b16 %v1996_v49  ;;  %v2077_v59 = vunpack.c.l.b16 %v1992_v24  ;;  %v3811_v24 = vpack.c.b16 %v2075_v23, %v2074_v55  ;;  %v631_v23 = vpack.c.bf16 %v2902_v21, %v2902_v21 }
 0x246   : > { %v1022_v32 = vsel %vm1000_vm7, %v3789_v14, -inf  ;;  %v1031_v18 = vsel %vm1000_vm7, %v3793_v53, -inf }
 0x247   : > { %v3801_v28 = vpack.c.b16 %v2112_v17, %v2111_v1  ;;  %v3803_v47 = vpack.c.b16 %v2077_v59, %v2076_v13  ;;  %1023 = vmax.xlane.f32.xlu0 %v1022_v32  ;;  %1032 = vmax.xlane.f32.xlu2 %v1031_v18  ;;  %v2109_v1 = vunpack.c.l.b16 %v1993_v31  ;;  %4604 = vst [vmem:[#allocation19_spill] sm:$0xff] %v3811_v24  ;;  %v2084_v57 = vsel %vm771_vm12, %v3811_v24, 0  ;;  %v3822_v32 = vpop.permute.xlu0 %2033 }
 0x248   : > { %v2913_v18 = vunpack.i.h.bf16 %v3620_v15  ;;  %v3831_v31 = vsel %vm572_vm9, 0.0, %v3228_v54  ;;  %v917_v15 = vunpack.c.l.b16 %v631_v23  ;;  %v3855_v23 = vsel %vm570_vm8, 0.0, %v3228_v54 }
 0x249   : > { %4602 = vst [vmem:[#allocation17_spill] sm:$0xff] %v3801_v28  ;;  %v2087_v44 = vsel %vm771_vm12, %v3803_v47, 0  ;;  %v2122_v49 = vsel %vm771_vm12, %v3801_v28, 0  ;;  %v3813_v13 = vpack.c.b16 %v2110_v34, %v2109_v1 }
 0x24a   : > { %4603 = vst [vmem:[#allocation18_spill] sm:$0xff] %v3803_v47  ;;  %2095 = vmatpush.bf16.xpose.msrb.mxu0 %v2087_v44  ;;  %2130 = vmatpush.bf16.xpose.msrb.mxu1 %v2122_v49  ;;  %v632_v34 = vpack.c.bf16 %v2913_v18, %v2913_v18  ;;  %v3835_v44 = vadd.f32 %v3679_v8, %v3831_v31  ;;  %v944_v49 = vsel %vm771_vm12, %v3737_v3, 0  ;;  %v2918_v8 = vunpack.i.h.bf16 %v3627_v2 }
 0x24b   : > { %4605 = vst [vmem:[#allocation20_spill] sm:$0xff] %v3813_v13  ;;  %v2119_v51 = vsel %vm771_vm12, %v3813_v13, 0  ;;  %v2917_v3 = vunpack.i.l.bf16 %v3627_v2  ;;  %v3861_v2 = vpop.permute.xlu2 %2068 }
 0x24c   : > { %4607 = vst [vmem:[#allocation22_spill] sm:$0xff] %v3831_v31  ;;  %v918_v36 = vunpack.c.l.b16 %v632_v34 }
 0x24e   : > { %v921_v4 = vpack.c.b16 %v918_v36, %v917_v15 }
 0x250   : > { %v3815_v17 = vpop.permute.xlu1 %2103 }
 0x251   : > { %4606 = vst [vmem:[#allocation21_spill] sm:$0xff] %v3815_v17 }
 0x252   : > { %2096 = vmatpush.bf16.xpose.msrb.mxu0 %v2084_v57  ;;  %2131 = vmatpush.bf16.xpose.msrb.mxu1 %v2119_v51 }
 0x258   : > { %v936_v52 = vpop.permute.xlu1 %935 }
 0x259   : > { %v947_v59 = vsel %vm771_vm12, %v936_v52, 0  ;;  %v634_v52 = vpack.c.bf16 %v2918_v8, %v2918_v8  ;;  %v3887_v8 = vsel %vm573_vm10, 0.0, %v3228_v54 }
 0x25a   : > { %955 = vmatpush.bf16.xpose.msrb.mxu2 %v947_v59  ;;  %v633_v59 = vpack.c.bf16 %v2917_v3, %v2917_v3  ;;  %4609 = vst [vmem:[#allocation23_spill] sm:$0xff] %v3887_v8 }
 0x25b   : > { %v920_v18 = vunpack.c.l.b16 %v634_v52  ;;  %v3896_v52 = vadd.f32 %v3726_v61, %v3887_v8 }
 0x25c   : > { %v919_v21 = vunpack.c.l.b16 %v633_v59 }
 0x25e   : > { %v922_v34 = vpack.c.b16 %v920_v18, %v919_v21  ;;  %v3907_v18 = vadd.f32 %v3739_v12, %v3855_v23  ;;  %v3922_v12 = vadd.f32 %v3772_v39, %v3682_v7 }
 0x262   : > { %956 = vmatpush.bf16.xpose.msrb.mxu2 %v944_v49  ;;  %v1009_v55 = vpop.xlane.xlu0 %1008  ;;  %v3859_v49 = vadd.f32 %v3639_v27, %v3855_v23  ;;  %v3876_v27 = vadd.f32 %v3655_v20, %v3869_v25 }
 0x263   : > { %v1051_v1 = vmax.f32 %v1009_v55, %v3835_v44 }
 0x265   : > { %vm1067_vm13 = vweird.f32 %v1051_v1 }
 0x266   : > { %vm1083_vm6 = vmxor %vm1067_vm13, %vm4608_vm4 }
 0x267   : > { %v3841_v57 = vsel %vm1083_vm6, %v1051_v1, 0.0 }
 0x268   : > { %1125 = vperm.xlu0 %2856, %v3841_v57  }
 0x269   : > { %2755 = vmatmul.msk.bf16.vlgmr.msrb.gmra.mxu2 %vm771_vm12, %v921_v4 }
 0x279   : > { %2756 = vmatmul.msk.bf16.gmra.mxu2 %vm771_vm12, %v922_v34  ;;  %v3912_v34 = vadd.f32 %v3750_v35, %v3869_v25 }
 0x283   : > { %v1003_v55 = vpop.xlane.xlu1 %1002 }
 0x284   : > { %v1049_v36 = vmax.f32 %v1003_v55, %v3859_v49  ;;  %v3916_v55 = vadd.f32 %v3752_v37, %v3855_v23 }
 0x286   : > { %vm1065_vm11 = vweird.f32 %v1049_v36 }
 0x287   : > { %vm1081_vm0 = vmxor %vm1065_vm11, %vm4608_vm4 }
 0x288   : > { %v3872_v1 = vsel %vm1081_vm0, %v1049_v36, 0.0 }
 0x289   : > { %1115 = vperm.xlu1 %2857, %v3872_v1  }
 0x28a   : > { %v1006_v15 = vpop.xlane.xlu2 %1005 }
 0x28b   : > { %v1050_v4 = vmax.f32 %v1006_v15, %v3876_v27 }
 0x28d   : > { %vm1066_vm1 = vweird.f32 %v1050_v4 }
 0x28e   : > { %vm1082_vm2 = vmxor %vm1066_vm1, %vm4608_vm4 }
 0x28f   : > { %v3890_v20 = vsel %vm1082_vm2, %v1050_v4, 0.0 }
 0x292   : > { %v1012_v16 = vpop.xlane.xlu2 %1011 }
 0x293   : > { %v1052_v41 = vmax.f32 %v1012_v16, %v3896_v52 }
 0x295   : > { %vm1068_vm14 = vweird.f32 %v1052_v41 }
 0x296   : > { %vm1084_vm5 = vmxor %vm1068_vm14, %vm4608_vm4 }
 0x297   : > { %v3900_v59 = vsel %vm1084_vm5, %v1052_v41, 0.0 }
 0x298   : > { %1130 = vperm.xlu2 %2898, %v3900_v59  }
 0x2a2   : > { %v1015_v21 = vpop.xlane.xlu2 %1014 }
 0x2a3   : > { %v1053_v61 = vmax.f32 %v1015_v21, %v3907_v18  ;;  %v3935_v21 = vadd.f32 %v3774_v60, %v3869_v25 }
 0x2a5   : > { %vm1069_vm10 = vweird.f32 %v1053_v61 }
 0x2a6   : > { %vm1085_vm1 = vmxor %vm1069_vm10, %vm4608_vm4 }
 0x2aa   : > { %v1018_v36 = vpop.xlane.xlu0 %1017  ;;  %v1027_v15 = vpop.xlane.xlu2 %1026 }
 0x2ab   : > { %v1054_v4 = vmax.f32 %v1018_v36, %v3912_v34  ;;  %v1057_v16 = vmax.f32 %v1027_v15, %v3916_v55  ;;  %v3951_v36 = vadd.f32 %v3785_v48, %v3831_v31 }
 0x2ad   : > { %vm1070_vm3 = vweird.f32 %v1054_v4  ;;  %vm1073_vm9 = vweird.f32 %v1057_v16 }
 0x2ae   : > { %vm1086_vm13 = vmxor %vm1070_vm3, %vm4608_vm4 }
 0x2af   : > { %v3925_v35 = vsel %vm1086_vm13, %v1054_v4, 0.0  ;;  %vm1089_vm6 = vmxor %vm1073_vm9, %vm4608_vm4  ;;  %v1019_v4 = vsel %vm1000_vm7, %v3922_v12, -inf }
 0x2b0   : > { %1140 = vperm.xlu0 %2856, %v3925_v35   ;;  %v3931_v41 = vsel %vm1089_vm6, %v1057_v16, 0.0 }
 0x2b1   : > { %1155 = vperm.xlu2 %2898, %v3931_v41  }
 0x2b2   : > { %v1030_v15 = vpop.xlane.xlu0 %1029 }
 0x2b3   : > { %v1058_v51 = vmax.f32 %v1030_v15, %v3935_v21  ;;  %1020 = vmax.xlane.f32.xlu1 %v1019_v4  ;;  %v910_v4 = vpop.f32.mrf.mxu1 }
 0x2b4   : > { %v3962_v60 = vadd.f32 %v910_v4, %v3729_v42 }
 0x2b5   : > { %vm1074_vm8 = vweird.f32 %v1058_v51 }
 0x2b6   : > { %vm1090_vm15 = vmxor %vm1074_vm8, %vm4608_vm4  ;;  %v1034_v48 = vsel %vm1000_vm7, %v3962_v60, -inf }
 0x2b7   : > { %v3944_v16 = vsel %vm1090_vm15, %v1058_v51, 0.0  ;;  %v3972_v51 = vadd.f32 %v3772_v39, %v3831_v31 }
 0x2b8   : > { %1160 = vperm.xlu0 %2856, %v3944_v16  }
 0x2ba   : > { %v1033_v37 = vpop.xlane.xlu2 %1032 }
 0x2bb   : > { %v1059_v54 = vmax.f32 %v1033_v37, %v3951_v36 }
 0x2bd   : > { %vm1075_vm11 = vweird.f32 %v1059_v54 }
 0x2be   : > { %vm1091_vm0 = vmxor %vm1075_vm11, %vm4608_vm4 }
 0x2bf   : > { %v3955_v15 = vsel %vm1091_vm0, %v1059_v54, 0.0  ;;  %v3967_v54 = vsel %vm1085_vm1, %v1053_v61, 0.0 }
 0x2c0   : > { %1165 = vperm.xlu2 %2898, %v3955_v15  }
 0x2cc   : > { %1120 = vperm.xlu1 %2857, %v3890_v20  }
 0x2f6   : > { %1035 = vmax.xlane.f32.xlu1 %v1034_v48 }
 0x2fb   : > { %v1116_v37 = vpop.permute.xlu1 %1115 }
 0x2fc   : > { %v1193_v5 = vsub.f32 %v3708_v33, %v1116_v37 }
 0x2fe   : > { %v1209_v48 = vmul.f32 1.442695, %v1193_v5  ;;  %v1024_v5 = vpop.xlane.xlu0 %1023 }
 0x300   : > { %2974 = vpow2.f32 %v1209_v48 }
 0x306   : > { %v3982_v47 = vpop.eup %2974 }
 0x307   : > { %v1289_v39 = vsel %vm1000_vm7, %v3982_v47, 0.0 }
 0x30f   : > { %1135 = vperm.xlu1 %2857, %v3967_v54  }
 0x326   : > { %v1021_v3 = vpop.xlane.xlu1 %1020 }
 0x327   : > { %v1055_v30 = vmax.f32 %v1021_v3, %v3972_v51 }
 0x329   : > { %vm1071_vm2 = vweird.f32 %v1055_v30 }
 0x32a   : > { %vm1087_vm14 = vmxor %vm1071_vm2, %vm4608_vm4 }
 0x32b   : > { %v3977_v9 = vsel %vm1087_vm14, %v1055_v30, 0.0  ;;  %v3989_v30 = vadd.f32 %v3783_v45, %v3887_v8  ;;  %v4001_v45 = vadd.f32 %v910_v4, %v3887_v8 }
 0x32c   : > { %1145 = vperm.xlu0 %2856, %v3977_v9  }
 0x32d   : > { %v1056_v61 = vmax.f32 %v1024_v5, %v3989_v30 }
 0x32f   : > { %vm1072_vm5 = vweird.f32 %v1056_v61 }
 0x330   : > { %vm1088_vm3 = vmxor %vm1072_vm5, %vm4608_vm4 }
 0x339   : > { %1290 = vadd.xlane.f32.xlu1 %v1289_v39  ;;  %v3997_v39 = vsel %vm1088_vm3, %v1056_v61, 0.0 }
 0x33e   : > { %v1121_v33 = vpop.permute.xlu1 %1120 }
 0x33f   : > { %v1194_v3 = vsub.f32 %v3720_v58, %v1121_v33  ;;  %v1126_v58 = vpop.permute.xlu0 %1125  ;;  %v1131_v33 = vpop.permute.xlu2 %1130 }
 0x341   : > { %v1211_v37 = vmul.f32 1.442695, %v1194_v3 }
 0x343   : > { %2976 = vpow2.f32 %v1211_v37  ;;  %v1196_v37 = vsub.f32 %v3733_v0, %v1131_v33 }
 0x347   : > { %v1141_v61 = vpop.permute.xlu0 %1140 }
 0x348   : > { %v1198_v4 = vsub.f32 %v3756_v62, %v1141_v61 }
 0x349   : > { %v3992_v19 = vpop.eup %2976 }
 0x34a   : > { %v1292_v48 = vsel %vm1000_vm7, %v3992_v19, 0.0  ;;  %v1219_v24 = vmul.f32 1.442695, %v1198_v4 }
 0x34b   : > { %1293 = vadd.xlane.f32.xlu2 %v1292_v48  ;;  %v1215_v48 = vmul.f32 1.442695, %v1196_v37 }
 0x34d   : > { %2978 = vpow2.f32 %v1215_v48 }
 0x34e   : > { %2980 = vpow2.f32 %v1219_v24  ;;  %v1195_v24 = vsub.f32 %v3686_v29, %v1126_v58 }
 0x350   : > { %v1213_v4 = vmul.f32 1.442695, %v1195_v24 }
 0x352   : > { %1150 = vperm.xlu1 %2857, %v3997_v39  }
 0x353   : > { %v4012_v38 = vpop.eup %2978 }
 0x354   : > { %v1298_v0 = vsel %vm1000_vm7, %v4012_v38, 0.0  ;;  %v4016_v33 = vpop.eup %2980 }
 0x355   : > { %v1304_v28 = vsel %vm1000_vm7, %v4016_v33, 0.0 }
 0x369   : > { %v1036_v3 = vpop.xlane.xlu1 %1035 }
 0x36a   : > { %v1060_v5 = vmax.f32 %v1036_v3, %v4001_v45  ;;  %v1156_v3 = vpop.permute.xlu2 %1155 }
 0x36b   : > { %v1201_v48 = vsub.f32 %v3760_v40, %v1156_v3 }
 0x36c   : > { %vm1076_vm9 = vweird.f32 %v1060_v5 }
 0x36d   : > { %vm1092_vm13 = vmxor %vm1076_vm9, %vm4608_vm4  ;;  %v1225_v61 = vmul.f32 1.442695, %v1201_v48 }
 0x36e   : > { %v4006_v13 = vsel %vm1092_vm13, %v1060_v5, 0.0 }
 0x36f   : > { %1170 = vperm.xlu0 %2856, %v4006_v13  }
 0x37c   : > { %1299 = vadd.xlane.f32.xlu1 %v1298_v0  ;;  %v1161_v0 = vpop.permute.xlu0 %1160 }
 0x381   : > { %v1136_v37 = vpop.permute.xlu1 %1135 }
 0x382   : > { %v1197_v5 = vsub.f32 %v3743_v6, %v1136_v37  ;;  %v1202_v6 = vsub.f32 %v3778_v63, %v1161_v0 }
 0x384   : > { %v1217_v62 = vmul.f32 1.442695, %v1197_v5  ;;  %1305 = vadd.xlane.f32.xlu1 %v1304_v28  ;;  %v1227_v40 = vmul.f32 1.442695, %v1202_v6  ;;  %v1166_v28 = vpop.permute.xlu2 %1165 }
 0x385   : > { %v1203_v58 = vsub.f32 %v3793_v53, %v1166_v28  ;;  %v4610_v53 = vsub.f32 %v3859_v49, %v3872_v1  ;;  %v4611_v1 = vsub.f32 %v3876_v27, %v3890_v20 }
 0x386   : > { %2982 = vpow2.f32 %v1217_v62 }
 0x387   : > { %2984 = vpow2.f32 %v1225_v61 }
 0x388   : > { %2986 = vpow2.f32 %v1213_v4  ;;  %v1257_v4 = vmul.f32 1.442695, %v4610_v53 }
 0x389   : > { %2988 = vpow2.f32 %v1227_v40 }
 0x38c   : > { %v4023_v26 = vpop.eup %2982 }
 0x38d   : > { %v1301_v50 = vsel %vm1000_vm7, %v4023_v26, 0.0  ;;  %v4028_v37 = vpop.eup %2984 }
 0x38e   : > { %1302 = vadd.xlane.f32.xlu2 %v1301_v50  ;;  %v4030_v3 = vpop.eup %2986  ;;  %v1313_v29 = vsel %vm1000_vm7, %v4028_v37, 0.0  ;;  %v1229_v50 = vmul.f32 1.442695, %v1203_v58 }
 0x38f   : > { %v1295_v5 = vsel %vm1000_vm7, %v4030_v3, 0.0  ;;  %v4037_v48 = vpop.eup %2988 }
 0x390   : > { %2990 = vpow2.f32 %v1229_v50  ;;  %v1316_v24 = vsel %vm1000_vm7, %v4037_v48, 0.0 }
 0x396   : > { %1314 = vadd.xlane.f32.xlu2 %v1313_v29  ;;  %v4045_v0 = vpop.eup %2990 }
 0x397   : > { %v1319_v6 = vsel %vm1000_vm7, %v4045_v0, 0.0 }
 0x399   : > { %1296 = vadd.xlane.f32.xlu0 %v1295_v5  ;;  %v1259_v5 = vmul.f32 1.442695, %v4611_v1 }
 0x39e   : > { %v1146_v63 = vpop.permute.xlu0 %1145 }
 0x39f   : > { %v1199_v62 = vsub.f32 %v3922_v12, %v1146_v63 }
 0x3a1   : > { %v1221_v61 = vmul.f32 1.442695, %v1199_v62  ;;  %1317 = vadd.xlane.f32.xlu0 %v1316_v24 }
 0x3a3   : > { %2992 = vpow2.f32 %v1221_v61 }
 0x3a4   : > { %2994 = vpow2.f32 %v1257_v4 }
 0x3a9   : > { %v4049_v40 = vpop.eup %2992  ;;  %1320 = vadd.xlane.f32.xlu0 %v1319_v6 }
 0x3aa   : > { %v1307_v12 = vsel %vm1000_vm7, %v4049_v40, 0.0  ;;  %v2995_v28 = vpop.eup %2994 }
 0x3ab   : > { %1308 = vadd.xlane.f32.xlu1 %v1307_v12 }
 0x3ac   : > { %v1291_v29 = vpop.xlane.xlu1 %1290 }
 0x3ad   : > { %v1337_v58 = vadd.f32 %v2995_v28, %v1291_v29 }
 0x3af   : > { %vm1353_vm6 = vcmp.eq.f32.partialorder %v1337_v58, 0.0 }
 0x3b0   : > { %v1369_v49 = vsel %vm1353_vm6, 1.0, %v1337_v58 }
 0x3b1   : > { %2996 = vrcp.f32 %v1369_v49  ;;  %v1396_v24 = vand.u32 2147483648, %v1369_v49  ;;  %v1394_v53 = vand.u32 2147483647, %v1369_v49  ;;  %vm1390_vm15 = vweird.f32 %v1369_v49 }
 0x3b2   : > { %2998 = vpow2.f32 %v1259_v5 }
 0x3b3   : > { %v1397_v58 = vor.u32 1.1754944e-38, %v1396_v24  ;;  %vm1395_vm0 = vcmp.eq.f32.partialorder %v1394_v53, 8.507059e+37 }
 0x3b7   : > { %v2997_v50 = vpop.eup %2996 }
 0x3b8   : > { %v1386_v63 = vmul.f32 %v2997_v50, %v1369_v49  ;;  %vm1391_vm8 = vweird.f32 %v2997_v50  ;;  %v2999_v4 = vpop.eup %2998 }
 0x3b9   : > { %vm1392_vm11 = vmor %vm1390_vm15, %vm1391_vm8 }
 0x3ba   : > { %v1387_v62 = vsub.f32 1.0, %v1386_v63 }
 0x3bc   : > { %v1388_v61 = vmul.f32 %v2997_v50, %v1387_v62 }
 0x3be   : > { %v1294_v6 = vpop.xlane.xlu2 %1293  ;;  %v1389_v12 = vadd.f32 %v2997_v50, %v1388_v61 }
 0x3bf   : > { %v1338_v29 = vadd.f32 %v2999_v4, %v1294_v6 }
 0x3c0   : > { %v1393_v31 = vsel %vm1392_vm11, %v2997_v50, %v1389_v12 }
 0x3c1   : > { %vm1354_vm10 = vcmp.eq.f32.partialorder %v1338_v29, 0.0  ;;  %v1398_v27 = vsel %vm1395_vm0, %v1397_v58, %v1393_v31 }
 0x3c2   : > { %v1370_v20 = vsel %vm1354_vm10, 1.0, %v1338_v29  ;;  %v4056_v1 = vmul.f32 %v2995_v28, %v1398_v27 }
 0x3c3   : > { %3000 = vrcp.f32 %v1370_v20  ;;  %v1411_v49 = vand.u32 2147483648, %v1370_v20  ;;  %v1409_v24 = vand.u32 2147483647, %v1370_v20  ;;  %vm1405_vm2 = vweird.f32 %v1370_v20 }
 0x3c4   : > { %v1151_v5 = vpop.permute.xlu1 %1150 }
 0x3c5   : > { %v1200_v63 = vsub.f32 %v3789_v14, %v1151_v5  ;;  %v1412_v53 = vor.u32 1.1754944e-38, %v1411_v49  ;;  %vm1410_vm5 = vcmp.eq.f32.partialorder %v1409_v24, 8.507059e+37 }
 0x3c7   : > { %v1223_v62 = vmul.f32 1.442695, %v1200_v63  ;;  %v4612_v63 = vsub.f32 %v3896_v52, %v3900_v59  ;;  %v1245_v52 = vsub.f32 %v3907_v18, %v3967_v54 }
 0x3c9   : > { %v3001_v17 = vpop.eup %3000  ;;  %3002 = vpow2.f32 %v1223_v62  ;;  %v1263_v62 = vmul.f32 1.442695, %v4612_v63  ;;  %v1265_v24 = vmul.f32 1.442695, %v1245_v52  ;;  %v4615_v63 = vsub.f32 %v3835_v44, %v3841_v57 }
 0x3ca   : > { %v1401_v8 = vmul.f32 %v3001_v17, %v1370_v20  ;;  %vm1406_vm1 = vweird.f32 %v3001_v17 }
 0x3cb   : > { %vm1407_vm14 = vmor %vm1405_vm2, %vm1406_vm1 }
 0x3cc   : > { %v1402_v61 = vsub.f32 1.0, %v1401_v8 }
 0x3ce   : > { %v1403_v6 = vmul.f32 %v3001_v17, %v1402_v61 }
 0x3cf   : > { %v4059_v50 = vpop.eup %3002 }
 0x3d0   : > { %v1310_v31 = vsel %vm1000_vm7, %v4059_v50, 0.0  ;;  %v1404_v28 = vadd.f32 %v3001_v17, %v1403_v6 }
 0x3d1   : > { %1311 = vadd.xlane.f32.xlu2 %v1310_v31 }
 0x3d2   : > { %v1408_v14 = vsel %vm1407_vm14, %v3001_v17, %v1404_v28  ;;  %v4613_v17 = vsub.f32 %v3912_v34, %v3925_v35 }
 0x3d3   : > { %v1413_v12 = vsel %vm1410_vm5, %v1412_v53, %v1408_v14 }
 0x3d4   : > { %v4063_v29 = vmul.f32 %v2999_v4, %v1413_v12  ;;  %1632 = vperm.xlu0 %2856, %v1413_v12   ;;  %v1267_v61 = vmul.f32 1.442695, %v4613_v17 }
 0x3e1   : > { %v1171_v8 = vpop.permute.xlu0 %1170 }
 0x3e2   : > { %v1204_v58 = vsub.f32 %v3962_v60, %v1171_v8  ;;  %v4614_v8 = vsub.f32 %v3916_v55, %v3931_v41 }
 0x3e4   : > { %v1231_v5 = vmul.f32 1.442695, %v1204_v58  ;;  %v1273_v58 = vmul.f32 1.442695, %v4614_v8 }
 0x3e6   : > { %3004 = vpow2.f32 %v1231_v5 }
 0x3e7   : > { %3006 = vpow2.f32 %v1263_v62  ;;  %v1261_v62 = vmul.f32 1.442695, %v4615_v63 }
 0x3e8   : > { %3008 = vpow2.f32 %v1267_v61 }
 0x3e9   : > { %1627 = vperm.xlu2 %2898, %v1398_v27  }
 0x3ec   : > { %v4069_v20 = vpop.eup %3004 }
 0x3ed   : > { %v1322_v4 = vsel %vm1000_vm7, %v4069_v20, 0.0  ;;  %v3007_v49 = vpop.eup %3006 }
 0x3ee   : > { %1323 = vadd.xlane.f32.xlu1 %v1322_v4  ;;  %v3009_v27 = vpop.eup %3008 }
 0x3ef   : > { %v1300_v60 = vpop.xlane.xlu1 %1299 }
 0x3f0   : > { %v1340_v6 = vadd.f32 %v3007_v49, %v1300_v60 }
 0x3f2   : > { %vm1356_vm3 = vcmp.eq.f32.partialorder %v1340_v6, 0.0 }
 0x3f3   : > { %v1372_v59 = vsel %vm1356_vm3, 1.0, %v1340_v6 }
 0x3f4   : > { %3010 = vrcp.f32 %v1372_v59  ;;  %v1441_v12 = vand.u32 2147483648, %v1372_v59  ;;  %v1439_v18 = vand.u32 2147483647, %v1372_v59  ;;  %vm1435_vm6 = vweird.f32 %v1372_v59 }
 0x3f5   : > { %3012 = vpow2.f32 %v1265_v24 }
 0x3f6   : > { %v1442_v6 = vor.u32 1.1754944e-38, %v1441_v12  ;;  %vm1440_vm15 = vcmp.eq.f32.partialorder %v1439_v18, 8.507059e+37 }
 0x3f7   : > { %v1306_v31 = vpop.xlane.xlu1 %1305 }
 0x3f8   : > { %v1342_v28 = vadd.f32 %v3009_v27, %v1306_v31 }
 0x3fa   : > { %v3011_v34 = vpop.eup %3010  ;;  %vm1358_vm9 = vcmp.eq.f32.partialorder %v1342_v28, 0.0 }
 0x3fb   : > { %v1431_v35 = vmul.f32 %v3011_v34, %v1372_v59  ;;  %v1374_v53 = vsel %vm1358_vm9, 1.0, %v1342_v28  ;;  %vm1436_vm13 = vweird.f32 %v3011_v34  ;;  %v4081_v54 = vpop.eup %3012 }
 0x3fc   : > { %3014 = vrcp.f32 %v1374_v53  ;;  %vm1437_vm8 = vmor %vm1435_vm6, %vm1436_vm13  ;;  %v1471_v57 = vand.u32 2147483648, %v1374_v53  ;;  %v1469_v28 = vand.u32 2147483647, %v1374_v53  ;;  %vm1465_vm10 = vweird.f32 %v1374_v53 }
 0x3fd   : > { %v1432_v14 = vsub.f32 1.0, %v1431_v35  ;;  %3016 = vpow2.f32 %v1273_v58  ;;  %v4616_v35 = vsub.f32 %v3935_v21, %v3944_v16 }
 0x3fe   : > { %3018 = vpow2.f32 %v1261_v62  ;;  %vm1470_vm2 = vcmp.eq.f32.partialorder %v1469_v28, 8.507059e+37  ;;  %v4618_v28 = vsub.f32 %v3972_v51, %v3977_v9 }
 0x3ff   : > { %v1433_v5 = vmul.f32 %v3011_v34, %v1432_v14  ;;  %v1275_v14 = vmul.f32 1.442695, %v4616_v35 }
 0x400   : > { %v1269_v35 = vmul.f32 1.442695, %v4618_v28 }
 0x401   : > { %v1303_v17 = vpop.xlane.xlu2 %1302  ;;  %v1434_v61 = vadd.f32 %v3011_v34, %v1433_v5  ;;  %v1472_v5 = vor.u32 1.1754944e-38, %v1471_v57 }
 0x402   : > { %v3015_v4 = vpop.eup %3014  ;;  %v1341_v60 = vadd.f32 %v4081_v54, %v1303_v17 }
 0x403   : > { %v1461_v55 = vmul.f32 %v3015_v4, %v1374_v53  ;;  %v1438_v41 = vsel %vm1437_vm8, %v3011_v34, %v1434_v61  ;;  %vm1466_vm0 = vweird.f32 %v3015_v4  ;;  %v4092_v12 = vpop.eup %3016 }
 0x404   : > { %vm1357_vm11 = vcmp.eq.f32.partialorder %v1341_v60, 0.0  ;;  %v1443_v52 = vsel %vm1440_vm15, %v1442_v6, %v1438_v41  ;;  %vm1467_vm1 = vmor %vm1465_vm10, %vm1466_vm0 }
 0x405   : > { %v1462_v24 = vsub.f32 1.0, %v1461_v55  ;;  %v1373_v31 = vsel %vm1357_vm11, 1.0, %v1341_v60  ;;  %1642 = vperm.xlu2 %2898, %v1443_v52   ;;  %v4087_v44 = vmul.f32 %v3007_v49, %v1443_v52  ;;  %v4095_v49 = vpop.eup %3018 }
 0x406   : > { %3020 = vrcp.f32 %v1373_v31  ;;  %v1456_v55 = vand.u32 2147483648, %v1373_v31  ;;  %v1454_v41 = vand.u32 2147483647, %v1373_v31  ;;  %vm1450_vm9 = vweird.f32 %v1373_v31 }
 0x407   : > { %v1463_v59 = vmul.f32 %v3015_v4, %v1462_v24  ;;  %3022 = vpow2.f32 %v1275_v14  ;;  %v4617_v24 = vsub.f32 %v3951_v36, %v3955_v15 }
 0x408   : > { %vm1455_vm6 = vcmp.eq.f32.partialorder %v1454_v41, 8.507059e+37 }
 0x409   : > { %v1315_v34 = vpop.xlane.xlu2 %1314  ;;  %v1464_v8 = vadd.f32 %v3015_v4, %v1463_v59  ;;  %v1277_v57 = vmul.f32 1.442695, %v4617_v24 }
 0x40a   : > { %v1345_v58 = vadd.f32 %v4092_v12, %v1315_v34  ;;  %v1457_v34 = vor.u32 1.1754944e-38, %v1456_v55 }
 0x40b   : > { %v1468_v18 = vsel %vm1467_vm1, %v3015_v4, %v1464_v8 }
 0x40c   : > { %v3021_v63 = vpop.eup %3020  ;;  %vm1361_vm14 = vcmp.eq.f32.partialorder %v1345_v58, 0.0  ;;  %v1297_v62 = vpop.xlane.xlu0 %1296  ;;  %v1473_v17 = vsel %vm1470_vm2, %v1472_v5, %v1468_v18 }
 0x40d   : > { %v1446_v21 = vmul.f32 %v3021_v63, %v1373_v31  ;;  %v1377_v16 = vsel %vm1361_vm14, 1.0, %v1345_v58  ;;  %v1339_v61 = vadd.f32 %v4095_v49, %v1297_v62  ;;  %v4098_v60 = vmul.f32 %v3009_v27, %v1473_v17  ;;  %1652 = vperm.xlu1 %2857, %v1473_v17   ;;  %v4103_v52 = vpop.eup %3022 }
 0x40e   : > { %3024 = vrcp.f32 %v1377_v16  ;;  %vm1451_vm3 = vweird.f32 %v3021_v63  ;;  %v1516_v31 = vand.u32 2147483648, %v1377_v16  ;;  %vm1510_vm11 = vweird.f32 %v1377_v16 }
 0x40f   : > { %v1447_v53 = vsub.f32 1.0, %v1446_v21  ;;  %vm1355_vm5 = vcmp.eq.f32.partialorder %v1339_v61, 0.0  ;;  %vm1452_vm13 = vmor %vm1450_vm9, %vm1451_vm3  ;;  %v1514_v21 = vand.u32 2147483647, %v1377_v16 }
 0x410   : > { %v4100_v6 = vsel %vm1355_vm5, 1.0, %v1339_v61 }
 0x411   : > { %3026 = vrcp.f32 %v4100_v6  ;;  %v1448_v4 = vmul.f32 %v3021_v63, %v1447_v53  ;;  %v1426_v53 = vand.u32 2147483648, %v4100_v6  ;;  %v1424_v24 = vand.u32 2147483647, %v4100_v6 }
 0x412   : > { %3028 = vpow2.f32 %v1277_v57  ;;  %vm1515_vm1 = vcmp.eq.f32.partialorder %v1514_v21, 8.507059e+37  ;;  %vm1420_vm2 = vweird.f32 %v4100_v6 }
 0x413   : > { %v1449_v27 = vadd.f32 %v3021_v63, %v1448_v4  ;;  %3030 = vpow2.f32 %v1269_v35  ;;  %vm1425_vm3 = vcmp.eq.f32.partialorder %v1424_v24, 8.507059e+37 }
 0x414   : > { %v3025_v59 = vpop.eup %3024  ;;  %v1318_v14 = vpop.xlane.xlu0 %1317 }
 0x415   : > { %v1506_v8 = vmul.f32 %v3025_v59, %v1377_v16  ;;  %v1346_v58 = vadd.f32 %v4103_v52, %v1318_v14  ;;  %v1453_v5 = vsel %vm1452_vm13, %v3021_v63, %v1449_v27  ;;  %vm1511_vm15 = vweird.f32 %v3025_v59 }
 0x416   : > { %v1458_v18 = vsel %vm1455_vm6, %v1457_v34, %v1453_v5  ;;  %vm1512_vm0 = vmor %vm1510_vm11, %vm1511_vm15  ;;  %v1427_v5 = vor.u32 1.1754944e-38, %v1426_v53 }
 0x417   : > { %v3027_v62 = vpop.eup %3026  ;;  %v1507_v36 = vsub.f32 1.0, %v1506_v8  ;;  %vm1362_vm8 = vcmp.eq.f32.partialorder %v1346_v58, 0.0  ;;  %v4113_v15 = vmul.f32 %v4081_v54, %v1458_v18  ;;  %1647 = vperm.xlu2 %2898, %v1458_v18   ;;  %v1517_v54 = vor.u32 1.1754944e-38, %v1516_v31 }
 0x418   : > { %v1416_v9 = vmul.f32 %v3027_v62, %v4100_v6  ;;  %v1378_v51 = vsel %vm1362_vm8, 1.0, %v1346_v58  ;;  %v4117_v55 = vpop.eup %3028  ;;  %vm1421_vm10 = vweird.f32 %v3027_v62 }
 0x419   : > { %3032 = vrcp.f32 %v1378_v51  ;;  %v1508_v17 = vmul.f32 %v3025_v59, %v1507_v36  ;;  %v4121_v28 = vpop.eup %3030  ;;  %vm1422_vm5 = vmor %vm1420_vm2, %vm1421_vm10  ;;  %vm1525_vm6 = vweird.f32 %v1378_v51 }
 0x41a   : > { %v1417_v63 = vsub.f32 1.0, %v1416_v9 }
 0x41b   : > { %v1509_v61 = vadd.f32 %v3025_v59, %v1508_v17 }
 0x41c   : > { %v1321_v4 = vpop.xlane.xlu0 %1320  ;;  %v1418_v41 = vmul.f32 %v3027_v62, %v1417_v63  ;;  %v1529_v63 = vand.u32 2147483647, %v1378_v51 }
 0x41d   : > { %v1347_v57 = vadd.f32 %v4117_v55, %v1321_v4  ;;  %v1513_v27 = vsel %vm1512_vm0, %v3025_v59, %v1509_v61 }
 0x41e   : > { %v1309_v35 = vpop.xlane.xlu1 %1308  ;;  %v1518_v14 = vsel %vm1515_vm1, %v1517_v54, %v1513_v27  ;;  %v1419_v16 = vadd.f32 %v3027_v62, %v1418_v41  ;;  %vm1530_vm15 = vcmp.eq.f32.partialorder %v1529_v63, 8.507059e+37 }
 0x41f   : > { %v3033_v34 = vpop.eup %3032  ;;  %vm1363_vm14 = vcmp.eq.f32.partialorder %v1347_v57, 0.0  ;;  %v1343_v8 = vadd.f32 %v4121_v28, %v1309_v35  ;;  %v4126_v58 = vmul.f32 %v4092_v12, %v1518_v14  ;;  %1667 = vperm.xlu2 %2898, %v1518_v14   ;;  %v1531_v12 = vand.u32 2147483648, %v1378_v51 }
 0x420   : > { %v1521_v59 = vmul.f32 %v3033_v34, %v1378_v51  ;;  %v1379_v18 = vsel %vm1363_vm14, 1.0, %v1347_v57  ;;  %v1423_v36 = vsel %vm1422_vm5, %v3027_v62, %v1419_v16  ;;  %vm1526_vm13 = vweird.f32 %v3033_v34 }
 0x421   : > { %3034 = vrcp.f32 %v1379_v18  ;;  %vm1359_vm9 = vcmp.eq.f32.partialorder %v1343_v8, 0.0  ;;  %v1428_v9 = vsel %vm1425_vm3, %v1427_v5, %v1423_v36  ;;  %vm1527_vm8 = vmor %vm1525_vm6, %vm1526_vm13  ;;  %v1532_v62 = vor.u32 1.1754944e-38, %v1531_v12 }
 0x422   : > { %v1522_v31 = vsub.f32 1.0, %v1521_v59  ;;  %v1375_v6 = vsel %vm1359_vm9, 1.0, %v1343_v8  ;;  %1637 = vperm.xlu0 %2856, %v1428_v9   ;;  %v4130_v17 = vmul.f32 %v4095_v49, %v1428_v9  ;;  %v1546_v35 = vand.u32 2147483648, %v1379_v18 }
 0x423   : > { %3036 = vrcp.f32 %v1375_v6  ;;  %v1544_v8 = vand.u32 2147483647, %v1379_v18  ;;  %vm1540_vm0 = vweird.f32 %v1379_v18  ;;  %v1486_v51 = vand.u32 2147483648, %v1375_v6 }
 0x424   : > { %v1523_v21 = vmul.f32 %v3033_v34, %v1522_v31  ;;  %v1547_v36 = vor.u32 1.1754944e-38, %v1546_v35  ;;  %vm1480_vm14 = vweird.f32 %v1375_v6 }
 0x425   : > { %vm1545_vm2 = vcmp.eq.f32.partialorder %v1544_v8, 8.507059e+37 }
 0x426   : > { %v1524_v61 = vadd.f32 %v3033_v34, %v1523_v21 }
 0x427   : > { %v3035_v53 = vpop.eup %3034 }
 0x428   : > { %v1536_v4 = vmul.f32 %v3035_v53, %v1379_v18  ;;  %v1528_v54 = vsel %vm1527_vm8, %v3033_v34, %v1524_v61  ;;  %vm1541_vm11 = vweird.f32 %v3035_v53  ;;  %v1484_v34 = vand.u32 2147483647, %v1375_v6 }
 0x429   : > { %v3037_v41 = vpop.eup %3036  ;;  %v1533_v24 = vsel %vm1530_vm15, %v1532_v62, %v1528_v54  ;;  %vm1542_vm1 = vmor %vm1540_vm0, %vm1541_vm11 }
 0x42a   : > { %v1537_v57 = vsub.f32 1.0, %v1536_v4  ;;  %v1476_v27 = vmul.f32 %v3037_v41, %v1375_v6  ;;  %1672 = vperm.xlu1 %2857, %v1533_v24   ;;  %v4133_v49 = vmul.f32 %v4103_v52, %v1533_v24  ;;  %vm1481_vm10 = vweird.f32 %v3037_v41  ;;  %v4143_v4 = vpop.f32.mrf.mxu2 }
 0x42b   : > { %vm1482_vm5 = vmor %vm1480_vm14, %vm1481_vm10  ;;  %v1487_v52 = vor.u32 1.1754944e-38, %v1486_v51  ;;  %vm1485_vm3 = vcmp.eq.f32.partialorder %v1484_v34, 8.507059e+37 }
 0x42c   : > { %v1477_v14 = vsub.f32 1.0, %v1476_v27  ;;  %v1538_v16 = vmul.f32 %v3035_v53, %v1537_v57  ;;  %v2948_v27 = vunpack.i.h.bf16 %v3657_v22 }
 0x42e   : > { %v1539_v5 = vadd.f32 %v3035_v53, %v1538_v16  ;;  %v1478_v59 = vmul.f32 %v3037_v41, %v1477_v14 }
 0x430   : > { %v1543_v9 = vsel %vm1542_vm1, %v3035_v53, %v1539_v5  ;;  %v1479_v31 = vadd.f32 %v3037_v41, %v1478_v59  ;;  %v1248_v53 = vsub.f32 %v3989_v30, %v3997_v39 }
 0x431   : > { %v1548_v12 = vsel %vm1545_vm2, %v1547_v36, %v1543_v9  ;;  %v1985_v9 = vpack.c.bf16 %v3578_v46, %v3578_v46  ;;  %v4619_v46 = vsub.f32 %v4001_v45, %v4006_v13 }
 0x432   : > { %1677 = vperm.xlu2 %2898, %v1548_v12   ;;  %v4136_v21 = vmul.f32 %v4117_v55, %v1548_v12  ;;  %v1483_v63 = vsel %vm1482_vm5, %v3037_v41, %v1479_v31  ;;  %v1271_v62 = vmul.f32 1.442695, %v1248_v53  ;;  %v4147_v55 = vadd.f32 %v4143_v4, %v3704_v56  ;;  %v4154_v36 = vpop.f32.mrf.mxu2 }
 0x433   : > { %v1488_v18 = vsel %vm1485_vm3, %v1487_v52, %v1483_v63  ;;  %v1986_v56 = vpack.c.bf16 %v2948_v27, %v2948_v27  ;;  %v4163_v63 = vadd.f32 %v4154_v36, %v3716_v11  ;;  %v1279_v53 = vmul.f32 1.442695, %v4619_v46 }
 0x434   : > { %v4139_v61 = vmul.f32 %v4121_v28, %v1488_v18  ;;  %1657 = vperm.xlu1 %2857, %v1488_v18   ;;  %3038 = vpow2.f32 %v1271_v62  ;;  %v1037_v30 = vsel %vm1000_vm7, %v4147_v55, -inf  ;;  %v2039_v62 = vunpack.c.l.b16 %v1985_v9 }
 0x435   : > { %v2040_v52 = vunpack.c.l.b16 %v1986_v56 }
 0x43a   : > { %v3039_v6 = vpop.eup %3038 }
 0x444   : > { %v1312_v54 = vpop.xlane.xlu2 %1311 }
 0x445   : > { %v1344_v24 = vadd.f32 %v3039_v6, %v1312_v54 }
 0x446   : > { %v1633_v57 = vpop.permute.xlu0 %1632 }
 0x447   : > { %vm1360_vm9 = vcmp.eq.f32.partialorder %v1344_v24, 0.0  ;;  %v1706_v28 = vmul.f32 %v3992_v19, %v1633_v57  ;;  %v4168_v57 = vpack.c.b16 %v2040_v52, %v2039_v62 }
 0x448   : > { %v1376_v41 = vsel %vm1360_vm9, 1.0, %v1344_v24 }
 0x449   : > { %3040 = vrcp.f32 %v1376_v41  ;;  %v1738_v35 = vpack.c.bf16 %v1706_v28, %v1706_v28  ;;  %v1501_v31 = vand.u32 2147483648, %v1376_v41  ;;  %v1499_v22 = vand.u32 2147483647, %v1376_v41 }
 0x44a   : > { %vm1495_vm6 = vweird.f32 %v1376_v41  ;;  %3042 = vpow2.f32 %v1279_v53 }
 0x44b   : > { %v1758_v5 = vunpack.c.l.b16 %v1738_v35  ;;  %v1502_v54 = vor.u32 1.1754944e-38, %v1501_v31  ;;  %vm1500_vm15 = vcmp.eq.f32.partialorder %v1499_v22, 8.507059e+37  ;;  %v4178_v31 = vpop.f32.mrf.mxu2 }
 0x44c   : > { %v1628_v39 = vpop.permute.xlu2 %1627  ;;  %1038 = vmax.xlane.f32.xlu0 %v1037_v30  ;;  %v1040_v30 = vsel %vm1000_vm7, %v4163_v63, -inf }
 0x44d   : > { %v1705_v14 = vmul.f32 %v3982_v47, %v1628_v39  ;;  %v2052_v47 = vsel %vm771_vm12, %v3691_v10, 0 }
 0x44f   : > { %v3041_v16 = vpop.eup %3040  ;;  %v1737_v8 = vpack.c.bf16 %v1705_v14, %v1705_v14 }
 0x450   : > { %v1491_v51 = vmul.f32 %v3041_v16, %v1376_v41  ;;  %vm1496_vm13 = vweird.f32 %v3041_v16  ;;  %v2049_v41 = vsel %vm771_vm12, %v4168_v57, 0  ;;  %v3043_v13 = vpop.eup %3042 }
 0x451   : > { %v1757_v59 = vunpack.c.l.b16 %v1737_v8  ;;  %vm1497_vm8 = vmor %vm1495_vm6, %vm1496_vm13 }
 0x452   : > { %v1492_v34 = vsub.f32 1.0, %v1491_v51 }
 0x453   : > { %v1761_v19 = vpack.c.b16 %v1758_v5, %v1757_v59  ;;  %v4182_v46 = vpop.f32.mrf.mxu2 }
 0x454   : > { %v1493_v12 = vmul.f32 %v3041_v16, %v1492_v34 }
 0x455   : > { %2757 = vmatmul.msk.bf16.vlgmr.msrb.gmra.mxu3 %vm1000_vm7, %v1761_v19 }
 0x456   : > { %2060 = vmatpush.bf16.xpose.msrb.mxu3 %v2052_v47  ;;  %v1494_v18 = vadd.f32 %v3041_v16, %v1493_v12 }
 0x458   : > { %v1498_v24 = vsel %vm1497_vm8, %v3041_v16, %v1494_v18 }
 0x459   : > { %v1503_v28 = vsel %vm1500_vm15, %v1502_v54, %v1498_v24  ;;  %v4186_v24 = vadd.f32 %v4182_v46, %v3729_v42 }
 0x45a   : > { %v4172_v11 = vmul.f32 %v3039_v6, %v1503_v28 }
 0x45b   : > { %1041 = vmax.xlane.f32.xlu2 %v1040_v30  ;;  %v1046_v30 = vsel %vm1000_vm7, %v4186_v24, -inf }
 0x45e   : > { %2061 = vmatpush.bf16.xpose.msrb.mxu3 %v2049_v41 }
 0x45f   : > { %v1643_v51 = vpop.permute.xlu2 %1642 }
 0x460   : > { %1662 = vperm.xlu0 %2856, %v1503_v28  }
 0x461   : > { %v1324_v45 = vpop.xlane.xlu1 %1323 }
 0x462   : > { %v1348_v39 = vadd.f32 %v3043_v13, %v1324_v45 }
 0x464   : > { %vm1364_vm11 = vcmp.eq.f32.partialorder %v1348_v39, 0.0 }
 0x465   : > { %v1380_v27 = vsel %vm1364_vm11, 1.0, %v1348_v39 }
 0x466   : > { %3044 = vrcp.f32 %v1380_v27  ;;  %v1561_v8 = vand.u32 2147483648, %v1380_v27  ;;  %v1559_v56 = vand.u32 2147483647, %v1380_v27  ;;  %vm1555_vm10 = vweird.f32 %v1380_v27 }
 0x468   : > { %v1562_v59 = vor.u32 1.1754944e-38, %v1561_v8  ;;  %vm1560_vm2 = vcmp.eq.f32.partialorder %v1559_v56, 8.507059e+37 }
 0x46c   : > { %v3045_v35 = vpop.eup %3044 }
 0x46d   : > { %v1551_v14 = vmul.f32 %v3045_v35, %v1380_v27  ;;  %vm1556_vm0 = vweird.f32 %v3045_v35 }
 0x46e   : > { %vm1557_vm1 = vmor %vm1555_vm10, %vm1556_vm0  ;;  %vm2137_vm0 = vcmask 253952  }
 0x46f   : > { %v1552_v16 = vsub.f32 1.0, %v1551_v14 }
 0x471   : > { %v1553_v6 = vmul.f32 %v3045_v35, %v1552_v16  ;;  %v1648_v12 = vpop.permute.xlu2 %1647  ;;  %v4196_v16 = vadd.f32 %v4178_v31, %v3682_v7  ;;  %v4209_v7 = vadd.f32 %v4143_v4, %v3855_v23 }
 0x472   : > { %v1709_v22 = vmul.f32 %v4023_v26, %v1648_v12  ;;  %v1708_v26 = vmul.f32 %v4012_v38, %v1643_v51 }
 0x473   : > { %v1554_v5 = vadd.f32 %v3045_v35, %v1553_v6 }
 0x474   : > { %v1741_v47 = vpack.c.bf16 %v1709_v22, %v1709_v22 }
 0x475   : > { %v1558_v34 = vsel %vm1557_vm1, %v3045_v35, %v1554_v5 }
 0x476   : > { %v1563_v19 = vsel %vm1560_vm2, %v1562_v59, %v1558_v34  ;;  %v1804_v62 = vunpack.c.l.b16 %v1741_v47 }
 0x477   : > { %1682 = vperm.xlu1 %2857, %v1563_v19   ;;  %v4176_v9 = vmul.f32 %v3043_v13, %v1563_v19 }
 0x479   : > { %v1668_v45 = vpop.permute.xlu2 %1667 }
 0x47a   : > { %v1713_v35 = vmul.f32 %v4028_v37, %v1668_v45 }
 0x47c   : > { %v1745_v6 = vpack.c.bf16 %v1713_v35, %v1713_v35 }
 0x47e   : > { %v1851_v51 = vunpack.c.l.b16 %v1745_v6 }
 0x47f   : > { %v1653_v52 = vpop.permute.xlu1 %1652 }
 0x480   : > { %v1710_v18 = vmul.f32 %v4016_v33, %v1653_v52  ;;  %v1740_v33 = vpack.c.bf16 %v1708_v26, %v1708_v26 }
 0x482   : > { %v1742_v53 = vpack.c.bf16 %v1710_v18, %v1710_v18  ;;  %v1760_v27 = vunpack.c.l.b16 %v1740_v33 }
 0x484   : > { %v1805_v54 = vunpack.c.l.b16 %v1742_v53 }
 0x486   : > { %v1808_v28 = vpack.c.b16 %v1805_v54, %v1804_v62 }
 0x488   : > { %2759 = vmatmul.msk.bf16.vlgmr.msra.gmra.mxu0 %vm1000_vm7, %v1808_v28 }
 0x48a   : > { %1047 = vmax.xlane.f32.xlu0 %v1046_v30 }
 0x48c   : > { %v1678_v19 = vpop.permute.xlu2 %1677 }
 0x48d   : > { %v1715_v28 = vmul.f32 %v4045_v0, %v1678_v19 }
 0x48f   : > { %v1747_v26 = vpack.c.bf16 %v1715_v28, %v1715_v28 }
 0x491   : > { %v1853_v33 = vunpack.c.l.b16 %v1747_v26 }
 0x494   : > { %v1638_v41 = vpop.permute.xlu0 %1637 }
 0x495   : > { %v1707_v13 = vmul.f32 %v4030_v3, %v1638_v41  ;;  %v1043_v3 = vsel %vm1000_vm7, %v4196_v16, -inf }
 0x497   : > { %v1739_v39 = vpack.c.bf16 %v1707_v13, %v1707_v13 }
 0x499   : > { %v1759_v42 = vunpack.c.l.b16 %v1739_v39  ;;  %v4620_v39 = vld [vmem:[#allocation23_spill] sm:$0xff] }
 0x49b   : > { %v1762_v14 = vpack.c.b16 %v1760_v27, %v1759_v42  ;;  %v4239_v27 = vadd.f32 %v4182_v46, %v4620_v39  ;;  %v4622_v46 = vld [vmem:[#allocation22_spill] sm:$0xff] }
 0x49c   : > { %v1673_v8 = vpop.permute.xlu1 %1672 }
 0x49d   : > { %v1714_v56 = vmul.f32 %v4037_v48, %v1673_v8  ;;  %2758 = vmatmul.msk.bf16.gmra.mxu3 %vm1000_vm7, %v1762_v14  ;;  %v4254_v8 = vadd.f32 %v4178_v31, %v4622_v46 }
 0x49f   : > { %v1746_v38 = vpack.c.bf16 %v1714_v56, %v1714_v56 }
 0x4a1   : > { %v1852_v5 = vunpack.c.l.b16 %v1746_v38  ;;  %1044 = vmax.xlane.f32.xlu1 %v1043_v3 }
 0x4a3   : > { %v1855_v37 = vpack.c.b16 %v1852_v5, %v1851_v51 }
 0x4a5   : > { %2761 = vmatmul.msk.bf16.vlgmr.msra.gmra.mxu1 %vm1000_vm7, %v1855_v37 }
 0x4a6   : > { %v1658_v12 = vpop.permute.xlu1 %1657 }
 0x4a7   : > { %v1711_v4 = vmul.f32 %v4049_v40, %v1658_v12 }
 0x4a9   : > { %v1743_v47 = vpack.c.bf16 %v1711_v4, %v1711_v4 }
 0x4ad   : > { %2765 = vmatmul.msk.bf16.vlgmr.msra.gmra.mxu3 %vm771_vm12, %v3768_v43 }
 0x4bd   : > { %2766 = vmatmul.msk.bf16.vlgmr.msrb.gmra.mxu3 %vm771_vm12, %v3822_v32  ;;  %v4220_v32 = vadd.f32 %v4154_v36, %v3869_v25  ;;  %v1806_v36 = vunpack.c.l.b16 %v1743_v47 }
 0x4bf   : > { %v1039_v48 = vpop.xlane.xlu0 %1038 }
 0x4c0   : > { %v1061_v59 = vmax.f32 %v1039_v48, %v4209_v7 }
 0x4c2   : > { %vm1077_vm14 = vweird.f32 %v1061_v59 }
 0x4c3   : > { %vm1093_vm5 = vmxor %vm1077_vm14, %vm4608_vm4 }
 0x4c4   : > { %v4213_v34 = vsel %vm1093_vm5, %v1061_v59, 0.0 }
 0x4c5   : > { %1175 = vperm.xlu2 %2898, %v4213_v34   ;;  %v1253_v43 = vsub.f32 %v4209_v7, %v4213_v34 }
 0x4ce   : > { %v1042_v23 = vpop.xlane.xlu2 %1041 }
 0x4cf   : > { %v1062_v22 = vmax.f32 %v1042_v23, %v4220_v32 }
 0x4d1   : > { %vm1078_vm3 = vweird.f32 %v1062_v22 }
 0x4d2   : > { %v1663_v52 = vpop.permute.xlu0 %1662  ;;  %vm1094_vm9 = vmxor %vm1078_vm3, %vm4608_vm4 }
 0x4d3   : > { %v1712_v18 = vmul.f32 %v4059_v50, %v1663_v52  ;;  %v4226_v53 = vsel %vm1094_vm9, %v1062_v22, 0.0 }
 0x4d4   : > { %v1254_v62 = vsub.f32 %v4220_v32, %v4226_v53  ;;  %1180 = vperm.xlu1 %2857, %v4226_v53  }
 0x4d5   : > { %v1744_v25 = vpack.c.bf16 %v1712_v18, %v1712_v18 }
 0x4d7   : > { %v1807_v54 = vunpack.c.l.b16 %v1744_v25 }
 0x4d8   : > { %v4250_v14 = vpop.f32.mrf.mxu3 }
 0x4d9   : > { %v1809_v40 = vpack.c.b16 %v1807_v54, %v1806_v36 }
 0x4db   : > { %2760 = vmatmul.msk.bf16.gmra.mxu0 %vm1000_vm7, %v1809_v40 }
 0x4e0   : > { %v4257_v38 = vpop.f32.mrf.mxu3 }
 0x4e9   : > { %v1683_v30 = vpop.permute.xlu1 %1682 }
 0x4ea   : > { %v1716_v41 = vmul.f32 %v4069_v20, %v1683_v30  ;;  %v4621_v20 = vld [vmem:[#allocation21_spill] sm:$0xff] }
 0x4eb   : > { %2767 = vmatmul.msk.bf16.vlgmr.msrb.gmra.mxu0 %vm771_vm12, %v3861_v2 }
 0x4ec   : > { %v1748_v50 = vpack.c.bf16 %v1716_v41, %v1716_v41 }
 0x4ee   : > { %v1854_v13 = vunpack.c.l.b16 %v1748_v50 }
 0x4f0   : > { %v1856_v45 = vpack.c.b16 %v1854_v13, %v1853_v33 }
 0x4f2   : > { %2762 = vmatmul.msk.bf16.gmra.mxu1 %vm1000_vm7, %v1856_v45 }
 0x4fd   : > { %v1048_v35 = vpop.xlane.xlu0 %1047 }
 0x4fe   : > { %v1064_v0 = vmax.f32 %v1048_v35, %v4239_v27  ;;  %v4623_v35 = vld [vmem:[#allocation13_spill] sm:$0xff] }
 0x500   : > { %vm1080_vm13 = vweird.f32 %v1064_v0 }
 0x501   : > { %vm1096_vm6 = vmxor %vm1080_vm13, %vm4608_vm4 }
 0x502   : > { %2768 = vmatmul.msk.bf16.vlgmr.msrb.gmra.mxu1 %vm771_vm12, %v4621_v20  ;;  %v4245_v2 = vsel %vm1096_vm6, %v1064_v0, 0.0 }
 0x503   : > { %1190 = vperm.xlu2 %2898, %v4245_v2   ;;  %v1256_v42 = vsub.f32 %v4239_v27, %v4245_v2 }
 0x505   : > { %v4278_v52 = vpop.f32.mrf.mxu0 }
 0x514   : > { %v1045_v6 = vpop.xlane.xlu1 %1044 }
 0x515   : > { %v1063_v56 = vmax.f32 %v1045_v6, %v4254_v8 }
 0x517   : > { %vm1079_vm8 = vweird.f32 %v1063_v56 }
 0x518   : > { %vm1095_vm15 = vmxor %vm1079_vm8, %vm4608_vm4 }
 0x519   : > { %v4260_v3 = vsel %vm1095_vm15, %v1063_v56, 0.0  ;;  %v477_v56 = vld [vmem:[%s329_s10] sm:$0x1] }
 0x51a   : > { %1185 = vperm.xlu0 %2856, %v4260_v3   ;;  %v1255_v51 = vsub.f32 %v4254_v8, %v4260_v3  ;;  %vm478_vm11 = vcmp.gt.f32.partialorder %v477_v56, 0.5 }
 0x51f   : > { %v1176_v31 = vpop.permute.xlu2 %1175 }
 0x520   : > { %v4265_v5 = vpop.f32.mrf.mxu3  ;;  %v1205_v59 = vsub.f32 %v4147_v55, %v1176_v31  ;;  %v4281_v55 = vpop.f32.mrf.mxu0 }
 0x522   : > { %v1233_v19 = vmul.f32 1.442695, %v1205_v59  ;;  %v4289_v30 = vpop.f32.mrf.mxu1 }
 0x524   : > { %3046 = vpow2.f32 %v1233_v19 }
 0x528   : > { %v4267_v37 = vpop.f32.mrf.mxu3 }
 0x52a   : > { %v4272_v23 = vpop.eup %3046  ;;  %v4294_v33 = vpop.f32.mrf.mxu1 }
 0x52b   : > { %v1325_v22 = vsel %vm1000_vm7, %v4272_v23, 0.0 }
 0x530   : > { %v4269_v48 = vpop.f32.mrf.mxu3 }
 0x538   : > { %v2030_v12 = vpop.f32.mrf.mxu3 }
 0x539   : > { %v3229_v12 = vmov 0.0  }
 0x540   : > { %v4274_v4 = vpop.f32.mrf.mxu3 }
 0x544   : > { %1326 = vadd.xlane.f32.xlu0 %v1325_v22  ;;  %v4313_v22 = vsel %vm478_vm11, -inf, %v3229_v12 }
 0x546   : > { %v1181_v47 = vpop.permute.xlu1 %1180 }
 0x547   : > { %v1206_v18 = vsub.f32 %v4163_v63, %v1181_v47 }
 0x548   : > { %v2065_v25 = vpop.f32.mrf.mxu3 }
 0x549   : > { %v1235_v36 = vmul.f32 1.442695, %v1206_v18 }
 0x54b   : > { %3048 = vpow2.f32 %v1235_v36 }
 0x551   : > { %v4283_v54 = vpop.eup %3048 }
 0x552   : > { %v1328_v40 = vsel %vm1000_vm7, %v4283_v54, 0.0 }
 0x553   : > { %1329 = vadd.xlane.f32.xlu1 %v1328_v40  ;;  %v4624_v40 = vld [vmem:[#allocation11_spill] sm:$0xff] }
 0x558   : > { %v4287_v28 = vpop.f32.mrf.mxu0 }
 0x55d   : > { %v1191_v26 = vpop.permute.xlu2 %1190 }
 0x55e   : > { %v1208_v41 = vsub.f32 %v4186_v24, %v1191_v26 }
 0x560   : > { %v1239_v63 = vmul.f32 1.442695, %v1208_v41  ;;  %v4292_v50 = vpop.f32.mrf.mxu0 }
 0x562   : > { %3050 = vpow2.f32 %v1239_v63 }
 0x568   : > { %v4296_v13 = vpop.eup %3050  ;;  %v2098_v45 = vpop.f32.mrf.mxu0 }
 0x569   : > { %v1334_v39 = vsel %vm1000_vm7, %v4296_v13, 0.0  ;;  %v4316_v47 = vadd.f32 %v2098_v45, %v4313_v22 }
 0x56a   : > { %1335 = vadd.xlane.f32.xlu2 %v1334_v39  ;;  %v1283_v39 = vmul.f32 1.442695, %v1254_v62 }
 0x56b   : > { %v2144_v18 = vsel %vm2137_vm0, %v4316_v47, -inf }
 0x56c   : > { %2970 = vrot.lane.b32.xlu1 %v4623_v35, %s3227_s18 }
 0x56f   : > { %v4302_v0 = vpop.f32.mrf.mxu1 }
 0x570   : > { %v2100_v20 = vpop.f32.mrf.mxu0 }
 0x577   : > { %v4304_v24 = vpop.f32.mrf.mxu1 }
 0x57f   : > { %v4306_v46 = vpop.f32.mrf.mxu1 }
 0x580   : > { %v4372_v27 = vadd.f32 %v4306_v46, %v4313_v22 }
 0x587   : > { %v2135_v6 = vpop.f32.mrf.mxu1 }
 0x58c   : > { %v1186_v31 = vpop.permute.xlu0 %1185 }
 0x58d   : > { %v1207_v59 = vsub.f32 %v4196_v16, %v1186_v31  ;;  %v1281_v16 = vmul.f32 1.442695, %v1253_v43 }
 0x58f   : > { %v1237_v19 = vmul.f32 1.442695, %v1207_v59 }
 0x591   : > { %3052 = vpow2.f32 %v1237_v19 }
 0x592   : > { %3054 = vpow2.f32 %v1281_v16 }
 0x596   : > { %2145 = vmax.xlane.f32.xlu1 %v2144_v18 }
 0x597   : > { %v4320_v25 = vpop.eup %3052 }
 0x598   : > { %v1331_v36 = vsel %vm1000_vm7, %v4320_v25, 0.0  ;;  %v3055_v26 = vpop.eup %3054 }
 0x599   : > { %1332 = vadd.xlane.f32.xlu0 %v1331_v36 }
 0x5ad   : > { %721 = vrot.lane.b32.xlu0 %v4624_v40, %s3227_s18 }
 0x5af   : > { %2282 = vrot.lane.b32.xlu1 %v3691_v10, %s3224_s16 }
 0x5b7   : > { %v1327_v41 = vpop.xlane.xlu0 %1326 }
 0x5b8   : > { %v1349_v63 = vadd.f32 %v3055_v26, %v1327_v41 }
 0x5ba   : > { %vm1365_vm10 = vcmp.eq.f32.partialorder %v1349_v63, 0.0 }
 0x5bb   : > { %v1381_v45 = vsel %vm1365_vm10, 1.0, %v1349_v63 }
 0x5bc   : > { %3056 = vrcp.f32 %v1381_v45  ;;  %v1576_v6 = vand.u32 2147483648, %v1381_v45  ;;  %v1574_v31 = vand.u32 2147483647, %v1381_v45  ;;  %vm1570_vm14 = vweird.f32 %v1381_v45 }
 0x5bd   : > { %3058 = vpow2.f32 %v1283_v39 }
 0x5be   : > { %v1577_v12 = vor.u32 1.1754944e-38, %v1576_v6  ;;  %vm1575_vm3 = vcmp.eq.f32.partialorder %v1574_v31, 8.507059e+37 }
 0x5c2   : > { %v3057_v7 = vpop.eup %3056 }
 0x5c3   : > { %v1566_v34 = vmul.f32 %v3057_v7, %v1381_v45  ;;  %v3059_v35 = vpop.eup %3058  ;;  %vm1571_vm1 = vweird.f32 %v3057_v7 }
 0x5c4   : > { %vm1572_vm5 = vmor %vm1570_vm14, %vm1571_vm1 }
 0x5c5   : > { %v1567_v43 = vsub.f32 1.0, %v1566_v34 }
 0x5c6   : > { %v1330_v20 = vpop.xlane.xlu1 %1329 }
 0x5c7   : > { %v1350_v56 = vadd.f32 %v3059_v35, %v1330_v20  ;;  %v1568_v10 = vmul.f32 %v3057_v7, %v1567_v43 }
 0x5c9   : > { %vm1366_vm2 = vcmp.eq.f32.partialorder %v1350_v56, 0.0  ;;  %v1569_v59 = vadd.f32 %v3057_v7, %v1568_v10 }
 0x5ca   : > { %v1382_v19 = vsel %vm1366_vm2, 1.0, %v1350_v56 }
 0x5cb   : > { %3060 = vrcp.f32 %v1382_v19  ;;  %v1573_v32 = vsel %vm1572_vm5, %v3057_v7, %v1569_v59  ;;  %v1591_v40 = vand.u32 2147483648, %v1382_v19  ;;  %v1589_v63 = vand.u32 2147483647, %v1382_v19 }
 0x5cc   : > { %v1578_v53 = vsel %vm1575_vm3, %v1577_v12, %v1573_v32  ;;  %vm1585_vm13 = vweird.f32 %v1382_v19 }
 0x5cd   : > { %1687 = vperm.xlu2 %2898, %v1578_v53   ;;  %v4334_v62 = vmul.f32 %v3055_v26, %v1578_v53  ;;  %v1592_v45 = vor.u32 1.1754944e-38, %v1591_v40  ;;  %vm1590_vm8 = vcmp.eq.f32.partialorder %v1589_v63, 8.507059e+37 }
 0x5d1   : > { %v3061_v18 = vpop.eup %3060 }
 0x5d2   : > { %v1581_v36 = vmul.f32 %v3061_v18, %v1382_v19  ;;  %vm1586_vm9 = vweird.f32 %v3061_v18  ;;  %v4340_v19 = vadd.f32 %v4269_v48, %v4313_v22 }
 0x5d3   : > { %vm1587_vm6 = vmor %vm1585_vm13, %vm1586_vm9 }
 0x5d4   : > { %v1582_v16 = vsub.f32 1.0, %v1581_v36  ;;  %v2138_v32 = vsel %vm2137_vm0, %v4340_v19, -inf }
 0x5d6   : > { %v1583_v41 = vmul.f32 %v3061_v18, %v1582_v16 }
 0x5d8   : > { %v1584_v39 = vadd.f32 %v3061_v18, %v1583_v41 }
 0x5da   : > { %v1588_v34 = vsel %vm1587_vm6, %v3061_v18, %v1584_v39  ;;  %v1285_v18 = vmul.f32 1.442695, %v1255_v51 }
 0x5db   : > { %v1593_v43 = vsel %vm1590_vm8, %v1592_v45, %v1588_v34 }
 0x5dc   : > { %1692 = vperm.xlu0 %2856, %v1593_v43   ;;  %v4336_v7 = vmul.f32 %v3059_v35, %v1593_v43  ;;  %v4346_v35 = vadd.f32 %v4274_v4, %v4313_v22  ;;  %3062 = vpow2.f32 %v1285_v18  ;;  %v4626_v22 = vld [vmem:[#allocation19_spill] sm:$0xff] }
 0x5de   : > { %v2971_v20 = vpop.permute.xlu1 %2970  ;;  %v2141_v53 = vsel %vm2137_vm0, %v4346_v35, -inf }
 0x5df   : > { %v2973_v26 = vunpack.i.h.bf16 %v2971_v20  ;;  %v2972_v6 = vunpack.i.l.bf16 %v2971_v20 }
 0x5e1   : > { %v746_v56 = vpack.c.bf16 %v2973_v26, %v2973_v26  ;;  %v745_v10 = vpack.c.bf16 %v2972_v6, %v2972_v6 }
 0x5e2   : > { %v3063_v36 = vpop.eup %3062 }
 0x5e3   : > { %v1911_v31 = vunpack.c.l.b16 %v746_v56  ;;  %v1910_v59 = vunpack.c.l.b16 %v745_v10 }
 0x5e5   : > { %v1913_v12 = vpack.c.b16 %v1911_v31, %v1910_v59  ;;  %v4625_v31 = vld [vmem:[#allocation14_spill] sm:$0xff] }
 0x5e7   : > { %1928 = vmatpush.bf16.msra.mxu2 %v1913_v12 }
 0x5f6   : > { %2139 = vmax.xlane.f32.xlu2 %v2138_v32 }
 0x5fe   : > { %2142 = vmax.xlane.f32.xlu2 %v2141_v53  ;;  %v1287_v53 = vmul.f32 1.442695, %v1256_v42 }
 0x609   : > { %v2146_v41 = vpop.xlane.xlu1 %2145 }
 0x60a   : > { %vm2152_vm14 = vweird.f32 %v2146_v41 }
 0x60b   : > { %vm2156_vm5 = vmxor %vm2152_vm14, %vm4608_vm4 }
 0x60c   : > { %v1333_v48 = vpop.xlane.xlu0 %1332  ;;  %v2160_v12 = vsel %vm2156_vm5, %v2146_v41, 0.0 }
 0x60d   : > { %v1351_v16 = vadd.f32 %v3063_v36, %v1333_v48  ;;  %v2164_v32 = vsub.f32 %v4316_v47, %v2160_v12  ;;  %v1336_v48 = vpop.xlane.xlu2 %1335 }
 0x60f   : > { %vm1367_vm15 = vcmp.eq.f32.partialorder %v1351_v16, 0.0  ;;  %v2170_v18 = vmul.f32 1.442695, %v2164_v32 }
 0x610   : > { %v1383_v40 = vsel %vm1367_vm15, 1.0, %v1351_v16 }
 0x611   : > { %3064 = vrcp.f32 %v1383_v40  ;;  %v1606_v45 = vand.u32 2147483648, %v1383_v40  ;;  %v1604_v43 = vand.u32 2147483647, %v1383_v40  ;;  %vm1600_vm10 = vweird.f32 %v1383_v40 }
 0x612   : > { %3066 = vpow2.f32 %v1287_v53 }
 0x613   : > { %v1607_v20 = vor.u32 1.1754944e-38, %v1606_v45  ;;  %vm1605_vm2 = vcmp.eq.f32.partialorder %v1604_v43, 8.507059e+37  ;;  %3068 = vpow2.f32 %v2170_v18 }
 0x616   : > { %2280 = vrot.lane.b32.xlu2 %v4168_v57, %s3224_s16 }
 0x617   : > { %v3065_v4 = vpop.eup %3064 }
 0x618   : > { %v1596_v63 = vmul.f32 %v3065_v4, %v1383_v40  ;;  %vm1601_vm11 = vweird.f32 %v3065_v4 }
 0x619   : > { %vm1602_vm1 = vmor %vm1600_vm10, %vm1601_vm11 }
 0x61a   : > { %v1597_v39 = vsub.f32 1.0, %v1596_v63  ;;  %v2147_v63 = vsel %vm2137_vm0, %v4372_v27, -inf }
 0x61c   : > { %v1598_v34 = vmul.f32 %v3065_v4, %v1597_v39 }
 0x61e   : > { %v1599_v3 = vadd.f32 %v3065_v4, %v1598_v34 }
 0x61f   : > { %v722_v8 = vpop.permute.xlu0 %721 }
 0x620   : > { %v744_v51 = vpack.c.bf16 %v722_v8, %v722_v8  ;;  %v1603_v6 = vsel %vm1602_vm1, %v3065_v4, %v1599_v3 }
 0x621   : > { %v2283_v26 = vpop.permute.xlu1 %2282  ;;  %v1608_v10 = vsel %vm1605_vm2, %v1607_v20, %v1603_v6 }
 0x622   : > { %v1909_v56 = vunpack.c.l.b16 %v744_v51  ;;  %2295 = vmatpush.bf16.msra.mxu3 %v2283_v26  ;;  %v4355_v57 = vmul.f32 %v3063_v36, %v1608_v10  ;;  %1697 = vperm.xlu0 %2856, %v1608_v10   ;;  %v4363_v36 = vpop.eup %3066 }
 0x623   : > { %v1352_v16 = vadd.f32 %v4363_v36, %v1336_v48  ;;  %v4366_v40 = vpop.eup %3068 }
 0x624   : > { %v1912_v59 = vpack.c.b16 %v1909_v56, %v4625_v31  ;;  %v2180_v4 = vsel %vm2137_vm0, %v4366_v40, 0.0 }
 0x625   : > { %vm1368_vm3 = vcmp.eq.f32.partialorder %v1352_v16, 0.0 }
 0x626   : > { %1929 = vmatpush.bf16.msra.mxu2 %v1912_v59  ;;  %v1384_v47 = vsel %vm1368_vm3, 1.0, %v1352_v16 }
 0x627   : > { %3070 = vrcp.f32 %v1384_v47  ;;  %v1688_v2 = vpop.permute.xlu2 %1687  ;;  %v1621_v6 = vand.u32 2147483648, %v1384_v47  ;;  %vm1615_vm13 = vweird.f32 %v1384_v47  ;;  %v1619_v56 = vand.u32 2147483647, %v1384_v47 }
 0x628   : > { %v1717_v41 = vmul.f32 %v4272_v23, %v1688_v2 }
 0x629   : > { %v1622_v31 = vor.u32 1.1754944e-38, %v1621_v6  ;;  %vm1620_vm8 = vcmp.eq.f32.partialorder %v1619_v56, 8.507059e+37 }
 0x62a   : > { %v1749_v34 = vpack.c.bf16 %v1717_v41, %v1717_v41 }
 0x62c   : > { %v1898_v51 = vunpack.c.l.b16 %v1749_v34 }
 0x62d   : > { %v3071_v42 = vpop.eup %3070 }
 0x62e   : > { %v1611_v39 = vmul.f32 %v3071_v42, %v1384_v47  ;;  %vm1616_vm9 = vweird.f32 %v3071_v42 }
 0x62f   : > { %vm1617_vm6 = vmor %vm1615_vm13, %vm1616_vm9 }
 0x630   : > { %v1612_v8 = vsub.f32 1.0, %v1611_v39  ;;  %v4629_v39 = vld [vmem:[#allocation15_spill] sm:$0xff] }
 0x632   : > { %v1613_v46 = vmul.f32 %v3071_v42, %v1612_v8 }
 0x634   : > { %v1614_v23 = vadd.f32 %v3071_v42, %v1613_v46 }
 0x636   : > { %v1618_v10 = vsel %vm1617_vm6, %v3071_v42, %v1614_v23  ;;  %v4630_v23 = vld [vmem:[#allocation18_spill] sm:$0xff] }
 0x63f   : > { %2181 = vadd.xlane.f32.xlu2 %v2180_v4 }
 0x64c   : > { %2148 = vmax.xlane.f32.xlu0 %v2147_v63  ;;  %v4627_v63 = vld [vmem:[#allocation17_spill] sm:$0xff] }
 0x64e   : > { %v1693_v45 = vpop.permute.xlu0 %1692 }
 0x64f   : > { %v1718_v43 = vmul.f32 %v4283_v54, %v1693_v45  ;;  %v1623_v54 = vsel %vm1620_vm8, %v1622_v31, %v1618_v10 }
 0x651   : > { %v1750_v3 = vpack.c.bf16 %v1718_v43, %v1718_v43 }
 0x653   : > { %v1899_v20 = vunpack.c.l.b16 %v1750_v3 }
 0x655   : > { %v1902_v26 = vpack.c.b16 %v1899_v20, %v1898_v51 }
 0x657   : > { %2302 = vrot.lane.b32.xlu2 %v4626_v22, %s3224_s16  ;;  %2763 = vmatmul.msk.bf16.vlgmr.msra.gmra.mxu2 %vm1000_vm7, %v1902_v26 }
 0x660   : > { %1702 = vperm.xlu0 %2856, %v1623_v54  }
 0x669   : > { %v2140_v59 = vpop.xlane.xlu2 %2139 }
 0x66a   : > { %vm2150_vm15 = vweird.f32 %v2140_v59 }
 0x66b   : > { %vm2154_vm11 = vmxor %vm2150_vm15, %vm4608_vm4 }
 0x66c   : > { %v2158_v12 = vsel %vm2154_vm11, %v2140_v59, 0.0 }
 0x66d   : > { %v2162_v32 = vsub.f32 %v4340_v19, %v2158_v12 }
 0x66f   : > { %v2166_v18 = vmul.f32 1.442695, %v2162_v32 }
 0x671   : > { %v2143_v53 = vpop.xlane.xlu2 %2142  ;;  %3072 = vpow2.f32 %v2166_v18 }
 0x672   : > { %vm2151_vm10 = vweird.f32 %v2143_v53 }
 0x673   : > { %vm2155_vm1 = vmxor %vm2151_vm10, %vm4608_vm4 }
 0x674   : > { %v2159_v48 = vsel %vm2155_vm1, %v2143_v53, 0.0 }
 0x675   : > { %v2163_v16 = vsub.f32 %v4346_v35, %v2159_v48  ;;  %v4628_v35 = vld [vmem:[#allocation20_spill] sm:$0xff] }
 0x677   : > { %v2168_v4 = vmul.f32 1.442695, %v2163_v16  ;;  %v4385_v2 = vpop.eup %3072 }
 0x678   : > { %v2174_v41 = vsel %vm2137_vm0, %v4385_v2, 0.0 }
 0x679   : > { %3074 = vpow2.f32 %v2168_v4  ;;  %v2281_v47 = vpop.permute.xlu2 %2280  ;;  %v4632_v4 = vld [vmem:[#allocation12_spill] sm:$0xff] }
 0x67a   : > { %2296 = vmatpush.bf16.msra.mxu3 %v2281_v47  ;;  %v4423_v47 = vperm.slane %v4632_v4, 0 }
 0x67f   : > { %v3075_v42 = vpop.eup %3074 }
 0x680   : > { %2175 = vadd.xlane.f32.xlu2 %v2174_v41  ;;  %v2177_v19 = vsel %vm2137_vm0, %v3075_v42, 0.0 }
 0x681   : > { %2178 = vadd.xlane.f32.xlu1 %v2177_v19 }
 0x694   : > { %v1698_v45 = vpop.permute.xlu0 %1697 }
 0x698   : > { %2525 = vperm.xlu2 %2898, %v4334_v62  }
 0x69a   : > { %2326 = vrot.lane.b32.xlu1 %v4627_v63, %s3224_s16 }
 0x6a2   : > { %2324 = vrot.lane.b32.xlu1 %v4628_v35, %s3224_s16 }
 0x6aa   : > { %2260 = vrot.lane.b32.xlu1 %v4629_v39, %s3224_s16 }
 0x6b2   : > { %2383 = vperm.xlu1 %2857, %v4113_v15   ;;  %v2182_v16 = vpop.xlane.xlu2 %2181 }
 0x6b3   : > { %vm2188_vm13 = vcmp.eq.f32.partialorder %v2182_v16, 0.0 }
 0x6b4   : > { %v2192_v35 = vsel %vm2188_vm13, 1.0, %v2182_v16 }
 0x6b5   : > { %vm2229_vm11 = vweird.f32 %v2192_v35 }
 0x6ba   : > { %2388 = vperm.xlu1 %2857, %v4098_v60   ;;  %v1719_v60 = vmul.f32 %v4320_v25, %v1698_v45  ;;  %v4631_v25 = vld [vmem:[#allocation16_spill] sm:$0xff] }
 0x6bc   : > { %v1751_v20 = vpack.c.bf16 %v1719_v60, %v1719_v60 }
 0x6be   : > { %v1900_v46 = vunpack.c.l.b16 %v1751_v20 }
 0x6bf   : > { %v2149_v34 = vpop.xlane.xlu0 %2148 }
 0x6c0   : > { %vm2153_vm2 = vweird.f32 %v2149_v34 }
 0x6c1   : > { %vm2157_vm14 = vmxor %vm2153_vm2, %vm4608_vm4 }
 0x6c2   : > { %2398 = vperm.xlu1 %2857, %v4172_v11   ;;  %v2161_v62 = vsel %vm2157_vm14, %v2149_v34, 0.0 }
 0x6c3   : > { %v2165_v43 = vsub.f32 %v4372_v27, %v2161_v62  ;;  %v1736_v27 = vmul.f32 %v4363_v36, %v1623_v54 }
 0x6c5   : > { %v2172_v8 = vmul.f32 1.442695, %v2165_v43 }
 0x6c7   : > { %3076 = vpow2.f32 %v2172_v8 }
 0x6ca   : > { %2464 = vperm.xlu1 %2857, %v4136_v21  }
 0x6cd   : > { %v4403_v3 = vpop.eup %3076 }
 0x6ce   : > { %v2183_v15 = vsel %vm2137_vm0, %v4403_v3, 0.0 }
 0x6cf   : > { %2184 = vadd.xlane.f32.xlu0 %v2183_v15 }
 0x6d2   : > { %2530 = vperm.xlu1 %2857, %v4336_v7   ;;  %v1703_v51 = vpop.permute.xlu0 %1702 }
 0x6d3   : > { %v1720_v11 = vmul.f32 %v4296_v13, %v1703_v51 }
 0x6d5   : > { %v1752_v26 = vpack.c.bf16 %v1720_v11, %v1720_v11 }
 0x6d7   : > { %v1901_v22 = vunpack.c.l.b16 %v1752_v26 }
 0x6d9   : > { %v1903_v21 = vpack.c.b16 %v1901_v22, %v1900_v46  ;;  %v2235_v22 = vand.u32 2147483648, %v2192_v35 }
 0x6da   : > { %2540 = vperm.xlu1 %2857, %v1736_v27  }
 0x6db   : > { %2764 = vmatmul.msk.bf16.gmra.mxu2 %vm1000_vm7, %v1903_v21 }
 0x6e3   : > { %2304 = vrot.lane.b32.xlu0 %v4630_v23, %s3224_s16  ;;  %v2233_v23 = vand.u32 2147483647, %v2192_v35 }
 0x6eb   : > { %2258 = vrot.lane.b32.xlu0 %v4631_v25, %s3224_s16  ;;  %s2780_s16 = sshll.u32 %s3291_s25, 5  ;;  %s2607_s25 = sshll.u32 %s4480_s14, 4  ;;  %s2608_s25 = int_to_ptr.vmem [resolvable:$true] %s2607_s25 }
 0x6ec   : > { %s2606_s19 = scalar_lea.hbm %s4568_s6, %s2780_s16 }
 0x6ed   : > { %s2609_s20 = sshll.u32 %s2606_s19, 4  ;;  %s2610_s20 = int_to_ptr.hbm [resolvable:$true] %s2609_s20 }
 0x6ee   : > { %s3160_s29 = sshra.s32 %s2610_s20, 4  ;;  %s3161_s29 = int_to_ptr.hbm [resolvable:$true] %s3160_s29 }
 0x6ef   : > { %s3162_s9 = scalar_lea.hbm %s3161_s29, 32  ;;  %p3167_p3 = scmp.lt.s32.totalorder %s3161_s29, %s4568_s6 }
 0x6f0   : > { %p3163_p0 = scmp.ne.s32.totalorder %s3161_s29, %s3162_s9 }
 0x6f2   : > { %p3164_p1 = pnand %p3163_p0, %p3308_p5 }
 0x6f3   : > { %2454 = vperm.xlu0 %2856, %v4126_v58  }
 0x6f4   : > { %v2179_v7 = vpop.xlane.xlu1 %2178  ;;  %p3165_p2 = pneg %p3164_p1 }
 0x6f5   : > { %vm2187_vm4 = vcmp.eq.f32.partialorder %v2179_v7, 0.0 }
 0x6f6   : > { %v2191_v13 = vsel %vm2187_vm4, 1.0, %v2179_v7  ;;  %vm2234_vm4 = vcmp.eq.f32.partialorder %v2233_v23, 8.507059e+37 }
 0x6f7   : > { %3078 = vrcp.f32 %v2191_v13  ;;  %v2220_v10 = vand.u32 2147483648, %v2191_v13  ;;  %v2218_v54 = vand.u32 2147483647, %v2191_v13  ;;  %vm2214_vm5 = vweird.f32 %v2191_v13 }
 0x6f8   : > { %3080 = vrcp.f32 %v2192_v35 }
 0x6f9   : > { %v2221_v12 = vor.u32 1.1754944e-38, %v2220_v10  ;;  %vm2219_vm9 = vcmp.eq.f32.partialorder %v2218_v54, 8.507059e+37  ;;  %v2236_v10 = vor.u32 1.1754944e-38, %v2235_v22 }
 0x6fb   : > { %2393 = vperm.xlu0 %2856, %v4139_v61  }
 0x6fd   : > { %v3079_v36 = vpop.eup %3078 }
 0x6fe   : > { %v2210_v6 = vmul.f32 %v3079_v36, %v2191_v13  ;;  %vm2215_vm0 = vweird.f32 %v3079_v36  ;;  %v3081_v45 = vpop.eup %3080 }
 0x6ff   : > { %vm2216_vm3 = vmor %vm2214_vm5, %vm2215_vm0  ;;  %v2225_v34 = vmul.f32 %v3081_v45, %v2192_v35  ;;  %vm2230_vm15 = vweird.f32 %v3081_v45 }
 0x700   : > { %v2211_v56 = vsub.f32 1.0, %v2210_v6  ;;  %vm4429_vm10 = vmor %vm2229_vm11, %vm2230_vm15  ;;  %vm2450_vm15 = vcmask 254080   ;;  %vm2521_vm11 = vcmask 385280  }
 0x701   : > { %v2226_v15 = vsub.f32 1.0, %v2225_v34 }
 0x702   : > { %v2212_v31 = vmul.f32 %v3079_v36, %v2211_v56 }
 0x703   : > { %2459 = vperm.xlu0 %2856, %v4133_v49   ;;  %v2227_v51 = vmul.f32 %v3081_v45, %v2226_v15 }
 0x704   : > { %v2213_v59 = vadd.f32 %v3079_v36, %v2212_v31 }
 0x705   : > { %v2228_v27 = vadd.f32 %v3081_v45, %v2227_v51 }
 0x706   : > { %v2217_v58 = vsel %vm2216_vm3, %v3079_v36, %v2213_v59 }
 0x707   : > { %v2222_v32 = vsel %vm2219_vm9, %v2221_v12, %v2217_v58  ;;  %v2232_v6 = vsel %vm4429_vm10, %v3081_v45, %v2228_v27  ;;  %vm2592_vm10 = vcmask 516480  }
 0x708   : > { %v2223_v53 = vmul.f32 %v3075_v42, %v2222_v32  ;;  %v2237_v58 = vsel %vm2234_vm4, %v2236_v10, %v2232_v6 }
 0x709   : > { %v2238_v16 = vmul.f32 %v4366_v40, %v2237_v58 }
 0x70a   : > { %v2255_v18 = vpack.c.bf16 %v2223_v53, %v2223_v53 }
 0x70b   : > { %2469 = vperm.xlu0 %2856, %v4176_v9   ;;  %v2303_v9 = vpop.permute.xlu2 %2302 }
 0x70c   : > { %v2327_v61 = vpop.permute.xlu1 %2326  ;;  %2770 = vmatmul.msk.bf16.vlgmr.msra.gmra.mxu3 %vm1000_vm7, %v2255_v18 }
 0x70d   : > { %2339 = vmatpush.bf16.msra.mxu1 %v2327_v61 }
 0x713   : > { %2535 = vperm.xlu0 %2856, %v4355_v57   ;;  %v2176_v57 = vpop.xlane.xlu2 %2175 }
 0x714   : > { %v2325_v48 = vpop.permute.xlu1 %2324  ;;  %vm2186_vm6 = vcmp.eq.f32.partialorder %v2176_v57, 0.0 }
 0x715   : > { %2340 = vmatpush.bf16.msra.mxu1 %v2325_v48  ;;  %v2190_v39 = vsel %vm2186_vm6, 1.0, %v2176_v57  ;;  %vm2441_vm6 = vcmask 261248  }
 0x716   : > { %3082 = vrcp.f32 %v2190_v39  ;;  %v2205_v31 = vand.u32 2147483648, %v2190_v39  ;;  %vm2199_vm0 = vweird.f32 %v2190_v39  ;;  %v2203_v59 = vand.u32 2147483647, %v2190_v39 }
 0x718   : > { %v2206_v48 = vor.u32 1.1754944e-38, %v2205_v31  ;;  %vm2204_vm13 = vcmp.eq.f32.partialorder %v2203_v59, 8.507059e+37 }
 0x71b   : > { %v2526_v15 = vpop.permute.xlu2 %2525 }
 0x71c   : > { %v2261_v49 = vpop.permute.xlu1 %2260  ;;  %v3083_v62 = vpop.eup %3082  ;;  %v2543_v51 = vmul.f32 %v2526_v15, %v4423_v47 }
 0x71d   : > { %2273 = vmatpush.bf16.msrb.mxu2 %v2261_v49  ;;  %v2195_v60 = vmul.f32 %v3083_v62, %v2190_v39  ;;  %vm2200_vm2 = vweird.f32 %v3083_v62 }
 0x71e   : > { %vm2201_vm3 = vmor %vm2199_vm0, %vm2200_vm2 }
 0x71f   : > { %v2196_v20 = vsub.f32 1.0, %v2195_v60 }
 0x721   : > { %v2197_v46 = vmul.f32 %v3083_v62, %v2196_v20 }
 0x723   : > { %v2198_v56 = vadd.f32 %v3083_v62, %v2197_v46 }
 0x724   : > { %v2384_v41 = vpop.permute.xlu1 %2383 }
 0x725   : > { %v2401_v42 = vmul.f32 %v2384_v41, %v4423_v47  ;;  %v2202_v53 = vsel %vm2201_vm3, %v3083_v62, %v2198_v56 }
 0x726   : > { %v2207_v4 = vsel %vm2204_vm13, %v2206_v48, %v2202_v53 }
 0x727   : > { %2409 = vrot.lane.b32.xlu0 %v2401_v42, %s3223_s15  ;;  %v2208_v42 = vmul.f32 %v4385_v2, %v2207_v4 }
 0x729   : > { %v2254_v57 = vpack.c.bf16 %v2208_v42, %v2208_v42 }
 0x72c   : > { %v2389_v19 = vpop.permute.xlu1 %2388 }
 0x72d   : > { %v2402_v63 = vmul.f32 %v2389_v19, %v4423_v47  ;;  %v2256_v19 = vpack.c.bf16 %v2238_v16, %v2238_v16 }
 0x72f   : > { %2411 = vrot.lane.b32.xlu0 %v2402_v63, %s3223_s15 }
 0x742   : > { %v2185_v43 = vpop.xlane.xlu0 %2184 }
 0x743   : > { %vm2189_vm8 = vcmp.eq.f32.partialorder %v2185_v43, 0.0 }
 0x744   : > { %v2193_v8 = vsel %vm2189_vm8, 1.0, %v2185_v43  ;;  %vm2512_vm8 = vcmask 392448  }
 0x745   : > { %3084 = vrcp.f32 %v2193_v8  ;;  %v2250_v25 = vand.u32 2147483648, %v2193_v8  ;;  %v2248_v36 = vand.u32 2147483647, %v2193_v8  ;;  %vm2244_vm14 = vweird.f32 %v2193_v8 }
 0x747   : > { %v2251_v12 = vor.u32 1.1754944e-38, %v2250_v25  ;;  %vm2249_vm9 = vcmp.eq.f32.partialorder %v2248_v36, 8.507059e+37  ;;  %v1931_v36 = vpop.f32.mrf.mxu2 }
 0x74b   : > { %v3085_v11 = vpop.eup %3084 }
 0x74c   : > { %v2240_v26 = vmul.f32 %v3085_v11, %v2193_v8  ;;  %vm2245_vm1 = vweird.f32 %v3085_v11 }
 0x74d   : > { %vm2246_vm5 = vmor %vm2244_vm14, %vm2245_vm1 }
 0x74e   : > { %v2241_v21 = vsub.f32 1.0, %v2240_v26 }
 0x74f   : > { %v1933_v6 = vpop.f32.mrf.mxu2 }
 0x750   : > { %v2242_v13 = vmul.f32 %v3085_v11, %v2241_v21 }
 0x752   : > { %v2243_v54 = vadd.f32 %v3085_v11, %v2242_v13 }
 0x754   : > { %v2247_v32 = vsel %vm2246_vm5, %v3085_v11, %v2243_v54 }
 0x755   : > { %v2252_v18 = vsel %vm2249_vm9, %v2251_v12, %v2247_v32  ;;  %v2305_v61 = vpop.permute.xlu0 %2304 }
 0x756   : > { %v2253_v49 = vmul.f32 %v4403_v3, %v2252_v18  ;;  %2317 = vmatpush.bf16.msra.mxu0 %v2305_v61  ;;  %v2399_v3 = vpop.permute.xlu1 %2398 }
 0x758   : > { %v2257_v41 = vpack.c.bf16 %v2253_v49, %v2253_v49 }
 0x75a   : > { %2318 = vmatpush.bf16.msra.mxu0 %v2303_v9  ;;  %2772 = vmatmul.msk.bf16.vlgmr.msra.gmra.mxu1 %vm1000_vm7, %v2257_v41  ;;  %v2404_v9 = vmul.f32 %v2399_v3, %v4423_v47 }
 0x75d   : > { %v2259_v63 = vpop.permute.xlu0 %2258  ;;  %2771 = vmatmul.msk.bf16.vlgmr.msra.gmra.mxu0 %vm1000_vm7, %v2256_v19 }
 0x75e   : > { %2274 = vmatpush.bf16.msrb.mxu2 %v2259_v63  ;;  %v2465_v2 = vpop.permute.xlu1 %2464 }
 0x75f   : > { %v2474_v62 = vmul.f32 %v2465_v2, %v4423_v47 }
 0x761   : > { %2769 = vmatmul.msk.bf16.vlgmr.msrb.gmra.mxu2 %vm1000_vm7, %v2254_v57  ;;  %vm2379_vm7 = vcmask 122880  }
 0x765   : > { %v2455_v35 = vpop.permute.xlu0 %2454 }
 0x766   : > { %v2472_v40 = vmul.f32 %v2455_v35, %v4423_v47  ;;  %v2531_v8 = vpop.permute.xlu1 %2530 }
 0x767   : > { %v2544_v20 = vmul.f32 %v2531_v8, %v4423_v47 }
 0x768   : > { %2480 = vrot.lane.b32.xlu1 %v2472_v40, %s3225_s17 }
 0x76d   : > { %v2394_v39 = vpop.permute.xlu0 %2393 }
 0x76e   : > { %v2403_v45 = vmul.f32 %v2394_v39, %v4423_v47  ;;  %v2541_v26 = vpop.permute.xlu1 %2540 }
 0x76f   : > { %v2546_v46 = vmul.f32 %v2541_v26, %v4423_v47 }
 0x770   : > { %2413 = vrot.lane.b32.xlu2 %v2403_v45, %s3223_s15  ;;  %2415 = vrot.lane.b32.xlu1 %v2404_v9, %s3223_s15  ;;  %s3232_s15 = smov 48  }
 0x775   : > { %v2460_v34 = vpop.permute.xlu0 %2459 }
 0x776   : > { %v2473_v43 = vmul.f32 %v2460_v34, %v4423_v47 }
 0x778   : > { %2484 = vrot.lane.b32.xlu2 %v2474_v62, %s3225_s17  ;;  %2482 = vrot.lane.b32.xlu0 %v2473_v43, %s3225_s17 }
 0x77d   : > { %v2470_v60 = vpop.permute.xlu0 %2469 }
 0x77e   : > { %v2475_v11 = vmul.f32 %v2470_v60, %v4423_v47 }
 0x780   : > { %2553 = vrot.lane.b32.xlu2 %v2544_v20, %s3227_s18  ;;  %2551 = vrot.lane.b32.xlu0 %v2543_v51, %s3227_s18 }
 0x781   : > { %2486 = vrot.lane.b32.xlu1 %v2475_v11, %s3225_s17 }
 0x785   : > { %v2536_v27 = vpop.permute.xlu0 %2535 }
 0x786   : > { %v2545_v22 = vmul.f32 %v2536_v27, %v4423_v47 }
 0x788   : > { %2348 = vperm.xlu2 %2898, %v4056_v1   ;;  %2557 = vrot.lane.b32.xlu0 %v2546_v46, %s3227_s18 }
 0x789   : > { %2555 = vrot.lane.b32.xlu1 %v2545_v22, %s3227_s18 }
 0x78f   : > { %v2298_v21 = vpop.f32.mrf.mxu3 }
 0x790   : > { %2363 = vperm.xlu2 %2898, %v4087_v44   ;;  %2358 = vperm.xlu0 %2856, %v4130_v17  }
 0x791   : > { %2353 = vperm.xlu1 %2857, %v4063_v29   ;;  %v1936_v29 = vpop.f32.mrf.mxu2 }
 0x797   : > { %v2300_v23 = vpop.f32.mrf.mxu3 }
 0x799   : > { %v2410_v25 = vpop.permute.xlu0 %2409  ;;  %v1938_v59 = vpop.f32.mrf.mxu2 }
 0x79a   : > { %v2421_v7 = vadd.f32 %v2410_v25, %v4278_v52 }
 0x79c   : > { %2429 = vrot.lane.b32.xlu1 %v2421_v7, %s3230_s28 }
 0x7a1   : > { %v2412_v13 = vpop.permute.xlu0 %2411 }
 0x7a2   : > { %v2422_v1 = vadd.f32 %v2412_v13, %v4281_v55 }
 0x7a4   : > { %2431 = vrot.lane.b32.xlu1 %v2422_v1, %s3230_s28 }
 0x7ca   : > { %v2414_v44 = vpop.permute.xlu2 %2413 }
 0x7cb   : > { %v2423_v17 = vadd.f32 %v2414_v44, %v4287_v28 }
 0x7cd   : > { %2433 = vrot.lane.b32.xlu0 %v2423_v17, %s3230_s28 }
 0x7d2   : > { %v2485_v56 = vpop.permute.xlu2 %2484 }
 0x7d3   : > { %v2494_v4 = vadd.f32 %v2485_v56, %v4302_v0 }
 0x7d7   : > { %v2342_v52 = vpop.f32.mrf.mxu1 }
 0x7da   : > { %v2320_v10 = vpop.f32.mrf.mxu0  ;;  %v2554_v31 = vpop.permute.xlu2 %2553 }
 0x7db   : > { %v2481_v54 = vpop.permute.xlu1 %2480  ;;  %v2564_v57 = vadd.f32 %v2554_v31, %v1933_v6 }
 0x7dc   : > { %v2492_v55 = vadd.f32 %v2481_v54, %v4289_v30 }
 0x7de   : > { %2500 = vrot.lane.b32.xlu2 %v2492_v55, %s3231_s11 }
 0x7df   : > { %v2344_v12 = vpop.f32.mrf.mxu1 }
 0x7e2   : > { %v2322_v58 = vpop.f32.mrf.mxu0  ;;  %v2349_v28 = vpop.permute.xlu2 %2348 }
 0x7e3   : > { %v2367_v32 = vmul.f32 %v4423_v47, %v2349_v28  ;;  %v2416_v53 = vpop.permute.xlu1 %2415 }
 0x7e4   : > { %v2424_v18 = vadd.f32 %v2416_v53, %v4292_v50  ;;  %v2276_v61 = vpop.f32.mrf.mxu2 }
 0x7e5   : > { %v2371_v48 = vadd.f32 %v2367_v32, %v4250_v14 }
 0x7e6   : > { %2435 = vrot.lane.b32.xlu2 %v2424_v18, %s3230_s28 }
 0x7e7   : > { %2375 = vst.msk [vmem:[%s4480_s14] sm:$0xff] %vm771_vm12, %v2371_v48 }
 0x7e8   : > { %2380 = vst.msk [vmem:[%s4480_s14] sm:$0x1] %vm2379_vm7, %v2276_v61 }
 0x7ea   : > { %v2364_v30 = vpop.permute.xlu2 %2363  ;;  %v2483_v49 = vpop.permute.xlu0 %2482 }
 0x7eb   : > { %v2370_v16 = vmul.f32 %v4423_v47, %v2364_v30  ;;  %v2493_v50 = vadd.f32 %v2483_v49, %v4294_v33 }
 0x7ec   : > { %v2278_v14 = vpop.f32.mrf.mxu2 }
 0x7ed   : > { %v2374_v41 = vadd.f32 %v2370_v16, %v4267_v37  ;;  %2502 = vrot.lane.b32.xlu0 %v2493_v50, %s3231_s11 }
 0x7ee   : > { %2504 = vrot.lane.b32.xlu2 %v2494_v4, %s3231_s11 }
 0x7ef   : > { %2378 = vst.msk [vmem:[%s4480_s14 + $0x18] sm:$0xff] %vm771_vm12, %v2374_v41 }
 0x7f2   : > { %v2552_v42 = vpop.permute.xlu0 %2551 }
 0x7f3   : > { %v2487_v19 = vpop.permute.xlu1 %2486  ;;  %v2563_v63 = vadd.f32 %v2552_v42, %v1931_v36 }
 0x7f4   : > { %v2495_v3 = vadd.f32 %v2487_v19, %v4304_v24 }
 0x7f5   : > { %2571 = vrot.lane.b32.xlu0 %v2563_v63, %s3232_s15 }
 0x7f6   : > { %2573 = vrot.lane.b32.xlu2 %v2564_v57, %s3232_s15  ;;  %2506 = vrot.lane.b32.xlu1 %v2495_v3, %s3231_s11 }
 0x7fa   : > { %v2558_v33 = vpop.permute.xlu0 %2557 }
 0x7fb   : > { %v2556_v37 = vpop.permute.xlu1 %2555  ;;  %v2566_v35 = vadd.f32 %v2558_v33, %v1938_v59 }
 0x7fc   : > { %v2565_v39 = vadd.f32 %v2556_v37, %v1936_v29 }
 0x7fd   : > { %2447 = vrot.lane.b32.xlu0 %v2298_v21, %s3230_s28 }
 0x7fe   : > { %2589 = vrot.lane.b32.xlu2 %v2342_v52, %s3232_s15  ;;  %2518 = vrot.lane.b32.xlu1 %v2320_v10, %s3231_s11  ;;  %s3166_s11 = scalar_lea.hbm %s4568_s6, 64 }
 0x7ff   : > { %p3168_p4 = scmp.lt.s32.totalorder %s3166_s11, %s3162_s9 }
 0x801   : > { %p3169_p7 = por %p3168_p4, %p3167_p3 }
 0x802   : > { %v2359_v0 = vpop.permute.xlu0 %2358 }
 0x803   : > { %v2354_v40 = vpop.permute.xlu1 %2353  ;;  %v2369_v24 = vmul.f32 %v4423_v47, %v2359_v0  ;;  %p3170_p8 = pnand %p3169_p7, %p3165_p2 }
 0x804   : > { %v2368_v9 = vmul.f32 %v4423_v47, %v2354_v40 }
 0x805   : > { %v2373_v45 = vadd.f32 %v2369_v24, %v4265_v5  ;;  %2577 = vrot.lane.b32.xlu0 %v2566_v35, %s3232_s15 }
 0x806   : > { %v2372_v2 = vadd.f32 %v2368_v9, %v4257_v38  ;;  %2575 = vrot.lane.b32.xlu1 %v2565_v39, %s3232_s15 }
 0x807   : > { %2377 = vst.msk [vmem:[%s4480_s14 + $0x10] sm:$0xff] %vm771_vm12, %v2373_v45 }
 0x808   : > { %2376 = vst.msk [vmem:[%s4480_s14 + $0x8] sm:$0xff] %vm771_vm12, %v2372_v2  ;;  %vm2583_vm12 = vcmask 523648  }
 0x80e   : > { %v2430_v34 = vpop.permute.xlu1 %2429 }
 0x80f   : > { %2442 = vst.msk [vmem:[%s4480_s14] sm:$0xff] %vm2441_vm6, %v2430_v34 }
 0x816   : > { %v2432_v62 = vpop.permute.xlu1 %2431 }
 0x817   : > { %2443 = vst.msk [vmem:[%s4480_s14 + $0x8] sm:$0xff] %vm2441_vm6, %v2432_v62 }
 0x838   : > { %v2501_v47 = vpop.permute.xlu2 %2500 }
 0x83f   : > { %v2434_v43 = vpop.permute.xlu0 %2433 }
 0x840   : > { %v2436_v5 = vpop.permute.xlu2 %2435  ;;  %2444 = vst.msk [vmem:[%s4480_s14 + $0x10] sm:$0xff] %vm2441_vm6, %v2434_v43 }
 0x841   : > { %2445 = vst.msk [vmem:[%s4480_s14 + $0x18] sm:$0xff] %vm2441_vm6, %v2436_v5 }
 0x848   : > { %v2505_v38 = vpop.permute.xlu2 %2504 }
 0x849   : > { %2515 = vst.msk [vmem:[%s4480_s14 + $0x10] sm:$0xff] %vm2512_vm8, %v2505_v38 }
 0x850   : > { %v2574_v15 = vpop.permute.xlu2 %2573 }
 0x858   : > { %v2590_v26 = vpop.permute.xlu2 %2589 }
 0x85f   : > { %v2503_v8 = vpop.permute.xlu0 %2502 }
 0x860   : > { %2514 = vst.msk [vmem:[%s4480_s14 + $0x8] sm:$0xff] %vm2512_vm8, %v2503_v8 }
 0x861   : > { %2585 = vst.msk [vmem:[%s4480_s14 + $0x8] sm:$0xff] %vm2583_vm12, %v2574_v15 }
 0x867   : > { %v2572_v60 = vpop.permute.xlu0 %2571 }
 0x868   : > { %v2507_v51 = vpop.permute.xlu1 %2506 }
 0x869   : > { %2516 = vst.msk [vmem:[%s4480_s14 + $0x18] sm:$0xff] %vm2512_vm8, %v2507_v51 }
 0x86f   : > { %v2448_v20 = vpop.permute.xlu0 %2447 }
 0x870   : > { %v2519_v11 = vpop.permute.xlu1 %2518  ;;  %2451 = vst.msk [vmem:[%s4480_s14] sm:$0x1] %vm2450_vm15, %v2448_v20 }
 0x871   : > { %2513 = vst.msk [vmem:[%s4480_s14] sm:$0xff] %vm2512_vm8, %v2501_v47 }
 0x872   : > { %2522 = vst.msk [vmem:[%s4480_s14] sm:$0x1] %vm2521_vm11, %v2519_v11 }
 0x873   : > { %2584 = vst.msk [vmem:[%s4480_s14] sm:$0xff] %vm2583_vm12, %v2572_v60 }
 0x874   : > { %2593 = vst.msk [vmem:[%s4480_s14] sm:$0x1] %vm2592_vm10, %v2590_v26 }
 0x877   : > { %v2578_v27 = vpop.permute.xlu0 %2577 }
 0x878   : > { %v2576_v46 = vpop.permute.xlu1 %2575  ;;  %2587 = vst.msk [vmem:[%s4480_s14 + $0x18] sm:$0xff] %vm2583_vm12, %v2578_v27 }
 0x879   : > { %2586 = vst.msk [vmem:[%s4480_s14 + $0x10] sm:$0xff] %vm2583_vm12, %v2576_v46 }
 0x87a   : > { %3173 = shalt.err (!%p3170_p8)
}
 0x87b   : > { %s3233_s12 = smov 128   ;;  %s3234_s14 = smov 8  }
 0x87c   : > { %2789 = dma.vmem_to_hbm [thread:$0]  (%p3308_p5), %s2608_s25, 512, %s2610_s20, %s2595_s26, %s3233_s12, %s3233_s12, %s3234_s14  }
 0x87d PF: > { %p2806_p9 = scmp.ge.s32.totalorder %s3216_s24, 2  ;;  %s2624_s16 = sand.u32 1, %s3204_s21  }
 0x87e   : > { %s2625_s17 = scalar_lea.sflag [#allocation4], %s2624_s16 }
 0x87f   : > { %p2799_p10 = pnand %p2806_p9, %p3312_p6 }
 0x881   : > { %p2800_p11 = pneg %p2799_p10 }
 0x883   : > { %3199 = dma.done.wait (%p2800_p11), %s2625_s17, 512  }
 0x884   : > { %3201 = vsyncadd (%p2800_p11), %s2625_s17, 4294966784  ;;  %p18_p12 = scmp.ge.s32.totalorder %s3295_s27, 4   ;;  %s4635_s21 = smov %s3208_s22 }
 0x885   : > { %s4636_s22 = smov %s3212_s23  ;;  %s4637_s23 = smov %s3306_s30 }
 0x886   : > { %s4638_s24 = smov %s3295_s27  ;;  %20 = sbr.rel (!%p18_p12) target bundleno = 5 (0x5), region = 97 }
 0x88b   :  { %2631 = vsyncpa [#allocation3], 1 }
 0x88c   :  { %2633 = vsyncpa [#allocation3 + $0x1], 1 }
 0x88d   :  { %2634 = vsyncpa [#allocation6], 1 }
 0x88e   :  { %2635 = vsyncpa [#allocation4], 1 }
 0x88f   :  { %2637 = vsyncpa [#allocation4 + $0x1], 1 }

</bundles_post_ra>
